<compile_context>
chip_gen: v7x
topology: tpu7x:2x2x1
jax: 0.10.0
libtpu: 0.0.40
codegen_flags: <defaults>
</compile_context>

<pallas_src>
import math
import numpy as np
import jax
import jax.numpy as jnp
from jax import lax
from jax.experimental import pallas as pl
from jax.experimental.pallas import tpu as pltpu

# ----- small, deterministic demo configuration (consistent with the module) -----
BATCH = 2
IN_CHANS = 3
INPUT_SIZE = 16
PATCH = 4                                   # patch_size
K = 3                                       # conv kernel_size
DEPTH = 2
DEPTH_MLP = 3
DIM_PER_GROUP = 8
NUM_PATCHES = (INPUT_SIZE // PATCH) ** 2    # 16
DIM = DIM_PER_GROUP * NUM_PATCHES           # 128
NUM_CLASSES = 16
KK = K * K
N_ROWS = BATCH * PATCH * PATCH              # 32 flattened (b, h, w) rows
CIN_STEM = IN_CHANS * NUM_PATCHES           # 48 (zero-padded to DIM channels for the stem)
BN_EPS = 1e-5
PAD = (K - 1) // 2
_INV_SQRT2 = 1.0 / math.sqrt(2.0)
TAP_OFFSETS = tuple((dh, dw) for dh in (-1, 0, 1) for dw in (-1, 0, 1))

assert K <= PATCH                           # BagNetPatch asserts this too
assert INPUT_SIZE % PATCH == 0              # demo uses the no-padding branch of the module
assert NUM_CLASSES <= DIM
# Roll-based im2col invariant: a VALID tap offset never leaves its image's P*P row block, so the
# circular wrap of pltpu.roll only corrupts rows that the precomputed edge masks zero out.
assert PAD * PATCH + PAD < PATCH * PATCH


# ---------------------------------------------------------------------------
# shared math helpers (used by kernel AND reference so matmul numerics match)
# ---------------------------------------------------------------------------
def _bdot(a, b):
    """Single-pass MXU matmul: bf16 operands, f32 accumulation."""
    return jnp.dot(a.astype(jnp.bfloat16), b.astype(jnp.bfloat16),
                   preferred_element_type=jnp.float32)


def _erf_approx(x):
    # Abramowitz & Stegun 7.1.26 (max abs err ~1.5e-7) == nn.GELU()'s exact erf at f32 precision.
    # The 1/(1+p*z) uses pl.reciprocal(approx=True): relative error ~2^-12 feeding the polynomial
    # is far inside the 5e-3 check, and it stays on the EUP slot (no VALU Newton refinement).
    a1, a2, a3, a4, a5 = 0.254829592, -0.284496736, 1.421413741, -1.453152027, 1.061405429
    p = 0.3275911
    sign = jnp.where(x >= 0.0, 1.0, -1.0)
    z = jnp.abs(x)
    t = pl.reciprocal(1.0 + p * z, approx=True)
    poly = ((((a5 * t + a4) * t + a3) * t + a2) * t + a1) * t
    return sign * (1.0 - poly * jnp.exp(-z * z))


def _gelu_exact(x):
    return 0.5 * x * (1.0 + _erf_approx(x * _INV_SQRT2))


# ---------------------------------------------------------------------------
# the fused Pallas kernel
# ---------------------------------------------------------------------------
def _bagnet_fused_kernel(x_ref, pos_ref, mask_ref, conv_w_ref, conv_v_ref,
                         mlp_w_ref, vec2_ref, head_w_ref, out_ref):
    mvals = mask_ref[...]                               # (N_ROWS, DIM); lane `tap` = 0/1 edge mask

    def conv_gelu_bn(y2d, layer, extra):
        """Grouped 3x3 conv as 9 accumulating per-tap MXU dots + bias + GELU + eval BN + add."""
        acc = jnp.zeros((N_ROWS, DIM), jnp.float32)
        for tap, (dh, dw) in enumerate(TAP_OFFSETS):
            off = dh * PATCH + dw                       # row shift inside one image's P*P rows
            if off == 0:
                tap_val = y2d                           # center tap: always valid, no mask needed
            else:
                # XLU sublane rotation on the vreg-resident activation (no VMEM round trip);
                # wrap-corrupted rows are exactly the rows the mask zeroes.
                rolled = pltpu.roll(y2d, shift=(-off) % N_ROWS, axis=0)
                tap_val = rolled * mvals[:, tap:tap + 1]
            acc = acc + _bdot(tap_val, conv_w_ref[layer, pl.ds(tap * DIM, DIM), :])
        acc = acc + conv_v_ref[layer, 0:1, :]           # conv bias
        y = _gelu_exact(acc)                            # nn.GELU()
        return y * conv_v_ref[layer, 1:2, :] + conv_v_ref[layer, 2:3, :] + extra  # BN + pos/resid

    # stem (+ pos_embedding), then `depth` residual blocks -- activations never leave vregs/VMEM
    y = conv_gelu_bn(x_ref[...], 0, pos_ref[...])
    for i in range(DEPTH):
        y = conv_gelu_bn(y, 1 + i, y)

    # tanh -> global average pool, entirely in vregs (no pool scratch, no partial stores)
    t = jnp.tanh(y)
    pp = PATCH * PATCH
    h = jnp.concatenate(
        [jnp.mean(t[b * pp:(b + 1) * pp, :], axis=0, keepdims=True) for b in range(BATCH)],
        axis=0)                                         # (BATCH, DIM)

    # MLP (Linear+ReLU) x DEPTH_MLP, then head (padded to 128 lanes -> lane-dense output store)
    for i in range(DEPTH_MLP):
        h = jnp.maximum(_bdot(h, mlp_w_ref[i]) + vec2_ref[i:i + 1, :], 0.0)
    out_ref[...] = _bdot(h, head_w_ref[...]) + vec2_ref[DEPTH_MLP:DEPTH_MLP + 1, :]


# ---------------------------------------------------------------------------
# plain-JAX glue (layout plumbing, parameter packing)
# ---------------------------------------------------------------------------
def patchify_to_rows(x):
    """NCHW -> (N_ROWS, DIM) channels-last rows ordered (b, patch_row, patch_col).

    Mirrors F.unfold(kernel=stride=P).transpose(-2,-1).reshape(B,-1,P,P): channel = l*IN_CHANS + c.
    The stem's CIN_STEM=48 channels are zero-padded to DIM=128 lanes (matching zero weight rows).
    """
    b, c, h, w = x.shape
    hp, wp = h // PATCH, w // PATCH
    x6 = x.reshape(b, c, hp, PATCH, wp, PATCH)
    x6 = jnp.transpose(x6, (0, 3, 5, 2, 4, 1))          # (B, ph, pw, hp, wp, C)
    x2 = x6.reshape(b * PATCH * PATCH, hp * wp * c)     # (N_ROWS, CIN_STEM)
    return jnp.pad(x2, ((0, 0), (0, DIM - CIN_STEM)))


def _pos_rows(params):
    return jnp.broadcast_to(params["pos"].reshape(1, PATCH * PATCH, DIM),
                            (BATCH, PATCH * PATCH, DIM)).reshape(N_ROWS, DIM)


def pack_grouped_conv(w, groups):
    """PyTorch grouped-conv weight (Cout, Cin_g, K, K) -> one (KK*DIM, Cout) tap-major matrix.

    Block-diagonal (groups) dense embedding, Cin zero-padded to DIM, taps stacked along rows.
    """
    cout_tot, cin_g, k, _ = w.shape
    dpg = cout_tot // groups
    wt = w.reshape(groups, dpg, cin_g, k * k)
    wt = jnp.transpose(wt, (0, 3, 2, 1))                # (G, KK, Cin_g, dpg)
    eye = jnp.eye(groups, dtype=w.dtype)
    dense = jnp.einsum("gh,hkic->kgihc", eye, wt)       # (KK, G, Cin_g, G, dpg)
    dense = dense.reshape(k * k, groups * cin_g, cout_tot)
    cin_tot = groups * cin_g
    if cin_tot < DIM:
        dense = jnp.pad(dense, ((0, 0), (0, DIM - cin_tot), (0, 0)))
    return dense.reshape(k * k * DIM, cout_tot)


def make_tap_masks():
    """Host-precomputed lane-compact edge masks: mask[r, tap] = 1 iff 3x3 tap `tap` is in-bounds."""
    r = np.arange(N_ROWS)
    hh = (r // PATCH) % PATCH
    ww = r % PATCH
    m = np.zeros((N_ROWS, DIM), np.float32)
    for tap, (dh, dw) in enumerate(TAP_OFFSETS):
        valid = (hh + dh >= 0) & (hh + dh < PATCH) & (ww + dw >= 0) & (ww + dw < PATCH)
        m[:, tap] = valid.astype(np.float32)
    return jnp.asarray(m)


def make_bn(key, c):
    k1, k2, k3, k4 = jax.random.split(key, 4)
    gamma = 1.0 + 0.1 * jax.random.normal(k1, (c,), jnp.float32)
    beta = 0.1 * jax.random.normal(k2, (c,), jnp.float32)
    mean = 0.1 * jax.random.normal(k3, (c,), jnp.float32)
    var = 0.5 + jax.random.uniform(k4, (c,), jnp.float32)
    scale = gamma / jnp.sqrt(var + BN_EPS)
    shift = beta - mean * scale
    return scale, shift


def init_params(key):
    ks = iter(jax.random.split(key, 64))
    p = {}
    p["pos"] = jax.random.normal(next(ks), (PATCH, PATCH, DIM), jnp.float32)   # pos_embedding (HWC)

    conv_w, conv_v = [], []
    # stem conv (Cin = IN_CHANS per group)
    w = jax.random.normal(next(ks), (DIM, IN_CHANS, K, K), jnp.float32) / math.sqrt(IN_CHANS * K * K)
    conv_w.append(pack_grouped_conv(w, NUM_PATCHES))
    b = 0.02 * jax.random.normal(next(ks), (DIM,), jnp.float32)
    sc, sh = make_bn(next(ks), DIM)
    conv_v.append(jnp.stack([b, sc, sh]))
    # residual block convs (Cin = DIM_PER_GROUP per group)
    for _ in range(DEPTH):
        w = jax.random.normal(next(ks), (DIM, DIM_PER_GROUP, K, K), jnp.float32) / math.sqrt(DIM_PER_GROUP * K * K)
        conv_w.append(pack_grouped_conv(w, NUM_PATCHES))
        b = 0.02 * jax.random.normal(next(ks), (DIM,), jnp.float32)
        sc, sh = make_bn(next(ks), DIM)
        conv_v.append(jnp.stack([b, sc, sh]))
    p["conv_w"] = jnp.stack(conv_w).astype(jnp.bfloat16)   # (1+DEPTH, KK*DIM, DIM), bf16 pre-cast
    p["conv_v"] = jnp.stack(conv_v)                        # (1+DEPTH, 3, DIM): bias / BN scale / BN shift

    mlp_w, vec2 = [], []
    for _ in range(DEPTH_MLP):
        mlp_w.append(jax.random.normal(next(ks), (DIM, DIM), jnp.float32) / math.sqrt(DIM))
        vec2.append(0.02 * jax.random.normal(next(ks), (DIM,), jnp.float32))
    p["mlp_w"] = jnp.stack(mlp_w).astype(jnp.bfloat16)     # (DEPTH_MLP, DIM, DIM), bf16 pre-cast

    head_w = jax.random.normal(next(ks), (DIM, NUM_CLASSES), jnp.float32) / math.sqrt(DIM)
    p["head_w"] = jnp.pad(head_w, ((0, 0), (0, DIM - NUM_CLASSES))).astype(jnp.bfloat16)  # (DIM, 128)
    head_b = 0.02 * jax.random.normal(next(ks), (NUM_CLASSES,), jnp.float32)
    vec2.append(jnp.pad(head_b, (0, DIM - NUM_CLASSES)))
    p["vec2"] = jnp.stack(vec2)                            # (DEPTH_MLP+1, DIM): MLP biases + head bias

    p["mask"] = make_tap_masks()                           # (N_ROWS, DIM) lane-compact edge masks
    return p


# ---------------------------------------------------------------------------
# full forward: one fused pallas_call
# ---------------------------------------------------------------------------
@jax.jit
def bagnet_forward(x, params):
    xin = patchify_to_rows(x)
    pos2d = _pos_rows(params)
    vmem = pl.BlockSpec(memory_space=pltpu.MemorySpace.VMEM)
    out_padded = pl.pallas_call(
        _bagnet_fused_kernel,
        out_shape=jax.ShapeDtypeStruct((BATCH, DIM), jnp.float32),   # lane-dense (2,128) output
        in_specs=[vmem] * 8,
        out_specs=vmem,
    )(xin, pos2d, params["mask"], params["conv_w"], params["conv_v"],
      params["mlp_w"], params["vec2"], params["head_w"])
    return out_padded[:, :NUM_CLASSES]


# ---------------------------------------------------------------------------
# pure-JAX reference (independent pad/slice im2col, long-K matmul, lax.erf GELU) for sanity check
# ---------------------------------------------------------------------------
@jax.jit
def reference_forward(x, params):
    def gelu_ref(v):
        return 0.5 * v * (1.0 + lax.erf(v * _INV_SQRT2))

    def conv_ref(a_rows, w_packed, vvec):
        a = a_rows.reshape(BATCH, PATCH, PATCH, DIM)
        ap = jnp.pad(a, ((0, 0), (PAD, PAD), (PAD, PAD), (0, 0)))
        cols = jnp.concatenate(
            [ap[:, kh:kh + PATCH, kw:kw + PATCH, :] for kh in range(K) for kw in range(K)],
            axis=-1).reshape(N_ROWS, KK * DIM)
        acc = _bdot(cols, w_packed) + vvec[0][None, :]
        return gelu_ref(acc) * vvec[1][None, :] + vvec[2][None, :]

    xin = patchify_to_rows(x)
    y = conv_ref(xin, params["conv_w"][0], params["conv_v"][0]) + _pos_rows(params)
    for i in range(DEPTH):
        y = conv_ref(y, params["conv_w"][1 + i], params["conv_v"][1 + i]) + y
    h = jnp.mean(jnp.tanh(y).reshape(BATCH, PATCH * PATCH, DIM), axis=1)
    for i in range(DEPTH_MLP):
        h = jnp.maximum(_bdot(h, params["mlp_w"][i]) + params["vec2"][i][None, :], 0.0)
    out = _bdot(h, params["head_w"]) + params["vec2"][DEPTH_MLP][None, :]
    return out[:, :NUM_CLASSES]


if __name__ == "__main__":
    key = jax.random.PRNGKey(0)
    kx, kp = jax.random.split(key)
    x = jax.random.normal(kx, (BATCH, IN_CHANS, INPUT_SIZE, INPUT_SIZE), jnp.float32)
    params = init_params(kp)

    out = jax.block_until_ready(bagnet_forward(x, params))
    assert out.shape == (BATCH, NUM_CLASSES) and out.dtype == jnp.float32

    ref = jax.block_until_ready(reference_forward(x, params))
    np.testing.assert_allclose(np.asarray(out), np.asarray(ref), rtol=5e-3, atol=5e-3)

    print("KERNEL_OK")
</pallas_src>

<mosaic_0001>
module attributes {stable_mosaic.version = 11 : i64} {
  func.func @_bagnet_fused_kernel(%arg0: memref<32x128xf32, #tpu.memory_space<vmem>>, %arg1: memref<32x128xf32, #tpu.memory_space<vmem>>, %arg2: memref<32x128xf32, #tpu.memory_space<vmem>>, %arg3: memref<3x1152x128xbf16, #tpu.memory_space<vmem>>, %arg4: memref<3x3x128xf32, #tpu.memory_space<vmem>>, %arg5: memref<3x128x128xbf16, #tpu.memory_space<vmem>>, %arg6: memref<4x128xf32, #tpu.memory_space<vmem>>, %arg7: memref<128x128xbf16, #tpu.memory_space<vmem>>, %arg8: memref<2x128xf32, #tpu.memory_space<vmem>>) attributes {dimension_semantics = [], scalar_prefetch = 0 : i64, scratch_operands = 0 : i64, tpu.core_type = #tpu.core_type<tc>} {
    %c0 = arith.constant 0 : index
    %c0_0 = arith.constant 0 : index
    %0 = vector.load %arg2[%c0, %c0_0] : memref<32x128xf32, #tpu.memory_space<vmem>>, vector<32x128xf32>
    %c0_1 = arith.constant 0 : index
    %c0_2 = arith.constant 0 : index
    %1 = vector.load %arg0[%c0_1, %c0_2] : memref<32x128xf32, #tpu.memory_space<vmem>>, vector<32x128xf32>
    %c0_3 = arith.constant 0 : index
    %c0_4 = arith.constant 0 : index
    %2 = vector.load %arg1[%c0_3, %c0_4] : memref<32x128xf32, #tpu.memory_space<vmem>>, vector<32x128xf32>
    %cst = arith.constant 0.000000e+00 : f32
    %3 = vector.broadcast %cst : f32 to vector<32x128xf32>
    %c5_i32 = arith.constant 5 : i32
    %4 = tpu.dynamic_rotate %1 by %c5_i32 dim 0 : vector<32x128xf32>, i32 -> vector<32x128xf32>
    %5 = vector.extract_strided_slice %0 {offsets = [0, 0], sizes = [32, 1], strides = [1, 1]} : vector<32x128xf32> to vector<32x1xf32>
    %6 = vector.broadcast %5 : vector<32x1xf32> to vector<32x128xf32>
    %7 = arith.mulf %4, %6 : vector<32x128xf32>
    %c0_5 = arith.constant 0 : index
    %c0_6 = arith.constant 0 : index
    %c0_7 = arith.constant 0 : index
    %8 = vector.load %arg3[%c0_5, %c0_6, %c0_7] : memref<3x1152x128xbf16, #tpu.memory_space<vmem>>, vector<1x128x128xbf16>
    %9 = vector.shape_cast %8 : vector<1x128x128xbf16> to vector<128x128xbf16>
    %10 = arith.truncf %7 : vector<32x128xf32> to vector<32x128xbf16>
    %cst_8 = arith.constant dense<0.000000e+00> : vector<32x128xf32>
    %11 = tpu.matmul %10, %9, %cst_8 {dimension_numbers = #tpu.dot_dimension_numbers<[1], [0], [0], [1], [0, 0, 1, 1], [], []>} : vector<32x128xbf16>, vector<128x128xbf16>, vector<32x128xf32> -> vector<32x128xf32>
    %12 = arith.addf %3, %11 : vector<32x128xf32>
    %c4_i32 = arith.constant 4 : i32
    %13 = tpu.dynamic_rotate %1 by %c4_i32 dim 0 : vector<32x128xf32>, i32 -> vector<32x128xf32>
    %14 = vector.extract_strided_slice %0 {offsets = [0, 1], sizes = [32, 1], strides = [1, 1]} : vector<32x128xf32> to vector<32x1xf32>
    %15 = vector.broadcast %14 : vector<32x1xf32> to vector<32x128xf32>
    %16 = arith.mulf %13, %15 : vector<32x128xf32>
    %c0_9 = arith.constant 0 : index
    %c128 = arith.constant 128 : index
    %c0_10 = arith.constant 0 : index
    %17 = vector.load %arg3[%c0_9, %c128, %c0_10] : memref<3x1152x128xbf16, #tpu.memory_space<vmem>>, vector<1x128x128xbf16>
    %18 = vector.shape_cast %17 : vector<1x128x128xbf16> to vector<128x128xbf16>
    %19 = arith.truncf %16 : vector<32x128xf32> to vector<32x128xbf16>
    %cst_11 = arith.constant dense<0.000000e+00> : vector<32x128xf32>
    %20 = tpu.matmul %19, %18, %cst_11 {dimension_numbers = #tpu.dot_dimension_numbers<[1], [0], [0], [1], [0, 0, 1, 1], [], []>} : vector<32x128xbf16>, vector<128x128xbf16>, vector<32x128xf32> -> vector<32x128xf32>
    %21 = arith.addf %12, %20 : vector<32x128xf32>
    %c3_i32 = arith.constant 3 : i32
    %22 = tpu.dynamic_rotate %1 by %c3_i32 dim 0 : vector<32x128xf32>, i32 -> vector<32x128xf32>
    %23 = vector.extract_strided_slice %0 {offsets = [0, 2], sizes = [32, 1], strides = [1, 1]} : vector<32x128xf32> to vector<32x1xf32>
    %24 = vector.broadcast %23 : vector<32x1xf32> to vector<32x128xf32>
    %25 = arith.mulf %22, %24 : vector<32x128xf32>
    %c0_12 = arith.constant 0 : index
    %c256 = arith.constant 256 : index
    %c0_13 = arith.constant 0 : index
    %26 = vector.load %arg3[%c0_12, %c256, %c0_13] : memref<3x1152x128xbf16, #tpu.memory_space<vmem>>, vector<1x128x128xbf16>
    %27 = vector.shape_cast %26 : vector<1x128x128xbf16> to vector<128x128xbf16>
    %28 = arith.truncf %25 : vector<32x128xf32> to vector<32x128xbf16>
    %cst_14 = arith.constant dense<0.000000e+00> : vector<32x128xf32>
    %29 = tpu.matmul %28, %27, %cst_14 {dimension_numbers = #tpu.dot_dimension_numbers<[1], [0], [0], [1], [0, 0, 1, 1], [], []>} : vector<32x128xbf16>, vector<128x128xbf16>, vector<32x128xf32> -> vector<32x128xf32>
    %30 = arith.addf %21, %29 : vector<32x128xf32>
    %c1_i32 = arith.constant 1 : i32
    %31 = tpu.dynamic_rotate %1 by %c1_i32 dim 0 : vector<32x128xf32>, i32 -> vector<32x128xf32>
    %32 = vector.extract_strided_slice %0 {offsets = [0, 3], sizes = [32, 1], strides = [1, 1]} : vector<32x128xf32> to vector<32x1xf32>
    %33 = vector.broadcast %32 : vector<32x1xf32> to vector<32x128xf32>
    %34 = arith.mulf %31, %33 : vector<32x128xf32>
    %c0_15 = arith.constant 0 : index
    %c384 = arith.constant 384 : index
    %c0_16 = arith.constant 0 : index
    %35 = vector.load %arg3[%c0_15, %c384, %c0_16] : memref<3x1152x128xbf16, #tpu.memory_space<vmem>>, vector<1x128x128xbf16>
    %36 = vector.shape_cast %35 : vector<1x128x128xbf16> to vector<128x128xbf16>
    %37 = arith.truncf %34 : vector<32x128xf32> to vector<32x128xbf16>
    %cst_17 = arith.constant dense<0.000000e+00> : vector<32x128xf32>
    %38 = tpu.matmul %37, %36, %cst_17 {dimension_numbers = #tpu.dot_dimension_numbers<[1], [0], [0], [1], [0, 0, 1, 1], [], []>} : vector<32x128xbf16>, vector<128x128xbf16>, vector<32x128xf32> -> vector<32x128xf32>
    %39 = arith.addf %30, %38 : vector<32x128xf32>
    %c0_18 = arith.constant 0 : index
    %c512 = arith.constant 512 : index
    %c0_19 = arith.constant 0 : index
    %40 = vector.load %arg3[%c0_18, %c512, %c0_19] : memref<3x1152x128xbf16, #tpu.memory_space<vmem>>, vector<1x128x128xbf16>
    %41 = vector.shape_cast %40 : vector<1x128x128xbf16> to vector<128x128xbf16>
    %42 = arith.truncf %1 : vector<32x128xf32> to vector<32x128xbf16>
    %cst_20 = arith.constant dense<0.000000e+00> : vector<32x128xf32>
    %43 = tpu.matmul %42, %41, %cst_20 {dimension_numbers = #tpu.dot_dimension_numbers<[1], [0], [0], [1], [0, 0, 1, 1], [], []>} : vector<32x128xbf16>, vector<128x128xbf16>, vector<32x128xf32> -> vector<32x128xf32>
    %44 = arith.addf %39, %43 : vector<32x128xf32>
    %c31_i32 = arith.constant 31 : i32
    %45 = tpu.dynamic_rotate %1 by %c31_i32 dim 0 : vector<32x128xf32>, i32 -> vector<32x128xf32>
    %46 = vector.extract_strided_slice %0 {offsets = [0, 5], sizes = [32, 1], strides = [1, 1]} : vector<32x128xf32> to vector<32x1xf32>
    %47 = vector.broadcast %46 : vector<32x1xf32> to vector<32x128xf32>
    %48 = arith.mulf %45, %47 : vector<32x128xf32>
    %c0_21 = arith.constant 0 : index
    %c640 = arith.constant 640 : index
    %c0_22 = arith.constant 0 : index
    %49 = vector.load %arg3[%c0_21, %c640, %c0_22] : memref<3x1152x128xbf16, #tpu.memory_space<vmem>>, vector<1x128x128xbf16>
    %50 = vector.shape_cast %49 : vector<1x128x128xbf16> to vector<128x128xbf16>
    %51 = arith.truncf %48 : vector<32x128xf32> to vector<32x128xbf16>
    %cst_23 = arith.constant dense<0.000000e+00> : vector<32x128xf32>
    %52 = tpu.matmul %51, %50, %cst_23 {dimension_numbers = #tpu.dot_dimension_numbers<[1], [0], [0], [1], [0, 0, 1, 1], [], []>} : vector<32x128xbf16>, vector<128x128xbf16>, vector<32x128xf32> -> vector<32x128xf32>
    %53 = arith.addf %44, %52 : vector<32x128xf32>
    %c29_i32 = arith.constant 29 : i32
    %54 = tpu.dynamic_rotate %1 by %c29_i32 dim 0 : vector<32x128xf32>, i32 -> vector<32x128xf32>
    %55 = vector.extract_strided_slice %0 {offsets = [0, 6], sizes = [32, 1], strides = [1, 1]} : vector<32x128xf32> to vector<32x1xf32>
    %56 = vector.broadcast %55 : vector<32x1xf32> to vector<32x128xf32>
    %57 = arith.mulf %54, %56 : vector<32x128xf32>
    %c0_24 = arith.constant 0 : index
    %c768 = arith.constant 768 : index
    %c0_25 = arith.constant 0 : index
    %58 = vector.load %arg3[%c0_24, %c768, %c0_25] : memref<3x1152x128xbf16, #tpu.memory_space<vmem>>, vector<1x128x128xbf16>
    %59 = vector.shape_cast %58 : vector<1x128x128xbf16> to vector<128x128xbf16>
    %60 = arith.truncf %57 : vector<32x128xf32> to vector<32x128xbf16>
    %cst_26 = arith.constant dense<0.000000e+00> : vector<32x128xf32>
    %61 = tpu.matmul %60, %59, %cst_26 {dimension_numbers = #tpu.dot_dimension_numbers<[1], [0], [0], [1], [0, 0, 1, 1], [], []>} : vector<32x128xbf16>, vector<128x128xbf16>, vector<32x128xf32> -> vector<32x128xf32>
    %62 = arith.addf %53, %61 : vector<32x128xf32>
    %c28_i32 = arith.constant 28 : i32
    %63 = tpu.dynamic_rotate %1 by %c28_i32 dim 0 : vector<32x128xf32>, i32 -> vector<32x128xf32>
    %64 = vector.extract_strided_slice %0 {offsets = [0, 7], sizes = [32, 1], strides = [1, 1]} : vector<32x128xf32> to vector<32x1xf32>
    %65 = vector.broadcast %64 : vector<32x1xf32> to vector<32x128xf32>
    %66 = arith.mulf %63, %65 : vector<32x128xf32>
    %c0_27 = arith.constant 0 : index
    %c896 = arith.constant 896 : index
    %c0_28 = arith.constant 0 : index
    %67 = vector.load %arg3[%c0_27, %c896, %c0_28] : memref<3x1152x128xbf16, #tpu.memory_space<vmem>>, vector<1x128x128xbf16>
    %68 = vector.shape_cast %67 : vector<1x128x128xbf16> to vector<128x128xbf16>
    %69 = arith.truncf %66 : vector<32x128xf32> to vector<32x128xbf16>
    %cst_29 = arith.constant dense<0.000000e+00> : vector<32x128xf32>
    %70 = tpu.matmul %69, %68, %cst_29 {dimension_numbers = #tpu.dot_dimension_numbers<[1], [0], [0], [1], [0, 0, 1, 1], [], []>} : vector<32x128xbf16>, vector<128x128xbf16>, vector<32x128xf32> -> vector<32x128xf32>
    %71 = arith.addf %62, %70 : vector<32x128xf32>
    %c27_i32 = arith.constant 27 : i32
    %72 = tpu.dynamic_rotate %1 by %c27_i32 dim 0 : vector<32x128xf32>, i32 -> vector<32x128xf32>
    %73 = vector.extract_strided_slice %0 {offsets = [0, 8], sizes = [32, 1], strides = [1, 1]} : vector<32x128xf32> to vector<32x1xf32>
    %74 = vector.broadcast %73 : vector<32x1xf32> to vector<32x128xf32>
    %75 = arith.mulf %72, %74 : vector<32x128xf32>
    %c0_30 = arith.constant 0 : index
    %c1024 = arith.constant 1024 : index
    %c0_31 = arith.constant 0 : index
    %76 = vector.load %arg3[%c0_30, %c1024, %c0_31] : memref<3x1152x128xbf16, #tpu.memory_space<vmem>>, vector<1x128x128xbf16>
    %77 = vector.shape_cast %76 : vector<1x128x128xbf16> to vector<128x128xbf16>
    %78 = arith.truncf %75 : vector<32x128xf32> to vector<32x128xbf16>
    %cst_32 = arith.constant dense<0.000000e+00> : vector<32x128xf32>
    %79 = tpu.matmul %78, %77, %cst_32 {dimension_numbers = #tpu.dot_dimension_numbers<[1], [0], [0], [1], [0, 0, 1, 1], [], []>} : vector<32x128xbf16>, vector<128x128xbf16>, vector<32x128xf32> -> vector<32x128xf32>
    %80 = arith.addf %71, %79 : vector<32x128xf32>
    %c0_33 = arith.constant 0 : index
    %c0_34 = arith.constant 0 : index
    %c0_35 = arith.constant 0 : index
    %81 = vector.load %arg4[%c0_33, %c0_34, %c0_35] : memref<3x3x128xf32, #tpu.memory_space<vmem>>, vector<1x1x128xf32>
    %82 = vector.shape_cast %81 : vector<1x1x128xf32> to vector<1x128xf32>
    %83 = vector.broadcast %82 : vector<1x128xf32> to vector<32x128xf32>
    %84 = arith.addf %80, %83 : vector<32x128xf32>
    %cst_36 = arith.constant 5.000000e-01 : f32
    %85 = vector.broadcast %cst_36 : f32 to vector<32x128xf32>
    %86 = arith.mulf %85, %84 : vector<32x128xf32>
    %cst_37 = arith.constant 0.707106769 : f32
    %87 = vector.broadcast %cst_37 : f32 to vector<32x128xf32>
    %88 = arith.mulf %84, %87 : vector<32x128xf32>
    %cst_38 = arith.constant 0.000000e+00 : f32
    %89 = vector.broadcast %cst_38 : f32 to vector<32x128xf32>
    %90 = arith.cmpf oge, %88, %89 : vector<32x128xf32>
    %cst_39 = arith.constant 1.000000e+00 : f32
    %cst_40 = arith.constant -1.000000e+00 : f32
    %91 = vector.broadcast %cst_39 : f32 to vector<32x128xf32>
    %92 = vector.broadcast %cst_40 : f32 to vector<32x128xf32>
    %93 = arith.select %90, %91, %92 : vector<32x128xi1>, vector<32x128xf32>
    %94 = math.absf %88 : vector<32x128xf32>
    %cst_41 = arith.constant 0.327591091 : f32
    %95 = vector.broadcast %cst_41 : f32 to vector<32x128xf32>
    %96 = arith.mulf %95, %94 : vector<32x128xf32>
    %cst_42 = arith.constant 1.000000e+00 : f32
    %97 = vector.broadcast %cst_42 : f32 to vector<32x128xf32>
    %98 = arith.addf %97, %96 : vector<32x128xf32>
    %99 = tpu.reciprocal %98 {approx = true} : vector<32x128xf32> -> vector<32x128xf32>
    %cst_43 = arith.constant 1.06140542 : f32
    %100 = vector.broadcast %cst_43 : f32 to vector<32x128xf32>
    %101 = arith.mulf %100, %99 : vector<32x128xf32>
    %cst_44 = arith.constant -1.45315206 : f32
    %102 = vector.broadcast %cst_44 : f32 to vector<32x128xf32>
    %103 = arith.addf %101, %102 : vector<32x128xf32>
    %104 = arith.mulf %103, %99 : vector<32x128xf32>
    %cst_45 = arith.constant 1.42141378 : f32
    %105 = vector.broadcast %cst_45 : f32 to vector<32x128xf32>
    %106 = arith.addf %104, %105 : vector<32x128xf32>
    %107 = arith.mulf %106, %99 : vector<32x128xf32>
    %cst_46 = arith.constant -0.284496725 : f32
    %108 = vector.broadcast %cst_46 : f32 to vector<32x128xf32>
    %109 = arith.addf %107, %108 : vector<32x128xf32>
    %110 = arith.mulf %109, %99 : vector<32x128xf32>
    %cst_47 = arith.constant 0.254829586 : f32
    %111 = vector.broadcast %cst_47 : f32 to vector<32x128xf32>
    %112 = arith.addf %110, %111 : vector<32x128xf32>
    %113 = arith.mulf %112, %99 : vector<32x128xf32>
    %cst_48 = arith.constant 0.000000e+00 : f32
    %114 = vector.broadcast %cst_48 : f32 to vector<32x128xf32>
    %115 = arith.subf %114, %94 : vector<32x128xf32>
    %116 = arith.mulf %115, %94 : vector<32x128xf32>
    %117 = math.exp %116 : vector<32x128xf32>
    %118 = arith.mulf %113, %117 : vector<32x128xf32>
    %cst_49 = arith.constant 1.000000e+00 : f32
    %119 = vector.broadcast %cst_49 : f32 to vector<32x128xf32>
    %120 = arith.subf %119, %118 : vector<32x128xf32>
    %121 = arith.mulf %93, %120 : vector<32x128xf32>
    %cst_50 = arith.constant 1.000000e+00 : f32
    %122 = vector.broadcast %cst_50 : f32 to vector<32x128xf32>
    %123 = arith.addf %122, %121 : vector<32x128xf32>
    %124 = arith.mulf %86, %123 : vector<32x128xf32>
    %c0_51 = arith.constant 0 : index
    %c1 = arith.constant 1 : index
    %c0_52 = arith.constant 0 : index
    %125 = vector.load %arg4[%c0_51, %c1, %c0_52] : memref<3x3x128xf32, #tpu.memory_space<vmem>>, vector<1x1x128xf32>
    %126 = vector.shape_cast %125 : vector<1x1x128xf32> to vector<1x128xf32>
    %127 = vector.broadcast %126 : vector<1x128xf32> to vector<32x128xf32>
    %128 = arith.mulf %124, %127 : vector<32x128xf32>
    %c0_53 = arith.constant 0 : index
    %c2 = arith.constant 2 : index
    %c0_54 = arith.constant 0 : index
    %129 = vector.load %arg4[%c0_53, %c2, %c0_54] : memref<3x3x128xf32, #tpu.memory_space<vmem>>, vector<1x1x128xf32>
    %130 = vector.shape_cast %129 : vector<1x1x128xf32> to vector<1x128xf32>
    %131 = vector.broadcast %130 : vector<1x128xf32> to vector<32x128xf32>
    %132 = arith.addf %128, %131 : vector<32x128xf32>
    %133 = arith.addf %132, %2 : vector<32x128xf32>
    %cst_55 = arith.constant 0.000000e+00 : f32
    %134 = vector.broadcast %cst_55 : f32 to vector<32x128xf32>
    %c5_i32_56 = arith.constant 5 : i32
    %135 = tpu.dynamic_rotate %133 by %c5_i32_56 dim 0 : vector<32x128xf32>, i32 -> vector<32x128xf32>
    %136 = vector.extract_strided_slice %0 {offsets = [0, 0], sizes = [32, 1], strides = [1, 1]} : vector<32x128xf32> to vector<32x1xf32>
    %137 = vector.broadcast %136 : vector<32x1xf32> to vector<32x128xf32>
    %138 = arith.mulf %135, %137 : vector<32x128xf32>
    %c1_57 = arith.constant 1 : index
    %c0_58 = arith.constant 0 : index
    %c0_59 = arith.constant 0 : index
    %139 = vector.load %arg3[%c1_57, %c0_58, %c0_59] : memref<3x1152x128xbf16, #tpu.memory_space<vmem>>, vector<1x128x128xbf16>
    %140 = vector.shape_cast %139 : vector<1x128x128xbf16> to vector<128x128xbf16>
    %141 = arith.truncf %138 : vector<32x128xf32> to vector<32x128xbf16>
    %cst_60 = arith.constant dense<0.000000e+00> : vector<32x128xf32>
    %142 = tpu.matmul %141, %140, %cst_60 {dimension_numbers = #tpu.dot_dimension_numbers<[1], [0], [0], [1], [0, 0, 1, 1], [], []>} : vector<32x128xbf16>, vector<128x128xbf16>, vector<32x128xf32> -> vector<32x128xf32>
    %143 = arith.addf %134, %142 : vector<32x128xf32>
    %c4_i32_61 = arith.constant 4 : i32
    %144 = tpu.dynamic_rotate %133 by %c4_i32_61 dim 0 : vector<32x128xf32>, i32 -> vector<32x128xf32>
    %145 = vector.extract_strided_slice %0 {offsets = [0, 1], sizes = [32, 1], strides = [1, 1]} : vector<32x128xf32> to vector<32x1xf32>
    %146 = vector.broadcast %145 : vector<32x1xf32> to vector<32x128xf32>
    %147 = arith.mulf %144, %146 : vector<32x128xf32>
    %c1_62 = arith.constant 1 : index
    %c128_63 = arith.constant 128 : index
    %c0_64 = arith.constant 0 : index
    %148 = vector.load %arg3[%c1_62, %c128_63, %c0_64] : memref<3x1152x128xbf16, #tpu.memory_space<vmem>>, vector<1x128x128xbf16>
    %149 = vector.shape_cast %148 : vector<1x128x128xbf16> to vector<128x128xbf16>
    %150 = arith.truncf %147 : vector<32x128xf32> to vector<32x128xbf16>
    %cst_65 = arith.constant dense<0.000000e+00> : vector<32x128xf32>
    %151 = tpu.matmul %150, %149, %cst_65 {dimension_numbers = #tpu.dot_dimension_numbers<[1], [0], [0], [1], [0, 0, 1, 1], [], []>} : vector<32x128xbf16>, vector<128x128xbf16>, vector<32x128xf32> -> vector<32x128xf32>
    %152 = arith.addf %143, %151 : vector<32x128xf32>
    %c3_i32_66 = arith.constant 3 : i32
    %153 = tpu.dynamic_rotate %133 by %c3_i32_66 dim 0 : vector<32x128xf32>, i32 -> vector<32x128xf32>
    %154 = vector.extract_strided_slice %0 {offsets = [0, 2], sizes = [32, 1], strides = [1, 1]} : vector<32x128xf32> to vector<32x1xf32>
    %155 = vector.broadcast %154 : vector<32x1xf32> to vector<32x128xf32>
    %156 = arith.mulf %153, %155 : vector<32x128xf32>
    %c1_67 = arith.constant 1 : index
    %c256_68 = arith.constant 256 : index
    %c0_69 = arith.constant 0 : index
    %157 = vector.load %arg3[%c1_67, %c256_68, %c0_69] : memref<3x1152x128xbf16, #tpu.memory_space<vmem>>, vector<1x128x128xbf16>
    %158 = vector.shape_cast %157 : vector<1x128x128xbf16> to vector<128x128xbf16>
    %159 = arith.truncf %156 : vector<32x128xf32> to vector<32x128xbf16>
    %cst_70 = arith.constant dense<0.000000e+00> : vector<32x128xf32>
    %160 = tpu.matmul %159, %158, %cst_70 {dimension_numbers = #tpu.dot_dimension_numbers<[1], [0], [0], [1], [0, 0, 1, 1], [], []>} : vector<32x128xbf16>, vector<128x128xbf16>, vector<32x128xf32> -> vector<32x128xf32>
    %161 = arith.addf %152, %160 : vector<32x128xf32>
    %c1_i32_71 = arith.constant 1 : i32
    %162 = tpu.dynamic_rotate %133 by %c1_i32_71 dim 0 : vector<32x128xf32>, i32 -> vector<32x128xf32>
    %163 = vector.extract_strided_slice %0 {offsets = [0, 3], sizes = [32, 1], strides = [1, 1]} : vector<32x128xf32> to vector<32x1xf32>
    %164 = vector.broadcast %163 : vector<32x1xf32> to vector<32x128xf32>
    %165 = arith.mulf %162, %164 : vector<32x128xf32>
    %c1_72 = arith.constant 1 : index
    %c384_73 = arith.constant 384 : index
    %c0_74 = arith.constant 0 : index
    %166 = vector.load %arg3[%c1_72, %c384_73, %c0_74] : memref<3x1152x128xbf16, #tpu.memory_space<vmem>>, vector<1x128x128xbf16>
    %167 = vector.shape_cast %166 : vector<1x128x128xbf16> to vector<128x128xbf16>
    %168 = arith.truncf %165 : vector<32x128xf32> to vector<32x128xbf16>
    %cst_75 = arith.constant dense<0.000000e+00> : vector<32x128xf32>
    %169 = tpu.matmul %168, %167, %cst_75 {dimension_numbers = #tpu.dot_dimension_numbers<[1], [0], [0], [1], [0, 0, 1, 1], [], []>} : vector<32x128xbf16>, vector<128x128xbf16>, vector<32x128xf32> -> vector<32x128xf32>
    %170 = arith.addf %161, %169 : vector<32x128xf32>
    %c1_76 = arith.constant 1 : index
    %c512_77 = arith.constant 512 : index
    %c0_78 = arith.constant 0 : index
    %171 = vector.load %arg3[%c1_76, %c512_77, %c0_78] : memref<3x1152x128xbf16, #tpu.memory_space<vmem>>, vector<1x128x128xbf16>
    %172 = vector.shape_cast %171 : vector<1x128x128xbf16> to vector<128x128xbf16>
    %173 = arith.truncf %133 : vector<32x128xf32> to vector<32x128xbf16>
    %cst_79 = arith.constant dense<0.000000e+00> : vector<32x128xf32>
    %174 = tpu.matmul %173, %172, %cst_79 {dimension_numbers = #tpu.dot_dimension_numbers<[1], [0], [0], [1], [0, 0, 1, 1], [], []>} : vector<32x128xbf16>, vector<128x128xbf16>, vector<32x128xf32> -> vector<32x128xf32>
    %175 = arith.addf %170, %174 : vector<32x128xf32>
    %c31_i32_80 = arith.constant 31 : i32
    %176 = tpu.dynamic_rotate %133 by %c31_i32_80 dim 0 : vector<32x128xf32>, i32 -> vector<32x128xf32>
    %177 = vector.extract_strided_slice %0 {offsets = [0, 5], sizes = [32, 1], strides = [1, 1]} : vector<32x128xf32> to vector<32x1xf32>
    %178 = vector.broadcast %177 : vector<32x1xf32> to vector<32x128xf32>
    %179 = arith.mulf %176, %178 : vector<32x128xf32>
    %c1_81 = arith.constant 1 : index
    %c640_82 = arith.constant 640 : index
    %c0_83 = arith.constant 0 : index
    %180 = vector.load %arg3[%c1_81, %c640_82, %c0_83] : memref<3x1152x128xbf16, #tpu.memory_space<vmem>>, vector<1x128x128xbf16>
    %181 = vector.shape_cast %180 : vector<1x128x128xbf16> to vector<128x128xbf16>
    %182 = arith.truncf %179 : vector<32x128xf32> to vector<32x128xbf16>
    %cst_84 = arith.constant dense<0.000000e+00> : vector<32x128xf32>
    %183 = tpu.matmul %182, %181, %cst_84 {dimension_numbers = #tpu.dot_dimension_numbers<[1], [0], [0], [1], [0, 0, 1, 1], [], []>} : vector<32x128xbf16>, vector<128x128xbf16>, vector<32x128xf32> -> vector<32x128xf32>
    %184 = arith.addf %175, %183 : vector<32x128xf32>
    %c29_i32_85 = arith.constant 29 : i32
    %185 = tpu.dynamic_rotate %133 by %c29_i32_85 dim 0 : vector<32x128xf32>, i32 -> vector<32x128xf32>
    %186 = vector.extract_strided_slice %0 {offsets = [0, 6], sizes = [32, 1], strides = [1, 1]} : vector<32x128xf32> to vector<32x1xf32>
    %187 = vector.broadcast %186 : vector<32x1xf32> to vector<32x128xf32>
    %188 = arith.mulf %185, %187 : vector<32x128xf32>
    %c1_86 = arith.constant 1 : index
    %c768_87 = arith.constant 768 : index
    %c0_88 = arith.constant 0 : index
    %189 = vector.load %arg3[%c1_86, %c768_87, %c0_88] : memref<3x1152x128xbf16, #tpu.memory_space<vmem>>, vector<1x128x128xbf16>
    %190 = vector.shape_cast %189 : vector<1x128x128xbf16> to vector<128x128xbf16>
    %191 = arith.truncf %188 : vector<32x128xf32> to vector<32x128xbf16>
    %cst_89 = arith.constant dense<0.000000e+00> : vector<32x128xf32>
    %192 = tpu.matmul %191, %190, %cst_89 {dimension_numbers = #tpu.dot_dimension_numbers<[1], [0], [0], [1], [0, 0, 1, 1], [], []>} : vector<32x128xbf16>, vector<128x128xbf16>, vector<32x128xf32> -> vector<32x128xf32>
    %193 = arith.addf %184, %192 : vector<32x128xf32>
    %c28_i32_90 = arith.constant 28 : i32
    %194 = tpu.dynamic_rotate %133 by %c28_i32_90 dim 0 : vector<32x128xf32>, i32 -> vector<32x128xf32>
    %195 = vector.extract_strided_slice %0 {offsets = [0, 7], sizes = [32, 1], strides = [1, 1]} : vector<32x128xf32> to vector<32x1xf32>
    %196 = vector.broadcast %195 : vector<32x1xf32> to vector<32x128xf32>
    %197 = arith.mulf %194, %196 : vector<32x128xf32>
    %c1_91 = arith.constant 1 : index
    %c896_92 = arith.constant 896 : index
    %c0_93 = arith.constant 0 : index
    %198 = vector.load %arg3[%c1_91, %c896_92, %c0_93] : memref<3x1152x128xbf16, #tpu.memory_space<vmem>>, vector<1x128x128xbf16>
    %199 = vector.shape_cast %198 : vector<1x128x128xbf16> to vector<128x128xbf16>
    %200 = arith.truncf %197 : vector<32x128xf32> to vector<32x128xbf16>
    %cst_94 = arith.constant dense<0.000000e+00> : vector<32x128xf32>
    %201 = tpu.matmul %200, %199, %cst_94 {dimension_numbers = #tpu.dot_dimension_numbers<[1], [0], [0], [1], [0, 0, 1, 1], [], []>} : vector<32x128xbf16>, vector<128x128xbf16>, vector<32x128xf32> -> vector<32x128xf32>
    %202 = arith.addf %193, %201 : vector<32x128xf32>
    %c27_i32_95 = arith.constant 27 : i32
    %203 = tpu.dynamic_rotate %133 by %c27_i32_95 dim 0 : vector<32x128xf32>, i32 -> vector<32x128xf32>
    %204 = vector.extract_strided_slice %0 {offsets = [0, 8], sizes = [32, 1], strides = [1, 1]} : vector<32x128xf32> to vector<32x1xf32>
    %205 = vector.broadcast %204 : vector<32x1xf32> to vector<32x128xf32>
    %206 = arith.mulf %203, %205 : vector<32x128xf32>
    %c1_96 = arith.constant 1 : index
    %c1024_97 = arith.constant 1024 : index
    %c0_98 = arith.constant 0 : index
    %207 = vector.load %arg3[%c1_96, %c1024_97, %c0_98] : memref<3x1152x128xbf16, #tpu.memory_space<vmem>>, vector<1x128x128xbf16>
    %208 = vector.shape_cast %207 : vector<1x128x128xbf16> to vector<128x128xbf16>
    %209 = arith.truncf %206 : vector<32x128xf32> to vector<32x128xbf16>
    %cst_99 = arith.constant dense<0.000000e+00> : vector<32x128xf32>
    %210 = tpu.matmul %209, %208, %cst_99 {dimension_numbers = #tpu.dot_dimension_numbers<[1], [0], [0], [1], [0, 0, 1, 1], [], []>} : vector<32x128xbf16>, vector<128x128xbf16>, vector<32x128xf32> -> vector<32x128xf32>
    %211 = arith.addf %202, %210 : vector<32x128xf32>
    %c1_100 = arith.constant 1 : index
    %c0_101 = arith.constant 0 : index
    %c0_102 = arith.constant 0 : index
    %212 = vector.load %arg4[%c1_100, %c0_101, %c0_102] : memref<3x3x128xf32, #tpu.memory_space<vmem>>, vector<1x1x128xf32>
    %213 = vector.shape_cast %212 : vector<1x1x128xf32> to vector<1x128xf32>
    %214 = vector.broadcast %213 : vector<1x128xf32> to vector<32x128xf32>
    %215 = arith.addf %211, %214 : vector<32x128xf32>
    %cst_103 = arith.constant 5.000000e-01 : f32
    %216 = vector.broadcast %cst_103 : f32 to vector<32x128xf32>
    %217 = arith.mulf %216, %215 : vector<32x128xf32>
    %cst_104 = arith.constant 0.707106769 : f32
    %218 = vector.broadcast %cst_104 : f32 to vector<32x128xf32>
    %219 = arith.mulf %215, %218 : vector<32x128xf32>
    %cst_105 = arith.constant 0.000000e+00 : f32
    %220 = vector.broadcast %cst_105 : f32 to vector<32x128xf32>
    %221 = arith.cmpf oge, %219, %220 : vector<32x128xf32>
    %cst_106 = arith.constant 1.000000e+00 : f32
    %cst_107 = arith.constant -1.000000e+00 : f32
    %222 = vector.broadcast %cst_106 : f32 to vector<32x128xf32>
    %223 = vector.broadcast %cst_107 : f32 to vector<32x128xf32>
    %224 = arith.select %221, %222, %223 : vector<32x128xi1>, vector<32x128xf32>
    %225 = math.absf %219 : vector<32x128xf32>
    %cst_108 = arith.constant 0.327591091 : f32
    %226 = vector.broadcast %cst_108 : f32 to vector<32x128xf32>
    %227 = arith.mulf %226, %225 : vector<32x128xf32>
    %cst_109 = arith.constant 1.000000e+00 : f32
    %228 = vector.broadcast %cst_109 : f32 to vector<32x128xf32>
    %229 = arith.addf %228, %227 : vector<32x128xf32>
    %230 = tpu.reciprocal %229 {approx = true} : vector<32x128xf32> -> vector<32x128xf32>
    %cst_110 = arith.constant 1.06140542 : f32
    %231 = vector.broadcast %cst_110 : f32 to vector<32x128xf32>
    %232 = arith.mulf %231, %230 : vector<32x128xf32>
    %cst_111 = arith.constant -1.45315206 : f32
    %233 = vector.broadcast %cst_111 : f32 to vector<32x128xf32>
    %234 = arith.addf %232, %233 : vector<32x128xf32>
    %235 = arith.mulf %234, %230 : vector<32x128xf32>
    %cst_112 = arith.constant 1.42141378 : f32
    %236 = vector.broadcast %cst_112 : f32 to vector<32x128xf32>
    %237 = arith.addf %235, %236 : vector<32x128xf32>
    %238 = arith.mulf %237, %230 : vector<32x128xf32>
    %cst_113 = arith.constant -0.284496725 : f32
    %239 = vector.broadcast %cst_113 : f32 to vector<32x128xf32>
    %240 = arith.addf %238, %239 : vector<32x128xf32>
    %241 = arith.mulf %240, %230 : vector<32x128xf32>
    %cst_114 = arith.constant 0.254829586 : f32
    %242 = vector.broadcast %cst_114 : f32 to vector<32x128xf32>
    %243 = arith.addf %241, %242 : vector<32x128xf32>
    %244 = arith.mulf %243, %230 : vector<32x128xf32>
    %cst_115 = arith.constant 0.000000e+00 : f32
    %245 = vector.broadcast %cst_115 : f32 to vector<32x128xf32>
    %246 = arith.subf %245, %225 : vector<32x128xf32>
    %247 = arith.mulf %246, %225 : vector<32x128xf32>
    %248 = math.exp %247 : vector<32x128xf32>
    %249 = arith.mulf %244, %248 : vector<32x128xf32>
    %cst_116 = arith.constant 1.000000e+00 : f32
    %250 = vector.broadcast %cst_116 : f32 to vector<32x128xf32>
    %251 = arith.subf %250, %249 : vector<32x128xf32>
    %252 = arith.mulf %224, %251 : vector<32x128xf32>
    %cst_117 = arith.constant 1.000000e+00 : f32
    %253 = vector.broadcast %cst_117 : f32 to vector<32x128xf32>
    %254 = arith.addf %253, %252 : vector<32x128xf32>
    %255 = arith.mulf %217, %254 : vector<32x128xf32>
    %c1_118 = arith.constant 1 : index
    %c1_119 = arith.constant 1 : index
    %c0_120 = arith.constant 0 : index
    %256 = vector.load %arg4[%c1_118, %c1_119, %c0_120] : memref<3x3x128xf32, #tpu.memory_space<vmem>>, vector<1x1x128xf32>
    %257 = vector.shape_cast %256 : vector<1x1x128xf32> to vector<1x128xf32>
    %258 = vector.broadcast %257 : vector<1x128xf32> to vector<32x128xf32>
    %259 = arith.mulf %255, %258 : vector<32x128xf32>
    %c1_121 = arith.constant 1 : index
    %c2_122 = arith.constant 2 : index
    %c0_123 = arith.constant 0 : index
    %260 = vector.load %arg4[%c1_121, %c2_122, %c0_123] : memref<3x3x128xf32, #tpu.memory_space<vmem>>, vector<1x1x128xf32>
    %261 = vector.shape_cast %260 : vector<1x1x128xf32> to vector<1x128xf32>
    %262 = vector.broadcast %261 : vector<1x128xf32> to vector<32x128xf32>
    %263 = arith.addf %259, %262 : vector<32x128xf32>
    %264 = arith.addf %263, %133 : vector<32x128xf32>
    %cst_124 = arith.constant 0.000000e+00 : f32
    %265 = vector.broadcast %cst_124 : f32 to vector<32x128xf32>
    %c5_i32_125 = arith.constant 5 : i32
    %266 = tpu.dynamic_rotate %264 by %c5_i32_125 dim 0 : vector<32x128xf32>, i32 -> vector<32x128xf32>
    %267 = vector.extract_strided_slice %0 {offsets = [0, 0], sizes = [32, 1], strides = [1, 1]} : vector<32x128xf32> to vector<32x1xf32>
    %268 = vector.broadcast %267 : vector<32x1xf32> to vector<32x128xf32>
    %269 = arith.mulf %266, %268 : vector<32x128xf32>
    %c2_126 = arith.constant 2 : index
    %c0_127 = arith.constant 0 : index
    %c0_128 = arith.constant 0 : index
    %270 = vector.load %arg3[%c2_126, %c0_127, %c0_128] : memref<3x1152x128xbf16, #tpu.memory_space<vmem>>, vector<1x128x128xbf16>
    %271 = vector.shape_cast %270 : vector<1x128x128xbf16> to vector<128x128xbf16>
    %272 = arith.truncf %269 : vector<32x128xf32> to vector<32x128xbf16>
    %cst_129 = arith.constant dense<0.000000e+00> : vector<32x128xf32>
    %273 = tpu.matmul %272, %271, %cst_129 {dimension_numbers = #tpu.dot_dimension_numbers<[1], [0], [0], [1], [0, 0, 1, 1], [], []>} : vector<32x128xbf16>, vector<128x128xbf16>, vector<32x128xf32> -> vector<32x128xf32>
    %274 = arith.addf %265, %273 : vector<32x128xf32>
    %c4_i32_130 = arith.constant 4 : i32
    %275 = tpu.dynamic_rotate %264 by %c4_i32_130 dim 0 : vector<32x128xf32>, i32 -> vector<32x128xf32>
    %276 = vector.extract_strided_slice %0 {offsets = [0, 1], sizes = [32, 1], strides = [1, 1]} : vector<32x128xf32> to vector<32x1xf32>
    %277 = vector.broadcast %276 : vector<32x1xf32> to vector<32x128xf32>
    %278 = arith.mulf %275, %277 : vector<32x128xf32>
    %c2_131 = arith.constant 2 : index
    %c128_132 = arith.constant 128 : index
    %c0_133 = arith.constant 0 : index
    %279 = vector.load %arg3[%c2_131, %c128_132, %c0_133] : memref<3x1152x128xbf16, #tpu.memory_space<vmem>>, vector<1x128x128xbf16>
    %280 = vector.shape_cast %279 : vector<1x128x128xbf16> to vector<128x128xbf16>
    %281 = arith.truncf %278 : vector<32x128xf32> to vector<32x128xbf16>
    %cst_134 = arith.constant dense<0.000000e+00> : vector<32x128xf32>
    %282 = tpu.matmul %281, %280, %cst_134 {dimension_numbers = #tpu.dot_dimension_numbers<[1], [0], [0], [1], [0, 0, 1, 1], [], []>} : vector<32x128xbf16>, vector<128x128xbf16>, vector<32x128xf32> -> vector<32x128xf32>
    %283 = arith.addf %274, %282 : vector<32x128xf32>
    %c3_i32_135 = arith.constant 3 : i32
    %284 = tpu.dynamic_rotate %264 by %c3_i32_135 dim 0 : vector<32x128xf32>, i32 -> vector<32x128xf32>
    %285 = vector.extract_strided_slice %0 {offsets = [0, 2], sizes = [32, 1], strides = [1, 1]} : vector<32x128xf32> to vector<32x1xf32>
    %286 = vector.broadcast %285 : vector<32x1xf32> to vector<32x128xf32>
    %287 = arith.mulf %284, %286 : vector<32x128xf32>
    %c2_136 = arith.constant 2 : index
    %c256_137 = arith.constant 256 : index
    %c0_138 = arith.constant 0 : index
    %288 = vector.load %arg3[%c2_136, %c256_137, %c0_138] : memref<3x1152x128xbf16, #tpu.memory_space<vmem>>, vector<1x128x128xbf16>
    %289 = vector.shape_cast %288 : vector<1x128x128xbf16> to vector<128x128xbf16>
    %290 = arith.truncf %287 : vector<32x128xf32> to vector<32x128xbf16>
    %cst_139 = arith.constant dense<0.000000e+00> : vector<32x128xf32>
    %291 = tpu.matmul %290, %289, %cst_139 {dimension_numbers = #tpu.dot_dimension_numbers<[1], [0], [0], [1], [0, 0, 1, 1], [], []>} : vector<32x128xbf16>, vector<128x128xbf16>, vector<32x128xf32> -> vector<32x128xf32>
    %292 = arith.addf %283, %291 : vector<32x128xf32>
    %c1_i32_140 = arith.constant 1 : i32
    %293 = tpu.dynamic_rotate %264 by %c1_i32_140 dim 0 : vector<32x128xf32>, i32 -> vector<32x128xf32>
    %294 = vector.extract_strided_slice %0 {offsets = [0, 3], sizes = [32, 1], strides = [1, 1]} : vector<32x128xf32> to vector<32x1xf32>
    %295 = vector.broadcast %294 : vector<32x1xf32> to vector<32x128xf32>
    %296 = arith.mulf %293, %295 : vector<32x128xf32>
    %c2_141 = arith.constant 2 : index
    %c384_142 = arith.constant 384 : index
    %c0_143 = arith.constant 0 : index
    %297 = vector.load %arg3[%c2_141, %c384_142, %c0_143] : memref<3x1152x128xbf16, #tpu.memory_space<vmem>>, vector<1x128x128xbf16>
    %298 = vector.shape_cast %297 : vector<1x128x128xbf16> to vector<128x128xbf16>
    %299 = arith.truncf %296 : vector<32x128xf32> to vector<32x128xbf16>
    %cst_144 = arith.constant dense<0.000000e+00> : vector<32x128xf32>
    %300 = tpu.matmul %299, %298, %cst_144 {dimension_numbers = #tpu.dot_dimension_numbers<[1], [0], [0], [1], [0, 0, 1, 1], [], []>} : vector<32x128xbf16>, vector<128x128xbf16>, vector<32x128xf32> -> vector<32x128xf32>
    %301 = arith.addf %292, %300 : vector<32x128xf32>
    %c2_145 = arith.constant 2 : index
    %c512_146 = arith.constant 512 : index
    %c0_147 = arith.constant 0 : index
    %302 = vector.load %arg3[%c2_145, %c512_146, %c0_147] : memref<3x1152x128xbf16, #tpu.memory_space<vmem>>, vector<1x128x128xbf16>
    %303 = vector.shape_cast %302 : vector<1x128x128xbf16> to vector<128x128xbf16>
    %304 = arith.truncf %264 : vector<32x128xf32> to vector<32x128xbf16>
    %cst_148 = arith.constant dense<0.000000e+00> : vector<32x128xf32>
    %305 = tpu.matmul %304, %303, %cst_148 {dimension_numbers = #tpu.dot_dimension_numbers<[1], [0], [0], [1], [0, 0, 1, 1], [], []>} : vector<32x128xbf16>, vector<128x128xbf16>, vector<32x128xf32> -> vector<32x128xf32>
    %306 = arith.addf %301, %305 : vector<32x128xf32>
    %c31_i32_149 = arith.constant 31 : i32
    %307 = tpu.dynamic_rotate %264 by %c31_i32_149 dim 0 : vector<32x128xf32>, i32 -> vector<32x128xf32>
    %308 = vector.extract_strided_slice %0 {offsets = [0, 5], sizes = [32, 1], strides = [1, 1]} : vector<32x128xf32> to vector<32x1xf32>
    %309 = vector.broadcast %308 : vector<32x1xf32> to vector<32x128xf32>
    %310 = arith.mulf %307, %309 : vector<32x128xf32>
    %c2_150 = arith.constant 2 : index
    %c640_151 = arith.constant 640 : index
    %c0_152 = arith.constant 0 : index
    %311 = vector.load %arg3[%c2_150, %c640_151, %c0_152] : memref<3x1152x128xbf16, #tpu.memory_space<vmem>>, vector<1x128x128xbf16>
    %312 = vector.shape_cast %311 : vector<1x128x128xbf16> to vector<128x128xbf16>
    %313 = arith.truncf %310 : vector<32x128xf32> to vector<32x128xbf16>
    %cst_153 = arith.constant dense<0.000000e+00> : vector<32x128xf32>
    %314 = tpu.matmul %313, %312, %cst_153 {dimension_numbers = #tpu.dot_dimension_numbers<[1], [0], [0], [1], [0, 0, 1, 1], [], []>} : vector<32x128xbf16>, vector<128x128xbf16>, vector<32x128xf32> -> vector<32x128xf32>
    %315 = arith.addf %306, %314 : vector<32x128xf32>
    %c29_i32_154 = arith.constant 29 : i32
    %316 = tpu.dynamic_rotate %264 by %c29_i32_154 dim 0 : vector<32x128xf32>, i32 -> vector<32x128xf32>
    %317 = vector.extract_strided_slice %0 {offsets = [0, 6], sizes = [32, 1], strides = [1, 1]} : vector<32x128xf32> to vector<32x1xf32>
    %318 = vector.broadcast %317 : vector<32x1xf32> to vector<32x128xf32>
    %319 = arith.mulf %316, %318 : vector<32x128xf32>
    %c2_155 = arith.constant 2 : index
    %c768_156 = arith.constant 768 : index
    %c0_157 = arith.constant 0 : index
    %320 = vector.load %arg3[%c2_155, %c768_156, %c0_157] : memref<3x1152x128xbf16, #tpu.memory_space<vmem>>, vector<1x128x128xbf16>
    %321 = vector.shape_cast %320 : vector<1x128x128xbf16> to vector<128x128xbf16>
    %322 = arith.truncf %319 : vector<32x128xf32> to vector<32x128xbf16>
    %cst_158 = arith.constant dense<0.000000e+00> : vector<32x128xf32>
    %323 = tpu.matmul %322, %321, %cst_158 {dimension_numbers = #tpu.dot_dimension_numbers<[1], [0], [0], [1], [0, 0, 1, 1], [], []>} : vector<32x128xbf16>, vector<128x128xbf16>, vector<32x128xf32> -> vector<32x128xf32>
    %324 = arith.addf %315, %323 : vector<32x128xf32>
    %c28_i32_159 = arith.constant 28 : i32
    %325 = tpu.dynamic_rotate %264 by %c28_i32_159 dim 0 : vector<32x128xf32>, i32 -> vector<32x128xf32>
    %326 = vector.extract_strided_slice %0 {offsets = [0, 7], sizes = [32, 1], strides = [1, 1]} : vector<32x128xf32> to vector<32x1xf32>
    %327 = vector.broadcast %326 : vector<32x1xf32> to vector<32x128xf32>
    %328 = arith.mulf %325, %327 : vector<32x128xf32>
    %c2_160 = arith.constant 2 : index
    %c896_161 = arith.constant 896 : index
    %c0_162 = arith.constant 0 : index
    %329 = vector.load %arg3[%c2_160, %c896_161, %c0_162] : memref<3x1152x128xbf16, #tpu.memory_space<vmem>>, vector<1x128x128xbf16>
    %330 = vector.shape_cast %329 : vector<1x128x128xbf16> to vector<128x128xbf16>
    %331 = arith.truncf %328 : vector<32x128xf32> to vector<32x128xbf16>
    %cst_163 = arith.constant dense<0.000000e+00> : vector<32x128xf32>
    %332 = tpu.matmul %331, %330, %cst_163 {dimension_numbers = #tpu.dot_dimension_numbers<[1], [0], [0], [1], [0, 0, 1, 1], [], []>} : vector<32x128xbf16>, vector<128x128xbf16>, vector<32x128xf32> -> vector<32x128xf32>
    %333 = arith.addf %324, %332 : vector<32x128xf32>
    %c27_i32_164 = arith.constant 27 : i32
    %334 = tpu.dynamic_rotate %264 by %c27_i32_164 dim 0 : vector<32x128xf32>, i32 -> vector<32x128xf32>
    %335 = vector.extract_strided_slice %0 {offsets = [0, 8], sizes = [32, 1], strides = [1, 1]} : vector<32x128xf32> to vector<32x1xf32>
    %336 = vector.broadcast %335 : vector<32x1xf32> to vector<32x128xf32>
    %337 = arith.mulf %334, %336 : vector<32x128xf32>
    %c2_165 = arith.constant 2 : index
    %c1024_166 = arith.constant 1024 : index
    %c0_167 = arith.constant 0 : index
    %338 = vector.load %arg3[%c2_165, %c1024_166, %c0_167] : memref<3x1152x128xbf16, #tpu.memory_space<vmem>>, vector<1x128x128xbf16>
    %339 = vector.shape_cast %338 : vector<1x128x128xbf16> to vector<128x128xbf16>
    %340 = arith.truncf %337 : vector<32x128xf32> to vector<32x128xbf16>
    %cst_168 = arith.constant dense<0.000000e+00> : vector<32x128xf32>
    %341 = tpu.matmul %340, %339, %cst_168 {dimension_numbers = #tpu.dot_dimension_numbers<[1], [0], [0], [1], [0, 0, 1, 1], [], []>} : vector<32x128xbf16>, vector<128x128xbf16>, vector<32x128xf32> -> vector<32x128xf32>
    %342 = arith.addf %333, %341 : vector<32x128xf32>
    %c2_169 = arith.constant 2 : index
    %c0_170 = arith.constant 0 : index
    %c0_171 = arith.constant 0 : index
    %343 = vector.load %arg4[%c2_169, %c0_170, %c0_171] : memref<3x3x128xf32, #tpu.memory_space<vmem>>, vector<1x1x128xf32>
    %344 = vector.shape_cast %343 : vector<1x1x128xf32> to vector<1x128xf32>
    %345 = vector.broadcast %344 : vector<1x128xf32> to vector<32x128xf32>
    %346 = arith.addf %342, %345 : vector<32x128xf32>
    %cst_172 = arith.constant 5.000000e-01 : f32
    %347 = vector.broadcast %cst_172 : f32 to vector<32x128xf32>
    %348 = arith.mulf %347, %346 : vector<32x128xf32>
    %cst_173 = arith.constant 0.707106769 : f32
    %349 = vector.broadcast %cst_173 : f32 to vector<32x128xf32>
    %350 = arith.mulf %346, %349 : vector<32x128xf32>
    %cst_174 = arith.constant 0.000000e+00 : f32
    %351 = vector.broadcast %cst_174 : f32 to vector<32x128xf32>
    %352 = arith.cmpf oge, %350, %351 : vector<32x128xf32>
    %cst_175 = arith.constant 1.000000e+00 : f32
    %cst_176 = arith.constant -1.000000e+00 : f32
    %353 = vector.broadcast %cst_175 : f32 to vector<32x128xf32>
    %354 = vector.broadcast %cst_176 : f32 to vector<32x128xf32>
    %355 = arith.select %352, %353, %354 : vector<32x128xi1>, vector<32x128xf32>
    %356 = math.absf %350 : vector<32x128xf32>
    %cst_177 = arith.constant 0.327591091 : f32
    %357 = vector.broadcast %cst_177 : f32 to vector<32x128xf32>
    %358 = arith.mulf %357, %356 : vector<32x128xf32>
    %cst_178 = arith.constant 1.000000e+00 : f32
    %359 = vector.broadcast %cst_178 : f32 to vector<32x128xf32>
    %360 = arith.addf %359, %358 : vector<32x128xf32>
    %361 = tpu.reciprocal %360 {approx = true} : vector<32x128xf32> -> vector<32x128xf32>
    %cst_179 = arith.constant 1.06140542 : f32
    %362 = vector.broadcast %cst_179 : f32 to vector<32x128xf32>
    %363 = arith.mulf %362, %361 : vector<32x128xf32>
    %cst_180 = arith.constant -1.45315206 : f32
    %364 = vector.broadcast %cst_180 : f32 to vector<32x128xf32>
    %365 = arith.addf %363, %364 : vector<32x128xf32>
    %366 = arith.mulf %365, %361 : vector<32x128xf32>
    %cst_181 = arith.constant 1.42141378 : f32
    %367 = vector.broadcast %cst_181 : f32 to vector<32x128xf32>
    %368 = arith.addf %366, %367 : vector<32x128xf32>
    %369 = arith.mulf %368, %361 : vector<32x128xf32>
    %cst_182 = arith.constant -0.284496725 : f32
    %370 = vector.broadcast %cst_182 : f32 to vector<32x128xf32>
    %371 = arith.addf %369, %370 : vector<32x128xf32>
    %372 = arith.mulf %371, %361 : vector<32x128xf32>
    %cst_183 = arith.constant 0.254829586 : f32
    %373 = vector.broadcast %cst_183 : f32 to vector<32x128xf32>
    %374 = arith.addf %372, %373 : vector<32x128xf32>
    %375 = arith.mulf %374, %361 : vector<32x128xf32>
    %cst_184 = arith.constant 0.000000e+00 : f32
    %376 = vector.broadcast %cst_184 : f32 to vector<32x128xf32>
    %377 = arith.subf %376, %356 : vector<32x128xf32>
    %378 = arith.mulf %377, %356 : vector<32x128xf32>
    %379 = math.exp %378 : vector<32x128xf32>
    %380 = arith.mulf %375, %379 : vector<32x128xf32>
    %cst_185 = arith.constant 1.000000e+00 : f32
    %381 = vector.broadcast %cst_185 : f32 to vector<32x128xf32>
    %382 = arith.subf %381, %380 : vector<32x128xf32>
    %383 = arith.mulf %355, %382 : vector<32x128xf32>
    %cst_186 = arith.constant 1.000000e+00 : f32
    %384 = vector.broadcast %cst_186 : f32 to vector<32x128xf32>
    %385 = arith.addf %384, %383 : vector<32x128xf32>
    %386 = arith.mulf %348, %385 : vector<32x128xf32>
    %c2_187 = arith.constant 2 : index
    %c1_188 = arith.constant 1 : index
    %c0_189 = arith.constant 0 : index
    %387 = vector.load %arg4[%c2_187, %c1_188, %c0_189] : memref<3x3x128xf32, #tpu.memory_space<vmem>>, vector<1x1x128xf32>
    %388 = vector.shape_cast %387 : vector<1x1x128xf32> to vector<1x128xf32>
    %389 = vector.broadcast %388 : vector<1x128xf32> to vector<32x128xf32>
    %390 = arith.mulf %386, %389 : vector<32x128xf32>
    %c2_190 = arith.constant 2 : index
    %c2_191 = arith.constant 2 : index
    %c0_192 = arith.constant 0 : index
    %391 = vector.load %arg4[%c2_190, %c2_191, %c0_192] : memref<3x3x128xf32, #tpu.memory_space<vmem>>, vector<1x1x128xf32>
    %392 = vector.shape_cast %391 : vector<1x1x128xf32> to vector<1x128xf32>
    %393 = vector.broadcast %392 : vector<1x128xf32> to vector<32x128xf32>
    %394 = arith.addf %390, %393 : vector<32x128xf32>
    %395 = arith.addf %394, %264 : vector<32x128xf32>
    %396 = math.tanh %395 : vector<32x128xf32>
    %397 = vector.extract_strided_slice %396 {offsets = [0, 0], sizes = [16, 128], strides = [1, 1]} : vector<32x128xf32> to vector<16x128xf32>
    %cst_193 = arith.constant dense<0.000000e+00> : vector<128xf32>
    %398 = vector.multi_reduction <add>, %397, %cst_193 [0] : vector<16x128xf32> to vector<128xf32>
    %399 = vector.shape_cast %398 : vector<128xf32> to vector<1x128xf32>
    %cst_194 = arith.constant 1.600000e+01 : f32
    %400 = vector.broadcast %cst_194 : f32 to vector<1x128xf32>
    %401 = arith.divf %399, %400 : vector<1x128xf32>
    %402 = vector.extract_strided_slice %396 {offsets = [16, 0], sizes = [16, 128], strides = [1, 1]} : vector<32x128xf32> to vector<16x128xf32>
    %cst_195 = arith.constant dense<0.000000e+00> : vector<128xf32>
    %403 = vector.multi_reduction <add>, %402, %cst_195 [0] : vector<16x128xf32> to vector<128xf32>
    %404 = vector.shape_cast %403 : vector<128xf32> to vector<1x128xf32>
    %cst_196 = arith.constant 1.600000e+01 : f32
    %405 = vector.broadcast %cst_196 : f32 to vector<1x128xf32>
    %406 = arith.divf %404, %405 : vector<1x128xf32>
    %407 = tpu.concatenate %401, %406 in 0 : vector<1x128xf32>, vector<1x128xf32> -> vector<2x128xf32>
    %c0_197 = arith.constant 0 : index
    %c0_198 = arith.constant 0 : index
    %c0_199 = arith.constant 0 : index
    %408 = vector.load %arg5[%c0_197, %c0_198, %c0_199] : memref<3x128x128xbf16, #tpu.memory_space<vmem>>, vector<1x128x128xbf16>
    %409 = vector.shape_cast %408 : vector<1x128x128xbf16> to vector<128x128xbf16>
    %410 = arith.truncf %407 : vector<2x128xf32> to vector<2x128xbf16>
    %cst_200 = arith.constant dense<0.000000e+00> : vector<2x128xf32>
    %411 = tpu.matmul %410, %409, %cst_200 {dimension_numbers = #tpu.dot_dimension_numbers<[1], [0], [0], [1], [0, 0, 1, 1], [], []>} : vector<2x128xbf16>, vector<128x128xbf16>, vector<2x128xf32> -> vector<2x128xf32>
    %c0_201 = arith.constant 0 : index
    %c0_202 = arith.constant 0 : index
    %412 = vector.load %arg6[%c0_201, %c0_202] : memref<4x128xf32, #tpu.memory_space<vmem>>, vector<1x128xf32>
    %413 = vector.broadcast %412 : vector<1x128xf32> to vector<2x128xf32>
    %414 = arith.addf %411, %413 : vector<2x128xf32>
    %cst_203 = arith.constant 0.000000e+00 : f32
    %415 = vector.broadcast %cst_203 : f32 to vector<2x128xf32>
    %416 = arith.maximumf %414, %415 : vector<2x128xf32>
    %c1_204 = arith.constant 1 : index
    %c0_205 = arith.constant 0 : index
    %c0_206 = arith.constant 0 : index
    %417 = vector.load %arg5[%c1_204, %c0_205, %c0_206] : memref<3x128x128xbf16, #tpu.memory_space<vmem>>, vector<1x128x128xbf16>
    %418 = vector.shape_cast %417 : vector<1x128x128xbf16> to vector<128x128xbf16>
    %419 = arith.truncf %416 : vector<2x128xf32> to vector<2x128xbf16>
    %cst_207 = arith.constant dense<0.000000e+00> : vector<2x128xf32>
    %420 = tpu.matmul %419, %418, %cst_207 {dimension_numbers = #tpu.dot_dimension_numbers<[1], [0], [0], [1], [0, 0, 1, 1], [], []>} : vector<2x128xbf16>, vector<128x128xbf16>, vector<2x128xf32> -> vector<2x128xf32>
    %c1_208 = arith.constant 1 : index
    %c0_209 = arith.constant 0 : index
    %421 = vector.load %arg6[%c1_208, %c0_209] : memref<4x128xf32, #tpu.memory_space<vmem>>, vector<1x128xf32>
    %422 = vector.broadcast %421 : vector<1x128xf32> to vector<2x128xf32>
    %423 = arith.addf %420, %422 : vector<2x128xf32>
    %cst_210 = arith.constant 0.000000e+00 : f32
    %424 = vector.broadcast %cst_210 : f32 to vector<2x128xf32>
    %425 = arith.maximumf %423, %424 : vector<2x128xf32>
    %c2_211 = arith.constant 2 : index
    %c0_212 = arith.constant 0 : index
    %c0_213 = arith.constant 0 : index
    %426 = vector.load %arg5[%c2_211, %c0_212, %c0_213] : memref<3x128x128xbf16, #tpu.memory_space<vmem>>, vector<1x128x128xbf16>
    %427 = vector.shape_cast %426 : vector<1x128x128xbf16> to vector<128x128xbf16>
    %428 = arith.truncf %425 : vector<2x128xf32> to vector<2x128xbf16>
    %cst_214 = arith.constant dense<0.000000e+00> : vector<2x128xf32>
    %429 = tpu.matmul %428, %427, %cst_214 {dimension_numbers = #tpu.dot_dimension_numbers<[1], [0], [0], [1], [0, 0, 1, 1], [], []>} : vector<2x128xbf16>, vector<128x128xbf16>, vector<2x128xf32> -> vector<2x128xf32>
    %c2_215 = arith.constant 2 : index
    %c0_216 = arith.constant 0 : index
    %430 = vector.load %arg6[%c2_215, %c0_216] : memref<4x128xf32, #tpu.memory_space<vmem>>, vector<1x128xf32>
    %431 = vector.broadcast %430 : vector<1x128xf32> to vector<2x128xf32>
    %432 = arith.addf %429, %431 : vector<2x128xf32>
    %cst_217 = arith.constant 0.000000e+00 : f32
    %433 = vector.broadcast %cst_217 : f32 to vector<2x128xf32>
    %434 = arith.maximumf %432, %433 : vector<2x128xf32>
    %c0_218 = arith.constant 0 : index
    %c0_219 = arith.constant 0 : index
    %435 = vector.load %arg7[%c0_218, %c0_219] : memref<128x128xbf16, #tpu.memory_space<vmem>>, vector<128x128xbf16>
    %436 = arith.truncf %434 : vector<2x128xf32> to vector<2x128xbf16>
    %cst_220 = arith.constant dense<0.000000e+00> : vector<2x128xf32>
    %437 = tpu.matmul %436, %435, %cst_220 {dimension_numbers = #tpu.dot_dimension_numbers<[1], [0], [0], [1], [0, 0, 1, 1], [], []>} : vector<2x128xbf16>, vector<128x128xbf16>, vector<2x128xf32> -> vector<2x128xf32>
    %c3 = arith.constant 3 : index
    %c0_221 = arith.constant 0 : index
    %438 = vector.load %arg6[%c3, %c0_221] : memref<4x128xf32, #tpu.memory_space<vmem>>, vector<1x128xf32>
    %439 = vector.broadcast %438 : vector<1x128xf32> to vector<2x128xf32>
    %440 = arith.addf %437, %439 : vector<2x128xf32>
    %c0_222 = arith.constant 0 : index
    %c0_223 = arith.constant 0 : index
    %441 = vector.load %arg8[%c0_222, %c0_223] : memref<2x128xf32, #tpu.memory_space<vmem>>, vector<2x128xf32>
    tpu.vector_store %arg8[%c0_222, %c0_223], %440 {strides = array<i32>} : memref<2x128xf32, #tpu.memory_space<vmem>>, vector<2x128xf32>,
    return
  }
}

</mosaic_0001>

<bundles_post_ra>
// kernel: bagnet_forward.1
= control target key start
LH: loop header
LB: loop body
LE: loop exit
PB: predicated region body
PF: predicated region fallthrough
CT: control target
= control target key end

     0   :  { %13 = vsyncpa [#allocation3], 0  ;;  %s8062_s0 = inlined_call_operand.vmem [shape: f32[32,128], index: 0, kind: input, shape index: {}]   ;;  %s8063_s1 = inlined_call_operand.vmem [shape: f32[32,128], index: 1, kind: input, shape index: {}]   ;;  %s8064_s2 = inlined_call_operand.vmem [shape: f32[32,128], index: 2, kind: input, shape index: {}]   ;;  %s8065_s3 = inlined_call_operand.vmem [shape: bf16[3,1152,128], index: 3, kind: input, shape index: {}]   ;;  %s8066_s4 = inlined_call_operand.vmem [shape: f32[3,3,128], index: 4, kind: input, shape index: {}]   ;;  %s8067_s5 = inlined_call_operand.hbm [shape: bf16[3,128,128], index: 5, kind: input, shape index: {}]   ;;  %s8068_s6 = inlined_call_operand.vmem [shape: f32[4,128], index: 6, kind: input, shape index: {}]   ;;  %s8069_s7 = inlined_call_operand.vmem [shape: bf16[128,128], index: 7, kind: input, shape index: {}]   ;;  %s8070_s8 = inlined_call_operand.hbm [shape: f32[2,128], index: 8, kind: output, shape index: {}]  }
   0x1   :  { %14 = vsyncpa [#allocation4], 0  ;;  %s6458_s27 = smov [#allocation2]   ;;  %s6410_s9 = scalar_lea.hbm %s8067_s5, 3072 }
   0x2   :  { %s30_s28 = sshll.u32 %s6458_s27, 4  ;;  %p6411_p0 = scmp.ne.s32.totalorder %s8067_s5, %s6410_s9  ;;  %s31_s28 = int_to_ptr.vmem [resolvable:$true] %s30_s28 }
   0x3   :  { %p6414_p1 = scmp.lt.u32.totalorder %s6410_s9, %s8067_s5 }
   0x5   :  { %p6416_p2 = pnand %p6414_p1, %p6411_p0 }
   0x7   :  { %6419 = shalt.err (!%p6416_p2)
}
   0x8   :  { %s6420_s14 = scalar_lea.vmem %s31_s28, 3072  ;;  %p6425_p4 = scmp.lt.s32.totalorder %s31_s28, %s31_s28 }
   0x9   :  { %p6421_p3 = scmp.ne.s32.totalorder %s31_s28, %s6420_s14  ;;  %p6426_p5 = scmp.lt.s32.totalorder %s6420_s14, %s6420_s14 }
   0xb   :  { %p6427_p6 = por %p6426_p5, %p6425_p4 }
   0xd   :  { %p6428_p7 = pnand %p6427_p6, %p6421_p3 }
   0xf   :  { %6431 = shalt.err (!%p6428_p7)
}
  0x10   :  { %s6459_s15 = smov 64   ;;  %s6460_s16 = smov 4  }
  0x11   :  { %36 = dma.hbm_to_vmem [thread:$0]  %s8067_s5, 3072, %s31_s28, [#allocation3], %s6459_s15, %s6459_s15, %s6460_s16  }
  0x12   :  { %6454 = dma.done.wait [#allocation3], 3072  }
  0x13   :  { %6455 = vsyncadd [#allocation3], 4294964224  ;;  %v6461_v0 = vmov 2   ;;  %v6533_v1 = vld [vmem:[%s8064_s2 + $0x10] sm:$0xff]  ;;  %v6538_v2 = vld [vmem:[%s8064_s2] sm:$0xff]  ;;  %v6462_v8 = vmov 3   ;;  %v61_v28 = vlaneseq }
  0x14   :  { %6087 = vset.pattern.permute.xlu1 %v6461_v0  ;;  %6086 = vset.pattern.permute.xlu0 %v6461_v0  ;;  %v6543_v3 = vld [vmem:[%s8064_s2 + $0x18] sm:$0xff]  ;;  %v6550_v4 = vld [vmem:[%s8064_s2 + $0x8] sm:$0xff]  ;;  %v6106_v5 = vld [vmem:[%s8065_s3 + $0x80] sm:$0xff]   ;;  %v6463_v11 = vmov 5   ;;  %v6464_v13 = vmov 6   ;;  %v6465_v16 = vmov 1  }
  0x15   :  { %369 = vperm.xlu1 %6087, %v6533_v1   ;;  %361 = vperm.xlu0 %6086, %v6538_v2   ;;  %v6107_v6 = vld [vmem:[%s8065_s3 + $0x88] sm:$0xff]   ;;  %v6108_v7 = vld [vmem:[%s8065_s3 + $0x90] sm:$0xff]   ;;  %v6109_v9 = vld [vmem:[%s8065_s3 + $0x98] sm:$0xff]   ;;  %v6466_v18 = vmov 7   ;;  %v6467_v19 = vmov 0   ;;  %v6468_v20 = vmov 8  }
  0x16   :  { %5395 = vmatprep.subr.bf16.mxu0 %v6106_v5  ;;  %v6110_v10 = vld [vmem:[%s8065_s3 + $0xa0] sm:$0xff]   ;;  %v6111_v12 = vld [vmem:[%s8065_s3 + $0xa8] sm:$0xff]   ;;  %v6112_v14 = vld [vmem:[%s8065_s3 + $0xb0] sm:$0xff]   ;;  %v6648_v32 = vshrl.u32 %v61_v28, 7  ;;  %vm6471_vm13 = vmmov 0  }
  0x17   :  { %5396 = vmatpush3.bf16.msra.mxu0 %v6106_v5  ;;  %v6113_v15 = vld [vmem:[%s8065_s3 + $0xb8] sm:$0xff]   ;;  %v6592_v17 = vld [vmem:[%s8065_s3 + $0xc0] sm:$0xff]   ;;  %v6138_v22 = vld [vmem:[%s8065_s3 + $0x48] sm:$0xff]  }
  0x18   :  { %5397 = vmatprep.subr.bf16.mxu0 %v6107_v6  ;;  %v6136_v21 = vld [vmem:[%s8065_s3 + $0x40] sm:$0xff]   ;;  %v6140_v23 = vld [vmem:[%s8065_s3 + $0x50] sm:$0xff]   ;;  %v6142_v24 = vld [vmem:[%s8065_s3 + $0x58] sm:$0xff]   ;;  %vm355_vm0 = vcmp.lt.s32.totalorder %v6648_v32, 3  ;;  %vm503_vm1 = vcmp.lt.s32.totalorder %v6648_v32, 1  ;;  %vm114_vm2 = vcmp.lt.s32.totalorder %v6648_v32, 4 }
  0x19   :  { %373 = vperm.xlu1 %6087, %v6543_v3   ;;  %365 = vperm.xlu0 %6086, %v6550_v4   ;;  %v6144_v25 = vld [vmem:[%s8065_s3 + $0x60] sm:$0xff]   ;;  %v6146_v26 = vld [vmem:[%s8065_s3 + $0x68] sm:$0xff]   ;;  %v6148_v29 = vld [vmem:[%s8065_s3 + $0x70] sm:$0xff]   ;;  %vm63_vm3 = vcmp.lt.s32.totalorder %v6648_v32, 5  ;;  %vm770_vm4 = vcmp.lt.s32.totalorder %v6648_v32, 7 }
  0x1a   :  { %5355 = vmatprep.subr.bf16.mxu1 %v6136_v21  ;;  %v6633_v27 = vld [vmem:[%s8062_s0 + $0x8] sm:$0xff]  ;;  %v6641_v30 = vld [vmem:[%s8062_s0 + $0x10] sm:$0xff]  ;;  %v6646_v31 = vld [vmem:[%s8062_s0 + $0x18] sm:$0xff] }
  0x1b   :  { %5398 = vmatpush3.bf16.msra.mxu0 %v6107_v6  ;;  %5356 = vmatpush3.bf16.msra.mxu1 %v6136_v21  ;;  %v352_v33 = vrot.slane %v6633_v27, 5  ;;  %v6654_v34 = vld [vmem:[%s8062_s0] sm:$0xff]  ;;  %v6150_v35 = vld [vmem:[%s8065_s3 + $0x78] sm:$0xff]   ;;  %v353_v36 = vrot.slane %v6641_v30, 5  ;;  %v354_v37 = vrot.slane %v6646_v31, 5  ;;  %v500_v47 = vrot.slane %v6633_v27, 7 }
  0x1c   :  { %5399 = vmatprep.subr.bf16.mxu0 %v6108_v7  ;;  %5357 = vmatprep.subr.bf16.mxu1 %v6138_v22  ;;  %v351_v38 = vrot.slane %v6654_v34, 5  ;;  %v6665_v39 = vld [vmem:[%s8065_s3] sm:$0xff]   ;;  %v499_v42 = vrot.slane %v6654_v34, 7  ;;  %v502_v48 = vrot.slane %v6646_v31, 7  ;;  %v6115_v59 = vld [vmem:[%s8065_s3 + $0xc8] sm:$0xff]   ;;  %v6116_v0 = vld [vmem:[%s8065_s3 + $0xd0] sm:$0xff]  }
  0x1d   :  { %6089 = vset.pattern.permute.xlu1 %v6462_v8  ;;  %6088 = vset.pattern.permute.xlu0 %v6462_v8  ;;  %v6676_v43 = vsel %vm355_vm0, %v352_v33, %v353_v36  ;;  %v6680_v44 = vsel %vm355_vm0, %v353_v36, %v354_v37  ;;  %v6118_v6 = vld [vmem:[%s8065_s3 + $0xe0] sm:$0xff]   ;;  %v6300_v32 = vld [vmem:[%s8065_s3 + $0x610] sm:$0xff]  }
  0x1e   :  { %513 = vperm.xlu1 %6089, %v6550_v4   ;;  %509 = vperm.xlu0 %6088, %v6538_v2   ;;  %v6684_v45 = vsel %vm355_vm0, %v351_v38, %v352_v33  ;;  %v6688_v46 = vsel %vm355_vm0, %v354_v37, %v351_v38  ;;  %v506_v57 = vsel %vm503_vm1, %v499_v42, %v500_v47  ;;  %v6123_v33 = vld [vmem:[%s8065_s3 + $0x108] sm:$0xff]  }
  0x1f   :  { %5400 = vmatpush3.bf16.msra.mxu0 %v6108_v7  ;;  %5358 = vmatpush3.bf16.msra.mxu1 %v6138_v22  ;;  %v507_v58 = vsel %vm503_vm1, %v502_v48, %v499_v42  ;;  %v6122_v22 = vld [vmem:[%s8065_s3 + $0x100] sm:$0xff]  }
  0x20   :  { %5401 = vmatprep.subr.bf16.mxu0 %v6109_v9  ;;  %5359 = vmatprep.subr.bf16.mxu1 %v6140_v23 }
  0x22   :  { %517 = vperm.xlu1 %6089, %v6533_v1   ;;  %521 = vperm.xlu0 %6088, %v6543_v3  }
  0x23   :  { %5402 = vmatpush3.bf16.msra.mxu0 %v6109_v9  ;;  %5360 = vmatpush3.bf16.msra.mxu1 %v6140_v23  ;;  %v6119_v9 = vld [vmem:[%s8065_s3 + $0xe8] sm:$0xff]  }
  0x24   :  { %5403 = vmatprep.subr.bf16.mxu0 %v6110_v10  ;;  %5361 = vmatprep.subr.bf16.mxu1 %v6142_v24 }
  0x26   :  { %6090 = vset.pattern.permute.xlu1 %v6463_v11  ;;  %6091 = vset.pattern.permute.xlu0 %v6463_v11  ;;  %v6120_v11 = vld [vmem:[%s8065_s3 + $0xf0] sm:$0xff]  }
  0x27   :  { %776 = vperm.xlu1 %6090, %v6538_v2   ;;  %780 = vperm.xlu0 %6091, %v6550_v4  }
  0x28   :  { %5404 = vmatpush3.bf16.msra.mxu0 %v6110_v10  ;;  %5362 = vmatpush3.bf16.msra.mxu1 %v6142_v24  ;;  %v501_v10 = vrot.slane %v6641_v30, 7 }
  0x29   :  { %5405 = vmatprep.subr.bf16.mxu0 %v6111_v12  ;;  %5363 = vmatprep.subr.bf16.mxu1 %v6144_v25 }
  0x2a   :  { %v504_v21 = vsel %vm503_vm1, %v501_v10, %v502_v48  ;;  %v766_v48 = vrot.slane %v6654_v34, 1 }
  0x2b   :  { %784 = vperm.xlu1 %6090, %v6533_v1   ;;  %6092 = vset.pattern.permute.xlu0 %v6464_v13 }
  0x2c   :  { %915 = vperm.xlu0 %6092, %v6538_v2   ;;  %5406 = vmatpush3.bf16.msra.mxu0 %v6111_v12 }
  0x2d   :  { %5407 = vmatprep.subr.bf16.mxu0 %v6112_v14  ;;  %5364 = vmatpush3.bf16.msra.mxu1 %v6144_v25 }
  0x2e   :  { %5365 = vmatprep.subr.bf16.mxu1 %v6146_v26 }
  0x2f   :  { %788 = vperm.xlu1 %6090, %v6543_v3  }
  0x30   :  { %927 = vperm.xlu0 %6092, %v6543_v3   ;;  %5408 = vmatpush3.bf16.msra.mxu0 %v6112_v14  ;;  %v111_v14 = vrot.slane %v6633_v27, 4 }
  0x31   :  { %5409 = vmatprep.subr.bf16.mxu0 %v6113_v15  ;;  %5366 = vmatpush3.bf16.msra.mxu1 %v6146_v26 }
  0x32   :  { %5367 = vmatprep.subr.bf16.mxu1 %v6148_v29 }
  0x33   :  { %6093 = vset.pattern.permute.xlu1 %v6464_v13 }
  0x34   :  { %919 = vperm.xlu1 %6093, %v6550_v4   ;;  %6095 = vset.pattern.permute.xlu0 %v6465_v16 }
  0x35   :  { %124 = vperm.xlu0 %6095, %v6550_v4   ;;  %5410 = vmatpush3.bf16.msra.mxu0 %v6113_v15  ;;  %v6121_v15 = vld [vmem:[%s8065_s3 + $0xf8] sm:$0xff]  }
  0x36   :  { %5415 = vmatprep.subr.bf16.mxu0 %v6592_v17  ;;  %5368 = vmatpush3.bf16.msra.mxu1 %v6148_v29 }
  0x37   :  { %5369 = vmatprep.subr.bf16.mxu1 %v6150_v35 }
  0x38   :  { %923 = vperm.xlu1 %6093, %v6533_v1  }
  0x39   :  { %128 = vperm.xlu0 %6095, %v6533_v1  }
  0x3a   :  { %5370 = vmatpush3.bf16.msra.mxu1 %v6150_v35  ;;  %v663_v35 = vpack.c.bf16 %v6633_v27, %v6654_v34 }
  0x3b   :  { %5375 = vmatprep.subr.bf16.mxu1 %v6665_v39 }
  0x3c   :  { %6094 = vset.pattern.permute.xlu1 %v6465_v16 }
  0x3d   :  { %120 = vperm.xlu1 %6094, %v6538_v2   ;;  %6098 = vset.pattern.permute.xlu0 %v6466_v18 }
  0x3e   :  { %1062 = vperm.xlu0 %6098, %v6533_v1  }
  0x41   :  { %6096 = vset.pattern.permute.xlu1 %v6466_v18 }
  0x42   :  { %1054 = vperm.xlu1 %6096, %v6538_v2   ;;  %6101 = vset.pattern.permute.xlu0 %v6467_v19 }
  0x43   :  { %75 = vperm.xlu0 %6101, %v6550_v4  }
  0x46   :  { %1058 = vperm.xlu1 %6096, %v6550_v4  }
  0x47   :  { %80 = vperm.xlu0 %6101, %v6533_v1  }
  0x4a   :  { %6097 = vset.pattern.permute.xlu1 %v6465_v16 }
  0x4b   :  { %132 = vperm.xlu1 %6097, %v6543_v3   ;;  %6104 = vset.pattern.permute.xlu0 %v6468_v20 }
  0x4c   :  { %1201 = vperm.xlu0 %6104, %v6533_v1  }
  0x4f   :  { %6099 = vset.pattern.permute.xlu1 %v6466_v18  ;;  %v110_v18 = vrot.slane %v6654_v34, 4 }
  0x50   :  { %1066 = vperm.xlu1 %6099, %v6543_v3  }
  0x51   :  { %v117_v26 = vsel %vm114_vm2, %v110_v18, %v111_v14 }
  0x54   :  { %6100 = vset.pattern.permute.xlu1 %v6467_v19 }
  0x55   :  { %70 = vperm.xlu1 %6100, %v6538_v2  }
  0x59   :  { %6102 = vset.pattern.permute.xlu1 %v6468_v20 }
  0x5a   :  { %1193 = vperm.xlu1 %6102, %v6538_v2  }
  0x5e   :  { %1197 = vperm.xlu1 %6102, %v6550_v4  }
  0x62   :  { %6103 = vset.pattern.permute.xlu1 %v6467_v19 }
  0x63   :  { %85 = vperm.xlu1 %6103, %v6543_v3  }
  0x67   :  { %6105 = vset.pattern.permute.xlu1 %v6468_v20  ;;  %v505_v20 = vsel %vm503_vm1, %v500_v47, %v501_v10  ;;  %v6124_v47 = vld [vmem:[%s8065_s3 + $0x110] sm:$0xff]   ;;  %v6127_v10 = vld [vmem:[%s8065_s3 + $0x128] sm:$0xff]  }
  0x68   :  { %1205 = vperm.xlu1 %6105, %v6543_v3   ;;  %v6117_v3 = vld [vmem:[%s8065_s3 + $0xd8] sm:$0xff]  }
  0x94   :  { %v6669_v40 = vpop.permute.xlu1 %369  ;;  %v6671_v41 = vpop.permute.xlu0 %361 }
  0x95   :  { %8091 = vst [vmem:[#allocation8_spill] sm:$0xff] %v6669_v40  ;;  %v378_v51 = vmul.f32 %v6669_v40, %v6676_v43  ;;  %v376_v53 = vmul.f32 %v6671_v41, %v6688_v46 }
  0x98   :  { %v6692_v49 = vpop.permute.xlu1 %373  ;;  %v6694_v50 = vpop.permute.xlu0 %365 }
  0x99   :  { %8092 = vst [vmem:[#allocation9_spill] sm:$0xff] %v6692_v49  ;;  %8093 = vst [vmem:[#allocation10_spill] sm:$0xff] %v6694_v50  ;;  %v379_v52 = vmul.f32 %v6692_v49, %v6680_v44  ;;  %v377_v54 = vmul.f32 %v6694_v50, %v6684_v45 }
  0x9b   :  { %v396_v55 = vpack.c.bf16 %v377_v54, %v376_v53  ;;  %v397_v56 = vpack.c.bf16 %v379_v52, %v378_v51  ;;  %v112_v51 = vrot.slane %v6641_v30, 4  ;;  %v6125_v54 = vld [vmem:[%s8065_s3 + $0x118] sm:$0xff]  }
  0x9d   :  { %5411 = vmatprep.mubr.bf16.mxu0 %v396_v55  ;;  %v6712_v60 = vpop.permute.xlu1 %513  ;;  %v6714_v61 = vpop.permute.xlu0 %509  ;;  %v767_v55 = vrot.slane %v6633_v27, 1 }
  0x9e   :  { %8094 = vst [vmem:[#allocation11_spill] sm:$0xff] %v6712_v60  ;;  %8095 = vst [vmem:[#allocation12_spill] sm:$0xff] %v6714_v61  ;;  %5412 = vmatmul.mubr.bf16.vlgmr.msra.gmra.mrb[0].mxu0 %v397_v56  ;;  %v525_v62 = vmul.f32 %v6712_v60, %v506_v57  ;;  %v524_v63 = vmul.f32 %v6714_v61, %v507_v58  ;;  %v768_v56 = vrot.slane %v6641_v30, 1 }
  0x9f   :  { %5416 = vmatpush3.bf16.msra.mxu0 %v6592_v17  ;;  %v113_v17 = vrot.slane %v6646_v31, 4  ;;  %v116_v58 = vsel %vm114_vm2, %v111_v14, %v112_v51  ;;  %v57_v14 = vrot.slane %v6654_v34, 3 }
  0xa0   :  { %5417 = vmatprep.subr.bf16.mxu0 %v6115_v59  ;;  %v544_v1 = vpack.c.bf16 %v525_v62, %v524_v63  ;;  %v6126_v62 = vld [vmem:[%s8065_s3 + $0x120] sm:$0xff]  }
  0xa1   :  { %v6722_v2 = vpop.permute.xlu1 %517  ;;  %v6727_v4 = vpop.permute.xlu0 %521  ;;  %v118_v29 = vsel %vm114_vm2, %v113_v17, %v110_v18 }
  0xa2   :  { %8096 = vst [vmem:[#allocation13_spill] sm:$0xff] %v6722_v2  ;;  %5431 = vmatprep.mubr.bf16.mxu0 %v544_v1  ;;  %8097 = vst [vmem:[#allocation14_spill] sm:$0xff] %v6727_v4  ;;  %v526_v24 = vmul.f32 %v6722_v2, %v505_v20  ;;  %v527_v25 = vmul.f32 %v6727_v4, %v504_v21  ;;  %v58_v1 = vrot.slane %v6633_v27, 3  ;;  %v6128_v21 = vld [vmem:[%s8065_s3 + $0x130] sm:$0xff]  }
  0xa3   :  { %5418 = vmatpush3.bf16.msra.mxu0 %v6115_v59 }
  0xa4   :  { %5419 = vmatprep.subr.bf16.mxu0 %v6116_v0  ;;  %v545_v37 = vpack.c.bf16 %v527_v25, %v526_v24  ;;  %v60_v24 = vrot.slane %v6646_v31, 3  ;;  %v6156_v25 = vld [vmem:[%s8065_s3 + $0x10] sm:$0xff]  }
  0xa6   :  { %v6729_v5 = vpop.permute.xlu1 %776  ;;  %v6736_v8 = vpop.permute.xlu0 %780 }
  0xa7   :  { %8098 = vst [vmem:[#allocation15_spill] sm:$0xff] %v6729_v5  ;;  %5420 = vmatpush3.bf16.msra.mxu0 %v6116_v0  ;;  %8100 = vst [vmem:[#allocation17_spill] sm:$0xff] %v6736_v8 }
  0xa8   :  { %5421 = vmatprep.subr.bf16.mxu0 %v6117_v3 }
  0xaa   :  { %v6734_v7 = vpop.permute.xlu1 %784 }
  0xab   :  { %8099 = vst [vmem:[#allocation16_spill] sm:$0xff] %v6734_v7  ;;  %5422 = vmatpush3.bf16.msra.mxu0 %v6117_v3  ;;  %v6745_v12 = vpop.permute.xlu0 %915  ;;  %v115_v3 = vsel %vm114_vm2, %v112_v51, %v113_v17  ;;  %v6154_v17 = vld [vmem:[%s8065_s3 + $0x8] sm:$0xff]   ;;  %v772_v51 = vsel %vm770_vm4, %v767_v55, %v768_v56 }
  0xac   :  { %5423 = vmatprep.subr.bf16.mxu0 %v6118_v6 }
  0xae   :  { %v6747_v13 = vpop.permute.xlu1 %788 }
  0xaf   :  { %5424 = vmatpush3.bf16.msra.mxu0 %v6118_v6  ;;  %8101 = vst [vmem:[#allocation18_spill] sm:$0xff] %v6747_v13  ;;  %v6758_v19 = vpop.permute.xlu0 %927 }
  0xb0   :  { %5425 = vmatprep.subr.bf16.mxu0 %v6119_v9 }
  0xb3   :  { %5426 = vmatpush3.bf16.msra.mxu0 %v6119_v9  ;;  %v6754_v16 = vpop.permute.xlu1 %919 }
  0xb4   :  { %5427 = vmatprep.subr.bf16.mxu0 %v6120_v11  ;;  %v6773_v28 = vpop.permute.xlu0 %124 }
  0xb5   :  { %v136_v36 = vmul.f32 %v6773_v28, %v117_v26 }
  0xb7   :  { %5428 = vmatpush3.bf16.msra.mxu0 %v6120_v11  ;;  %v6767_v23 = vpop.permute.xlu1 %923 }
  0xb8   :  { %5429 = vmatprep.subr.bf16.mxu0 %v6121_v15  ;;  %v6811_v0 = vpop.permute.xlu0 %128 }
  0xb9   :  { %v137_v9 = vmul.f32 %v6811_v0, %v116_v58 }
  0xbb   :  { %5430 = vmatpush3.bf16.msra.mxu0 %v6121_v15 }
  0xbc   :  { %5435 = vmatprep.subr.bf16.mxu0 %v6122_v22  ;;  %v6783_v38 = vpop.permute.xlu1 %120 }
  0xbd   :  { %v135_v42 = vmul.f32 %v6783_v38, %v118_v29  ;;  %v6831_v18 = vpop.permute.xlu0 %1062 }
  0xbe   :  { %5432 = vmatmul.mubr.bf16.vlgmr.msra.gmra.mrb[0].mxu0 %v545_v37 }
  0xbf   :  { %5436 = vmatpush3.bf16.msra.mxu0 %v6122_v22  ;;  %5451 = vmatprep.mubr.bf16.mxu0 %v663_v35  ;;  %v155_v52 = vpack.c.bf16 %v136_v36, %v135_v42  ;;  %v6837_v22 = vmul.f32 %v6831_v18, %v115_v3  ;;  %v6129_v35 = vld [vmem:[%s8065_s3 + $0x138] sm:$0xff]   ;;  %v6856_v36 = vsel %vm63_vm3, %v57_v14, %v58_v1 }
  0xc0   :  { %5437 = vmatprep.subr.bf16.mxu0 %v6123_v33 }
  0xc1   :  { %v6791_v53 = vpop.permute.xlu1 %1054  ;;  %5371 = vmatprep.mubr.bf16.mxu1 %v155_v52  ;;  %v6877_v52 = vsel %vm63_vm3, %v60_v24, %v57_v14 }
  0xc2   :  { %v6799_v57 = vmul.f32 %v6791_v53, %v117_v26  ;;  %v6860_v42 = vpop.permute.xlu0 %75 }
  0xc3   :  { %5438 = vmatpush3.bf16.msra.mxu0 %v6123_v33 }
  0xc4   :  { %5439 = vmatprep.subr.bf16.mxu0 %v6124_v47 }
  0xc5   :  { %v6803_v59 = vpop.permute.xlu1 %1058 }
  0xc6   :  { %v6809_v63 = vmul.f32 %v6803_v59, %v116_v58 }
  0xc7   :  { %5440 = vmatpush3.bf16.msra.mxu0 %v6124_v47  ;;  %v773_v47 = vsel %vm770_vm4, %v766_v48, %v767_v55  ;;  %v6130_v55 = vld [vmem:[%s8065_s3 + $0x140] sm:$0xff]  }
  0xc8   :  { %5441 = vmatprep.subr.bf16.mxu0 %v6125_v54  ;;  %v1089_v6 = vpack.c.bf16 %v6809_v63, %v6799_v57  ;;  %v6167_v57 = vld [vmem:[%s8065_s3 + $0x1e8] sm:$0xff]   ;;  %v6168_v63 = vld [vmem:[%s8065_s3 + $0x1f0] sm:$0xff]  }
  0xca   :  { %v6824_v11 = vpop.permute.xlu1 %132 }
  0xcb   :  { %5442 = vmatpush3.bf16.msra.mxu0 %v6125_v54  ;;  %v138_v15 = vmul.f32 %v6824_v11, %v115_v3  ;;  %v792_v3 = vmul.f32 %v6736_v8, %v772_v51 }
  0xcc   :  { %5443 = vmatprep.subr.bf16.mxu0 %v6126_v62 }
  0xcd   :  { %v156_v20 = vpack.c.bf16 %v138_v15, %v137_v9  ;;  %v664_v15 = vpack.c.bf16 %v6646_v31, %v6641_v30 }
  0xcf   :  { %5444 = vmatpush3.bf16.msra.mxu0 %v6126_v62  ;;  %5372 = vmatmul.mubr.bf16.vlgmr.msra.gmra.mrb[0].mxu1 %v156_v20  ;;  %v6843_v26 = vpop.permute.xlu1 %1066  ;;  %v791_v62 = vmul.f32 %v6729_v5, %v773_v47  ;;  %v6131_v20 = vld [vmem:[%s8065_s3 + $0x148] sm:$0xff]   ;;  %v6133_v47 = vld [vmem:[%s8065_s3 + $0x158] sm:$0xff]  }
  0xd0   :  { %5445 = vmatprep.subr.bf16.mxu0 %v6127_v10  ;;  %5376 = vmatpush3.bf16.msra.mxu1 %v6665_v39  ;;  %v6847_v33 = vmul.f32 %v6843_v26, %v118_v29  ;;  %v6158_v39 = vld [vmem:[%s8065_s3 + $0x18] sm:$0xff]   ;;  %v89_v29 = vmul.f32 %v6860_v42, %v6856_v36 }
  0xd1   :  { %5377 = vmatprep.subr.bf16.mxu1 %v6154_v17 }
  0xd2   :  { %v1090_v37 = vpack.c.bf16 %v6847_v33, %v6837_v22  ;;  %v6174_v22 = vld [vmem:[%s8065_s3 + $0x220] sm:$0xff]   ;;  %v6175_v33 = vld [vmem:[%s8065_s3 + $0x228] sm:$0xff]  }
  0xd3   :  { %5446 = vmatpush3.bf16.msra.mxu0 %v6127_v10  ;;  %v6160_v10 = vld [vmem:[%s8065_s3 + $0x20] sm:$0xff]  }
  0xd4   :  { %5447 = vmatprep.subr.bf16.mxu0 %v6128_v21  ;;  %5378 = vmatpush3.bf16.msra.mxu1 %v6154_v17  ;;  %v6879_v54 = vpop.permute.xlu1 %70  ;;  %v811_v17 = vpack.c.bf16 %v792_v3, %v791_v62  ;;  %v6166_v62 = vld [vmem:[%s8065_s3 + $0x38] sm:$0xff]  }
  0xd5   :  { %5379 = vmatprep.subr.bf16.mxu1 %v6156_v25  ;;  %v88_v58 = vmul.f32 %v6879_v54, %v6877_v52 }
  0xd7   :  { %5448 = vmatpush3.bf16.msra.mxu0 %v6128_v21  ;;  %v108_v9 = vpack.c.bf16 %v89_v29, %v88_v58  ;;  %v6162_v21 = vld [vmem:[%s8065_s3 + $0x28] sm:$0xff]   ;;  %v59_v29 = vrot.slane %v6641_v30, 3  ;;  %v6915_v58 = vpop.permute.xlu0 %80  ;;  %v6141_v30 = vld [vmem:[%s8065_s3 + $0x180] sm:$0xff]  }
  0xd8   :  { %5449 = vmatprep.subr.bf16.mxu0 %v6129_v35  ;;  %5380 = vmatpush3.bf16.msra.mxu1 %v6156_v25 }
  0xd9   :  { %5381 = vmatprep.subr.bf16.mxu1 %v6158_v39  ;;  %v6891_v14 = vpop.permute.xlu1 %1193  ;;  %5391 = vmatprep.mubr.bf16.mxu1 %v108_v9  ;;  %v65_v3 = vsel %vm63_vm3, %v58_v1, %v59_v29  ;;  %v64_v9 = vsel %vm63_vm3, %v59_v29, %v60_v24  ;;  %v6135_v1 = vld [vmem:[%s8065_s3 + $0x168] sm:$0xff]   ;;  %v6137_v24 = vld [vmem:[%s8065_s3 + $0x170] sm:$0xff]  }
  0xdb   :  { %5450 = vmatpush3.bf16.msra.mxu0 %v6129_v35  ;;  %v6132_v35 = vld [vmem:[%s8065_s3 + $0x150] sm:$0xff]  }
  0xdc   :  { %5455 = vmatprep.subr.bf16.mxu0 %v6130_v55  ;;  %5382 = vmatpush3.bf16.msra.mxu1 %v6158_v39  ;;  %v6164_v39 = vld [vmem:[%s8065_s3 + $0x30] sm:$0xff]  }
  0xdd   :  { %5383 = vmatprep.subr.bf16.mxu1 %v6160_v10  ;;  %v6901_v25 = vpop.permute.xlu1 %1197 }
  0xde   :  { %5452 = vmatmul.mubr.bf16.vlgmr.msra.gmra.mrb[0].mxu0 %v664_v15  ;;  %v6134_v15 = vld [vmem:[%s8065_s3 + $0x160] sm:$0xff]  }
  0xdf   :  { %5456 = vmatpush3.bf16.msra.mxu0 %v6130_v55  ;;  %5471 = vmatprep.mubr.bf16.mxu0 %v811_v17  ;;  %v769_v17 = vrot.slane %v6646_v31, 1  ;;  %v930_v31 = vmul.f32 %v6745_v12, %v6856_v36  ;;  %v6145_v36 = vld [vmem:[%s8065_s3 + $0x190] sm:$0xff]  }
  0xe0   :  { %5457 = vmatprep.subr.bf16.mxu0 %v6131_v20  ;;  %5384 = vmatpush3.bf16.msra.mxu1 %v6160_v10  ;;  %v90_v10 = vmul.f32 %v6915_v58, %v65_v3 }
  0xe1   :  { %5385 = vmatprep.subr.bf16.mxu1 %v6162_v21 }
  0xe2   :  { %v6913_v51 = vpop.permute.xlu1 %85 }
  0xe3   :  { %5458 = vmatpush3.bf16.msra.mxu0 %v6131_v20  ;;  %v91_v55 = vmul.f32 %v6913_v51, %v64_v9  ;;  %v6139_v20 = vld [vmem:[%s8065_s3 + $0x178] sm:$0xff]  }
  0xe4   :  { %5459 = vmatprep.subr.bf16.mxu0 %v6132_v35  ;;  %5386 = vmatpush3.bf16.msra.mxu1 %v6162_v21  ;;  %v771_v21 = vsel %vm770_vm4, %v768_v56, %v769_v17 }
  0xe5   :  { %5387 = vmatprep.subr.bf16.mxu1 %v6164_v39  ;;  %v109_v27 = vpack.c.bf16 %v91_v55, %v90_v10  ;;  %v793_v29 = vmul.f32 %v6734_v7, %v771_v21  ;;  %v6151_v55 = vld [vmem:[%s8065_s3 + $0x1a8] sm:$0xff]   ;;  %v6153_v10 = vld [vmem:[%s8065_s3 + $0x1b0] sm:$0xff]   ;;  %v6165_v21 = vld [vmem:[%s8065_s3 + $0x1e0] sm:$0xff]  }
  0xe7   :  { %5460 = vmatpush3.bf16.msra.mxu0 %v6132_v35  ;;  %v774_v35 = vsel %vm770_vm4, %v769_v17, %v766_v48  ;;  %v6143_v48 = vld [vmem:[%s8065_s3 + $0x188] sm:$0xff]  }
  0xe8   :  { %5461 = vmatprep.subr.bf16.mxu0 %v6133_v47  ;;  %5388 = vmatpush3.bf16.msra.mxu1 %v6164_v39  ;;  %v931_v39 = vmul.f32 %v6754_v16, %v65_v3  ;;  %v6149_v3 = vld [vmem:[%s8065_s3 + $0x1a0] sm:$0xff]  }
  0xe9   :  { %5389 = vmatprep.subr.bf16.mxu1 %v6166_v62 }
  0xea   :  { %v950_v34 = vpack.c.bf16 %v931_v39, %v930_v31  ;;  %v1209_v39 = vmul.f32 %v6901_v25, %v6676_v43  ;;  %v6170_v31 = vld [vmem:[%s8065_s3 + $0x200] sm:$0xff]   ;;  %v6172_v43 = vld [vmem:[%s8065_s3 + $0x210] sm:$0xff]  }
  0xeb   :  { %5462 = vmatpush3.bf16.msra.mxu0 %v6133_v47  ;;  %v794_v47 = vmul.f32 %v6747_v13, %v774_v35  ;;  %v1208_v35 = vmul.f32 %v6891_v14, %v6684_v45  ;;  %v6173_v45 = vld [vmem:[%s8065_s3 + $0x218] sm:$0xff]  }
  0xec   :  { %5463 = vmatprep.subr.bf16.mxu0 %v6134_v15  ;;  %5390 = vmatpush3.bf16.msra.mxu1 %v6166_v62  ;;  %v6147_v62 = vld [vmem:[%s8065_s3 + $0x198] sm:$0xff]  }
  0xed   :  { %v812_v56 = vpack.c.bf16 %v794_v47, %v793_v29  ;;  %v1228_v29 = vpack.c.bf16 %v1209_v39, %v1208_v35  ;;  %v6171_v47 = vld [vmem:[%s8065_s3 + $0x208] sm:$0xff]  }
  0xef   :  { %5464 = vmatpush3.bf16.msra.mxu0 %v6134_v15  ;;  %5392 = vmatmul.mubr.bf16.vlgmr.msra.gmra.mrb[0].mxu1 %v109_v27  ;;  %v6155_v15 = vld [vmem:[%s8065_s3 + $0x1b8] sm:$0xff]   ;;  %v932_v27 = vmul.f32 %v6767_v23, %v64_v9 }
  0xf0   :  { %5465 = vmatprep.subr.bf16.mxu0 %v6135_v1  ;;  %v6163_v9 = vld [vmem:[%s8065_s3 + $0x1d8] sm:$0xff]  }
  0xf3   :  { %5466 = vmatpush3.bf16.msra.mxu0 %v6135_v1  ;;  %v933_v1 = vmul.f32 %v6758_v19, %v6877_v52  ;;  %v6161_v52 = vld [vmem:[%s8065_s3 + $0x1d0] sm:$0xff]  }
  0xf4   :  { %5467 = vmatprep.subr.bf16.mxu0 %v6137_v24 }
  0xf5   :  { %v951_v17 = vpack.c.bf16 %v933_v1, %v932_v27  ;;  %v6178_v27 = vld [vmem:[%s8065_s3 + $0x280] sm:$0xff]   ;;  %v6181_v1 = vld [vmem:[%s8065_s3 + $0x298] sm:$0xff]  }
  0xf6   :  { %5535 = vmatprep.subr.bf16.mxu1 %v6178_v27 }
  0xf7   :  { %5468 = vmatpush3.bf16.msra.mxu0 %v6137_v24  ;;  %v6157_v24 = vld [vmem:[%s8065_s3 + $0x1c0] sm:$0xff]   ;;  %5536 = vmatpush3.bf16.msra.mxu1 %v6178_v27 }
  0xf8   :  { %5469 = vmatprep.subr.bf16.mxu0 %v6139_v20 }
  0xfb   :  { %5470 = vmatpush3.bf16.msra.mxu0 %v6139_v20  ;;  %v6159_v20 = vld [vmem:[%s8065_s3 + $0x1c8] sm:$0xff]  }
  0xfc   :  { %5475 = vmatprep.subr.bf16.mxu0 %v6141_v30 }
  0xfe   :  { %5472 = vmatmul.mubr.bf16.vlgmr.msra.gmra.mrb[0].mxu0 %v812_v56  ;;  %v6177_v56 = vld [vmem:[%s8065_s3 + $0x238] sm:$0xff]  }
  0xff   :  { %5476 = vmatpush3.bf16.msra.mxu0 %v6141_v30  ;;  %5491 = vmatprep.mubr.bf16.mxu0 %v950_v34  ;;  %v7036_v30 = vpop.permute.xlu1 %1205  ;;  %v7038_v34 = vpop.permute.xlu0 %1201 }
 0x100   :  { %5477 = vmatprep.subr.bf16.mxu0 %v6143_v48 }
 0x103   :  { %5478 = vmatpush3.bf16.msra.mxu0 %v6143_v48  ;;  %v1211_v48 = vmul.f32 %v7036_v30, %v6688_v46  ;;  %v6179_v46 = vld [vmem:[%s8065_s3 + $0x288] sm:$0xff]  }
 0x104   :  { %5479 = vmatprep.subr.bf16.mxu0 %v6145_v36  ;;  %5537 = vmatprep.subr.bf16.mxu1 %v6179_v46 }
 0x105   :  { %5538 = vmatpush3.bf16.msra.mxu1 %v6179_v46 }
 0x107   :  { %5480 = vmatpush3.bf16.msra.mxu0 %v6145_v36  ;;  %v1210_v36 = vmul.f32 %v7038_v34, %v6680_v44  ;;  %v6180_v44 = vld [vmem:[%s8065_s3 + $0x290] sm:$0xff]  }
 0x108   :  { %5481 = vmatprep.subr.bf16.mxu0 %v6147_v62  ;;  %5539 = vmatprep.subr.bf16.mxu1 %v6180_v44 }
 0x109   :  { %5540 = vmatpush3.bf16.msra.mxu1 %v6180_v44 }
 0x10a   :  { %5541 = vmatprep.subr.bf16.mxu1 %v6181_v1 }
 0x10b   :  { %5482 = vmatpush3.bf16.msra.mxu0 %v6147_v62  ;;  %v1229_v62 = vpack.c.bf16 %v1211_v48, %v1210_v36 }
 0x10c   :  { %5483 = vmatprep.subr.bf16.mxu0 %v6149_v3 }
 0x10d   :  { %5542 = vmatpush3.bf16.msra.mxu1 %v6181_v1 }
 0x10f   :  { %5484 = vmatpush3.bf16.msra.mxu0 %v6149_v3 }
 0x110   :  { %5485 = vmatprep.subr.bf16.mxu0 %v6151_v55 }
 0x113   :  { %5486 = vmatpush3.bf16.msra.mxu0 %v6151_v55 }
 0x114   :  { %5487 = vmatprep.subr.bf16.mxu0 %v6153_v10 }
 0x117   :  { %5488 = vmatpush3.bf16.msra.mxu0 %v6153_v10 }
 0x118   :  { %5489 = vmatprep.subr.bf16.mxu0 %v6155_v15 }
 0x11b   :  { %5490 = vmatpush3.bf16.msra.mxu0 %v6155_v15 }
 0x11c   :  { %5495 = vmatprep.subr.bf16.mxu0 %v6157_v24 }
 0x11e   :  { %5492 = vmatmul.mubr.bf16.vlgmr.msra.gmra.mrb[0].mxu0 %v951_v17  ;;  %v6183_v17 = vld [vmem:[%s8065_s3 + $0x2a8] sm:$0xff]  }
 0x11f   :  { %5496 = vmatpush3.bf16.msra.mxu0 %v6157_v24  ;;  %5511 = vmatprep.mubr.bf16.mxu0 %v1089_v6  ;;  %v6169_v6 = vld [vmem:[%s8065_s3 + $0x1f8] sm:$0xff]   ;;  %v6182_v24 = vld [vmem:[%s8065_s3 + $0x2a0] sm:$0xff]  }
 0x120   :  { %5497 = vmatprep.subr.bf16.mxu0 %v6159_v20  ;;  %5543 = vmatprep.subr.bf16.mxu1 %v6182_v24 }
 0x121   :  { %5544 = vmatpush3.bf16.msra.mxu1 %v6182_v24 }
 0x122   :  { %5545 = vmatprep.subr.bf16.mxu1 %v6183_v17 }
 0x123   :  { %5498 = vmatpush3.bf16.msra.mxu0 %v6159_v20  ;;  %v6184_v20 = vld [vmem:[%s8065_s3 + $0x2b0] sm:$0xff]  }
 0x124   :  { %5499 = vmatprep.subr.bf16.mxu0 %v6161_v52 }
 0x125   :  { %5546 = vmatpush3.bf16.msra.mxu1 %v6183_v17 }
 0x126   :  { %5547 = vmatprep.subr.bf16.mxu1 %v6184_v20 }
 0x127   :  { %5500 = vmatpush3.bf16.msra.mxu0 %v6161_v52  ;;  %v6185_v52 = vld [vmem:[%s8065_s3 + $0x2b8] sm:$0xff]  }
 0x128   :  { %5501 = vmatprep.subr.bf16.mxu0 %v6163_v9 }
 0x129   :  { %5548 = vmatpush3.bf16.msra.mxu1 %v6184_v20 }
 0x12a   :  { %5549 = vmatprep.subr.bf16.mxu1 %v6185_v52 }
 0x12b   :  { %5502 = vmatpush3.bf16.msra.mxu0 %v6163_v9  ;;  %v7074_v9 = vld [vmem:[%s8065_s3 + $0x240] sm:$0xff]  }
 0x12c   :  { %5503 = vmatprep.subr.bf16.mxu0 %v6165_v21 }
 0x12d   :  { %5550 = vmatpush3.bf16.msra.mxu1 %v6185_v52 }
 0x12e   :  { %5555 = vmatprep.subr.bf16.mxu1 %v7074_v9 }
 0x12f   :  { %5504 = vmatpush3.bf16.msra.mxu0 %v6165_v21 }
 0x130   :  { %5505 = vmatprep.subr.bf16.mxu0 %v6167_v57 }
 0x133   :  { %5506 = vmatpush3.bf16.msra.mxu0 %v6167_v57  ;;  %v4566_v57 = vld [vmem:[%s8066_s4] ss:$0 sm:$0xff] }
 0x134   :  { %5507 = vmatprep.subr.bf16.mxu0 %v6168_v63 }
 0x137   :  { %5508 = vmatpush3.bf16.msra.mxu0 %v6168_v63 }
 0x138   :  { %5509 = vmatprep.subr.bf16.mxu0 %v6169_v6 }
 0x13b   :  { %5510 = vmatpush3.bf16.msra.mxu0 %v6169_v6 }
 0x13c   :  { %5515 = vmatprep.subr.bf16.mxu0 %v6170_v31 }
 0x13e   :  { %5512 = vmatmul.mubr.bf16.vlgmr.msra.gmra.mrb[0].mxu0 %v1090_v37  ;;  %v6176_v37 = vld [vmem:[%s8065_s3 + $0x230] sm:$0xff]  }
 0x13f   :  { %5516 = vmatpush3.bf16.msra.mxu0 %v6170_v31  ;;  %5531 = vmatprep.mubr.bf16.mxu0 %v1228_v29 }
 0x140   :  { %5517 = vmatprep.subr.bf16.mxu0 %v6171_v47 }
 0x143   :  { %5518 = vmatpush3.bf16.msra.mxu0 %v6171_v47 }
 0x144   :  { %5519 = vmatprep.subr.bf16.mxu0 %v6172_v43 }
 0x147   :  { %5520 = vmatpush3.bf16.msra.mxu0 %v6172_v43 }
 0x148   :  { %5521 = vmatprep.subr.bf16.mxu0 %v6173_v45 }
 0x14b   :  { %5522 = vmatpush3.bf16.msra.mxu0 %v6173_v45 }
 0x14c   :  { %5523 = vmatprep.subr.bf16.mxu0 %v6174_v22 }
 0x14f   :  { %5524 = vmatpush3.bf16.msra.mxu0 %v6174_v22 }
 0x150   :  { %5525 = vmatprep.subr.bf16.mxu0 %v6175_v33 }
 0x153   :  { %5526 = vmatpush3.bf16.msra.mxu0 %v6175_v33 }
 0x154   :  { %5527 = vmatprep.subr.bf16.mxu0 %v6176_v37 }
 0x157   :  { %5528 = vmatpush3.bf16.msra.mxu0 %v6176_v37 }
 0x158   :  { %5529 = vmatprep.subr.bf16.mxu0 %v6177_v56 }
 0x15b   :  { %5530 = vmatpush3.bf16.msra.mxu0 %v6177_v56 }
 0x15e   :  { %5532 = vmatmul.mubr.bf16.vlgmr.msra.gmra.mrb[0].mxu0 %v1229_v62 }
 0x1c2   :  { %v5393_v3 = vpop.f32.mrb[0].mxu1 }
 0x1c3   :  { %v336_v55 = vpop.f32.mrb[1].mxu1 }
 0x1c4   :  { %v5394_v10 = vpop.f32.mrb[2].mxu1 }
 0x1c5   :  { %v339_v15 = vpop.f32.mrb[3].mxu1 }
 0x231   :  { %v5533_v21 = vpop.f32.mrb[0].mxu0 }
 0x232   :  { %v5975_v63 = vadd.f32 %v5533_v21, %v5393_v3  ;;  %v1312_v6 = vpop.f32.mrb[1].mxu0 }
 0x233   :  { %v5976_v35 = vadd.f32 %v1312_v6, %v336_v55  ;;  %v5534_v39 = vpop.f32.mrb[2].mxu0 }
 0x234   :  { %v7080_v31 = vadd.f32 %v5975_v63, %v4566_v57  ;;  %v5977_v29 = vadd.f32 %v5534_v39, %v5394_v10  ;;  %v1315_v47 = vpop.f32.mrb[3].mxu0 }
 0x235   :  { %v7082_v43 = vadd.f32 %v5976_v35, %v4566_v57  ;;  %v5978_v45 = vadd.f32 %v1315_v47, %v339_v15 }
 0x236   :  { %v7085_v22 = vmul.f32 0.70710677, %v7080_v31  ;;  %v7087_v33 = vadd.f32 %v5977_v29, %v4566_v57 }
 0x237   :  { %v7090_v37 = vmul.f32 0.70710677, %v7082_v43  ;;  %v7096_v36 = vadd.f32 %v5978_v45, %v4566_v57 }
 0x238   :  { %v1358_v56 = vand.u32 2147483647, %v7085_v22  ;;  %v7094_v48 = vmul.f32 0.70710677, %v7087_v33  ;;  %vm1350_vm5 = vcmp.ge.f32.partialorder %v7085_v22, 0.0 }
 0x239   :  { %v1356_v62 = vand.u32 2147483647, %v7090_v37  ;;  %v7101_v27 = vmul.f32 0.70710677, %v7096_v36  ;;  %vm1348_vm6 = vcmp.ge.f32.partialorder %v7090_v37, 0.0  ;;  %v1342_v37 = vmul.f32 0.5, %v7080_v31 }
 0x23a   :  { %v1362_v3 = vmul.f32 0.3275911, %v1358_v56  ;;  %v1359_v10 = vand.u32 2147483647, %v7094_v48  ;;  %v1410_v52 = vsub.f32 0.0, %v1358_v56  ;;  %vm1351_vm7 = vcmp.ge.f32.partialorder %v7094_v48, 0.0 }
 0x23b   :  { %v1360_v55 = vmul.f32 0.3275911, %v1356_v62  ;;  %v1357_v1 = vand.u32 2147483647, %v7101_v27  ;;  %v1408_v21 = vsub.f32 0.0, %v1356_v62  ;;  %vm1349_vm8 = vcmp.ge.f32.partialorder %v7101_v27, 0.0 }
 0x23c   :  { %v1366_v15 = vadd.f32 1.0, %v1362_v3  ;;  %v1363_v44 = vmul.f32 0.3275911, %v1359_v10  ;;  %v1414_v63 = vmul.f32 %v1410_v52, %v1358_v56  ;;  %v1411_v6 = vsub.f32 0.0, %v1359_v10  ;;  %v4568_v31 = vld [vmem:[%s8066_s4 + $0x2] ss:$0 sm:$0xff] }
 0x23d   :  { %v1364_v46 = vadd.f32 1.0, %v1360_v55  ;;  %v1361_v17 = vmul.f32 0.3275911, %v1357_v1  ;;  %v1412_v29 = vmul.f32 %v1408_v21, %v1356_v62  ;;  %v1409_v45 = vsub.f32 0.0, %v1357_v1 }
 0x23e   :  { %6354 = vrcp.f32 %v1366_v15  ;;  %v1367_v24 = vadd.f32 1.0, %v1363_v44  ;;  %v1420_v15 = vmul.f32 1.442695, %v1414_v63 }
 0x23f   :  { %6356 = vrcp.f32 %v1364_v46  ;;  %v1365_v20 = vadd.f32 1.0, %v1361_v17  ;;  %v1415_v46 = vmul.f32 %v1411_v6, %v1359_v10  ;;  %v1416_v7 = vmul.f32 1.442695, %v1412_v29 }
 0x240   :  { %6358 = vrcp.f32 %v1367_v24 }
 0x241   :  { %6360 = vrcp.f32 %v1365_v20  ;;  %v1413_v20 = vmul.f32 %v1409_v45, %v1357_v1  ;;  %v1422_v2 = vmul.f32 1.442695, %v1415_v46 }
 0x242   :  { %6362 = vpow2.f32 %v1420_v15 }
 0x243   :  { %6364 = vpow2.f32 %v1416_v7  ;;  %v1418_v63 = vmul.f32 1.442695, %v1413_v20 }
 0x244   :  { %6366 = vpow2.f32 %v1422_v2 }
 0x245   :  { %6368 = vpow2.f32 %v1418_v63 }
 0x248   :  { %v6355_v57 = vpop.eup %6354 }
 0x249   :  { %v6357_v35 = vpop.eup %6356  ;;  %v1374_v39 = vmul.f32 1.0614054, %v6355_v57 }
 0x24a   :  { %v1372_v47 = vmul.f32 1.0614054, %v6357_v35  ;;  %v6359_v55 = vpop.eup %6358 }
 0x24b   :  { %v1378_v3 = vadd.f32 -1.4531521, %v1374_v39  ;;  %v1375_v24 = vmul.f32 1.0614054, %v6359_v55  ;;  %v6361_v17 = vpop.eup %6360 }
 0x24c   :  { %v1376_v13 = vadd.f32 -1.4531521, %v1372_v47  ;;  %v1373_v56 = vmul.f32 1.0614054, %v6361_v17 }
 0x24d   :  { %v1382_v44 = vmul.f32 %v6355_v57, %v1378_v3  ;;  %v1379_v4 = vadd.f32 -1.4531521, %v1375_v24  ;;  %v6363_v24 = vpop.eup %6362 }
 0x24e   :  { %v1380_v8 = vmul.f32 %v6357_v35, %v1376_v13  ;;  %v1377_v39 = vadd.f32 -1.4531521, %v1373_v56  ;;  %v6365_v56 = vpop.eup %6364 }
 0x24f   :  { %v1386_v5 = vadd.f32 1.4214138, %v1382_v44  ;;  %v1383_v21 = vmul.f32 %v6359_v55, %v1379_v4 }
 0x250   :  { %v1384_v52 = vadd.f32 1.4214138, %v1380_v8  ;;  %v1381_v6 = vmul.f32 %v6361_v17, %v1377_v39 }
 0x251   :  { %v1390_v62 = vmul.f32 %v6355_v57, %v1386_v5  ;;  %v1387_v10 = vadd.f32 1.4214138, %v1383_v21 }
 0x252   :  { %v1388_v60 = vmul.f32 %v6357_v35, %v1384_v52  ;;  %v1385_v1 = vadd.f32 1.4214138, %v1381_v6 }
 0x253   :  { %v1394_v47 = vadd.f32 -0.28449672, %v1390_v62  ;;  %v1391_v13 = vmul.f32 %v6359_v55, %v1387_v10  ;;  %v8085_v10 = vmov -1.0  }
 0x254   :  { %v1392_v29 = vadd.f32 -0.28449672, %v1388_v60  ;;  %v1389_v8 = vmul.f32 %v6361_v17, %v1385_v1  ;;  %v1352_v6 = vsel %vm1348_vm6, 1.0, %v8085_v10  ;;  %v1355_v48 = vsel %vm1351_vm7, 1.0, %v8085_v10 }
 0x255   :  { %v1398_v3 = vmul.f32 %v6355_v57, %v1394_v47  ;;  %v1395_v15 = vadd.f32 -0.28449672, %v1391_v13  ;;  %v6367_v47 = vpop.eup %6366  ;;  %v1353_v27 = vsel %vm1349_vm8, 1.0, %v8085_v10 }
 0x256   :  { %v1396_v45 = vmul.f32 %v6357_v35, %v1392_v29  ;;  %v1393_v4 = vadd.f32 -0.28449672, %v1389_v8  ;;  %v6369_v13 = vpop.eup %6368  ;;  %v1340_v8 = vmul.f32 0.5, %v7082_v43 }
 0x257   :  { %v1402_v44 = vadd.f32 0.2548296, %v1398_v3  ;;  %v1399_v7 = vmul.f32 %v6359_v55, %v1395_v15  ;;  %v4567_v15 = vld [vmem:[%s8066_s4 + $0x1] ss:$0 sm:$0xff] }
 0x258   :  { %v1400_v46 = vadd.f32 0.2548296, %v1396_v45  ;;  %v1397_v2 = vmul.f32 %v6361_v17, %v1393_v4 }
 0x259   :  { %v1406_v5 = vmul.f32 %v6355_v57, %v1402_v44  ;;  %v1403_v60 = vadd.f32 0.2548296, %v1399_v7  ;;  %v1354_v57 = vsel %vm1350_vm5, 1.0, %v8085_v10 }
 0x25a   :  { %v1404_v20 = vmul.f32 %v6357_v35, %v1400_v46  ;;  %v1401_v63 = vadd.f32 0.2548296, %v1397_v2  ;;  %v53_v2 = vld [vmem:[%s8063_s1] sm:$0xff] }
 0x25b   :  { %v1426_v52 = vmul.f32 %v6363_v24, %v1406_v5  ;;  %v1407_v39 = vmul.f32 %v6359_v55, %v1403_v60 }
 0x25c   :  { %v1424_v62 = vmul.f32 %v6365_v56, %v1404_v20  ;;  %v1405_v35 = vmul.f32 %v6361_v17, %v1401_v63  ;;  %v1343_v20 = vmul.f32 0.5, %v7087_v33  ;;  %v55_v63 = vld [vmem:[%s8063_s1 + $0x10] sm:$0xff] }
 0x25d   :  { %v1430_v21 = vsub.f32 1.0, %v1426_v52  ;;  %v1427_v22 = vmul.f32 %v6367_v47, %v1407_v39 }
 0x25e   :  { %v1428_v29 = vsub.f32 1.0, %v1424_v62  ;;  %v1425_v55 = vmul.f32 %v6369_v13, %v1405_v35 }
 0x25f   :  { %v1434_v3 = vmul.f32 %v1430_v21, %v1354_v57  ;;  %v1431_v44 = vsub.f32 1.0, %v1427_v22  ;;  %v1341_v21 = vmul.f32 0.5, %v7096_v36  ;;  %v54_v36 = vld [vmem:[%s8063_s1 + $0x8] sm:$0xff] }
 0x260   :  { %v1432_v1 = vmul.f32 %v1428_v29, %v1352_v6  ;;  %v1429_v7 = vsub.f32 1.0, %v1425_v55  ;;  %v56_v29 = vld [vmem:[%s8063_s1 + $0x18] sm:$0xff] }
 0x261   :  { %v1438_v45 = vadd.f32 1.0, %v1434_v3  ;;  %v1435_v17 = vmul.f32 %v1431_v44, %v1355_v48 }
 0x262   :  { %v1436_v46 = vadd.f32 1.0, %v1432_v1  ;;  %v1433_v52 = vmul.f32 %v1429_v7, %v1353_v27 }
 0x263   :  { %v1442_v5 = vmul.f32 %v1438_v45, %v1342_v37  ;;  %v1439_v56 = vadd.f32 1.0, %v1435_v17 }
 0x264   :  { %v1440_v4 = vmul.f32 %v1436_v46, %v1340_v8  ;;  %v1437_v39 = vadd.f32 1.0, %v1433_v52 }
 0x265   :  { %v1451_v24 = vmul.f32 %v4567_v15, %v1442_v5  ;;  %v1443_v62 = vmul.f32 %v1439_v56, %v1343_v20 }
 0x266   :  { %v1449_v60 = vmul.f32 %v4567_v15, %v1440_v4  ;;  %v1441_v6 = vmul.f32 %v1437_v39, %v1341_v21  ;;  %v6187_v21 = vld [vmem:[%s8065_s3 + $0x248] sm:$0xff]  }
 0x267   :  { %v1460_v43 = vadd.f32 %v4568_v31, %v1451_v24  ;;  %v1452_v57 = vmul.f32 %v4567_v15, %v1443_v62 }
 0x268   :  { %v1458_v47 = vadd.f32 %v4568_v31, %v1449_v60  ;;  %v1450_v35 = vmul.f32 %v4567_v15, %v1441_v6 }
 0x269   :  { %v7133_v3 = vadd.f32 %v1460_v43, %v55_v63  ;;  %v1461_v22 = vadd.f32 %v4568_v31, %v1452_v57 }
 0x26a   :  { %v7128_v33 = vadd.f32 %v1458_v47, %v53_v2  ;;  %v1459_v37 = vadd.f32 %v4568_v31, %v1450_v35 }
 0x26b   :  { %v7138_v13 = vadd.f32 %v1461_v22, %v56_v29  ;;  %v1499_v8 = vrot.slane %v7133_v3, 4  ;;  %v1468_v57 = vrot.slane %v7133_v3, 3  ;;  %v6188_v29 = vld [vmem:[%s8065_s3 + $0x250] sm:$0xff]  }
 0x26c   :  { %v1497_v1 = vrot.slane %v7128_v33, 4  ;;  %v1466_v45 = vrot.slane %v7128_v33, 3  ;;  %v7142_v44 = vadd.f32 %v1459_v37, %v54_v36  ;;  %v1721_v63 = vrot.slane %v7128_v33, 5 }
 0x26d   :  { %v1500_v55 = vrot.slane %v7138_v13, 4  ;;  %v1469_v46 = vrot.slane %v7138_v13, 3  ;;  %v1724_v47 = vrot.slane %v7138_v13, 5  ;;  %v1723_v36 = vrot.slane %v7133_v3, 5 }
 0x26e   :  { %v1498_v15 = vrot.slane %v7142_v44, 4  ;;  %v1467_v17 = vrot.slane %v7142_v44, 3  ;;  %v1722_v6 = vrot.slane %v7142_v44, 5 }
 0x26f   :  { %v1504_v48 = vsel %vm114_vm2, %v1500_v55, %v1497_v1  ;;  %v1501_v5 = vsel %vm114_vm2, %v1499_v8, %v1500_v55  ;;  %v1473_v4 = vsel %vm63_vm3, %v1469_v46, %v1466_v45  ;;  %v1470_v22 = vsel %vm63_vm3, %v1468_v57, %v1469_v46 }
 0x270   :  { %v1505_v7 = vmul.f32 %v1504_v48, %v6783_v38  ;;  %v1508_v31 = vmul.f32 %v1501_v5, %v6824_v11  ;;  %v1503_v27 = vsel %vm114_vm2, %v1497_v1, %v1498_v15  ;;  %v1502_v24 = vsel %vm114_vm2, %v1498_v15, %v1499_v8  ;;  %v6189_v8 = vld [vmem:[%s8065_s3 + $0x258] sm:$0xff]  }
 0x271   :  { %v1472_v20 = vsel %vm63_vm3, %v1466_v45, %v1467_v17  ;;  %v1506_v56 = vmul.f32 %v1503_v27, %v6773_v28  ;;  %v1507_v52 = vmul.f32 %v1502_v24, %v6811_v0  ;;  %v1474_v60 = vmul.f32 %v1473_v4, %v6879_v54 }
 0x272   :  { %v1475_v43 = vmul.f32 %v1472_v20, %v6860_v42  ;;  %v1471_v35 = vsel %vm63_vm3, %v1467_v17, %v1468_v57  ;;  %v1728_v37 = vsel %vm355_vm0, %v1724_v47, %v1721_v63  ;;  %v7189_v1 = vmul.f32 %v1504_v48, %v6843_v26 }
 0x273   :  { %v1525_v2 = vpack.c.bf16 %v1506_v56, %v1505_v7  ;;  %v1526_v62 = vpack.c.bf16 %v1508_v31, %v1507_v52  ;;  %v1727_v45 = vsel %vm355_vm0, %v1721_v63, %v1722_v6  ;;  %v7195_v55 = vsel %vm355_vm0, %v1723_v36, %v1724_v47  ;;  %v6192_v63 = vld [vmem:[%s8065_s3 + $0x270] sm:$0xff]   ;;  %v6193_v47 = vld [vmem:[%s8065_s3 + $0x278] sm:$0xff]  }
 0x274   :  { %v1495_v39 = vpack.c.bf16 %v1475_v43, %v1474_v60  ;;  %v7202_v46 = vsel %vm355_vm0, %v1722_v6, %v1723_v36  ;;  %v7205_v15 = vmul.f32 %v1472_v20, %v6745_v12  ;;  %v7208_v48 = vmul.f32 %v1471_v35, %v6754_v16 }
 0x275   :  { %5551 = vmatprep.mubr.bf16.mxu1 %v1525_v2  ;;  %v7211_v17 = vmul.f32 %v1470_v22, %v6767_v23  ;;  %v7214_v7 = vmul.f32 %v1728_v37, %v7036_v30  ;;  %v7217_v31 = vmul.f32 %v1503_v27, %v6791_v53  ;;  %v7223_v56 = vmul.f32 %v1501_v5, %v6831_v18  ;;  %v6190_v2 = vld [vmem:[%s8065_s3 + $0x260] sm:$0xff]  }
 0x276   :  { %5552 = vmatmul.mubr.bf16.vlgmr.msra.gmra.mrb[4].mxu1 %v1526_v62  ;;  %v2253_v20 = vpack.c.bf16 %v7208_v48, %v7205_v15  ;;  %v7230_v60 = vmul.f32 %v1727_v45, %v6891_v14  ;;  %v7238_v5 = vmul.f32 %v7202_v46, %v6901_v25  ;;  %v7242_v43 = vmul.f32 %v7195_v55, %v7038_v34  ;;  %v6231_v15 = vld [vmem:[%s8065_s3 + $0x3e8] sm:$0xff]   ;;  %v6232_v48 = vld [vmem:[%s8065_s3 + $0x3f0] sm:$0xff]  }
 0x277   :  { %5556 = vmatpush3.bf16.msra.mxu1 %v7074_v9  ;;  %5571 = vmatprep.mubr.bf16.mxu1 %v1495_v39  ;;  %v7184_v9 = vmul.f32 %v1473_v4, %v6758_v19  ;;  %v7220_v4 = vmul.f32 %v1502_v24, %v6803_v59  ;;  %v2377_v24 = vpack.c.bf16 %v7189_v1, %v7223_v56  ;;  %v6191_v39 = vld [vmem:[%s8065_s3 + $0x268] sm:$0xff]   ;;  %v6246_v1 = vld [vmem:[%s8065_s3 + $0x460] sm:$0xff]  }
 0x278   :  { %5557 = vmatprep.subr.bf16.mxu1 %v6187_v21  ;;  %v1476_v57 = vmul.f32 %v1471_v35, %v6915_v58  ;;  %v1477_v6 = vmul.f32 %v1470_v22, %v6913_v51  ;;  %v1729_v36 = vmul.f32 %v1728_v37, %v6671_v41  ;;  %v6196_v22 = vld [vmem:[%s8065_s3 + $0x2d0] sm:$0xff]   ;;  %v6197_v35 = vld [vmem:[%s8065_s3 + $0x2d8] sm:$0xff]   ;;  %v6198_v37 = vld [vmem:[%s8065_s3 + $0x2e0] sm:$0xff]  }
 0x279   :  { %v2254_v52 = vpack.c.bf16 %v7184_v9, %v7211_v17  ;;  %v2376_v27 = vpack.c.bf16 %v7220_v4, %v7217_v31  ;;  %v6238_v9 = vld [vmem:[%s8065_s3 + $0x420] sm:$0xff]   ;;  %v6239_v17 = vld [vmem:[%s8065_s3 + $0x428] sm:$0xff]   ;;  %v6240_v31 = vld [vmem:[%s8065_s3 + $0x430] sm:$0xff]  }
 0x27a   :  { %v6241_v4 = vld [vmem:[%s8065_s3 + $0x438] sm:$0xff]   ;;  %v6247_v56 = vld [vmem:[%s8065_s3 + $0x468] sm:$0xff]  }
 0x27b   :  { %5558 = vmatpush3.bf16.msra.mxu1 %v6187_v21  ;;  %v6219_v21 = vld [vmem:[%s8065_s3 + $0x388] sm:$0xff]  }
 0x27c   :  { %5559 = vmatprep.subr.bf16.mxu1 %v6188_v29 }
 0x27f   :  { %5560 = vmatpush3.bf16.msra.mxu1 %v6188_v29  ;;  %v6194_v29 = vld [vmem:[%s8065_s3 + $0x2c0] sm:$0xff]  }
 0x280   :  { %5561 = vmatprep.subr.bf16.mxu1 %v6189_v8 }
 0x283   :  { %5562 = vmatpush3.bf16.msra.mxu1 %v6189_v8  ;;  %v1730_v8 = vmul.f32 %v1727_v45, %v6694_v50  ;;  %v6199_v45 = vld [vmem:[%s8065_s3 + $0x2e8] sm:$0xff]  }
 0x284   :  { %5563 = vmatprep.subr.bf16.mxu1 %v6190_v2 }
 0x287   :  { %5564 = vmatpush3.bf16.msra.mxu1 %v6190_v2  ;;  %v1496_v2 = vpack.c.bf16 %v1477_v6, %v1476_v57  ;;  %v1852_v57 = vrot.slane %v7128_v33, 7  ;;  %v1853_v6 = vrot.slane %v7142_v44, 7 }
 0x288   :  { %5565 = vmatprep.subr.bf16.mxu1 %v6191_v39 }
 0x28b   :  { %5566 = vmatpush3.bf16.msra.mxu1 %v6191_v39  ;;  %v6195_v39 = vld [vmem:[%s8065_s3 + $0x2c8] sm:$0xff]  }
 0x28c   :  { %5567 = vmatprep.subr.bf16.mxu1 %v6192_v63 }
 0x28f   :  { %5568 = vmatpush3.bf16.msra.mxu1 %v6192_v63  ;;  %v1749_v63 = vpack.c.bf16 %v1730_v8, %v1729_v36  ;;  %v6201_v36 = vld [vmem:[%s8065_s3 + $0x2f8] sm:$0xff]   ;;  %v1858_v8 = vsel %vm503_vm1, %v1852_v57, %v1853_v6 }
 0x290   :  { %5569 = vmatprep.subr.bf16.mxu1 %v6193_v47 }
 0x293   :  { %5570 = vmatpush3.bf16.msra.mxu1 %v6193_v47  ;;  %v6200_v47 = vld [vmem:[%s8065_s3 + $0x2f0] sm:$0xff]  }
 0x294   :  { %5575 = vmatprep.subr.bf16.mxu1 %v6194_v29 }
 0x296   :  { %5572 = vmatmul.mubr.bf16.vlgmr.msra.gmra.mrb[4].mxu1 %v1496_v2 }
 0x297   :  { %5576 = vmatpush3.bf16.msra.mxu1 %v6194_v29  ;;  %5591 = vmatprep.mubr.bf16.mxu1 %v1749_v63  ;;  %v1855_v29 = vrot.slane %v7138_v13, 7  ;;  %v1732_v63 = vmul.f32 %v7195_v55, %v6692_v49  ;;  %v6204_v55 = vld [vmem:[%s8065_s3 + $0x310] sm:$0xff]  }
 0x298   :  { %5577 = vmatprep.subr.bf16.mxu1 %v6195_v39 }
 0x299   :  { %v1859_v2 = vsel %vm503_vm1, %v1855_v29, %v1852_v57 }
 0x29b   :  { %5578 = vmatpush3.bf16.msra.mxu1 %v6195_v39  ;;  %v1731_v39 = vmul.f32 %v7202_v46, %v6669_v40  ;;  %v6205_v46 = vld [vmem:[%s8065_s3 + $0x318] sm:$0xff]  }
 0x29c   :  { %5579 = vmatprep.subr.bf16.mxu1 %v6196_v22 }
 0x29d   :  { %v1750_v10 = vpack.c.bf16 %v1732_v63, %v1731_v39  ;;  %v6209_v39 = vld [vmem:[%s8065_s3 + $0x338] sm:$0xff]  }
 0x29f   :  { %5580 = vmatpush3.bf16.msra.mxu1 %v6196_v22  ;;  %v6202_v22 = vld [vmem:[%s8065_s3 + $0x300] sm:$0xff]  }
 0x2a0   :  { %5581 = vmatprep.subr.bf16.mxu1 %v6197_v35 }
 0x2a3   :  { %5582 = vmatpush3.bf16.msra.mxu1 %v6197_v35  ;;  %v1860_v35 = vmul.f32 %v1859_v2, %v6714_v61  ;;  %v1854_v2 = vrot.slane %v7133_v3, 7 }
 0x2a4   :  { %5583 = vmatprep.subr.bf16.mxu1 %v6198_v37 }
 0x2a5   :  { %v1856_v63 = vsel %vm503_vm1, %v1854_v2, %v1855_v29  ;;  %v6211_v29 = vld [vmem:[%s8065_s3 + $0x348] sm:$0xff]  }
 0x2a7   :  { %5584 = vmatpush3.bf16.msra.mxu1 %v6198_v37  ;;  %v8102_v37 = vld [vmem:[#allocation11_spill] sm:$0xff] }
 0x2a8   :  { %5585 = vmatprep.subr.bf16.mxu1 %v6199_v45 }
 0x2ab   :  { %5586 = vmatpush3.bf16.msra.mxu1 %v6199_v45  ;;  %v1861_v45 = vmul.f32 %v1858_v8, %v8102_v37  ;;  %v6208_v8 = vld [vmem:[%s8065_s3 + $0x330] sm:$0xff]  }
 0x2ac   :  { %5587 = vmatprep.subr.bf16.mxu1 %v6200_v47 }
 0x2ad   :  { %v1880_v57 = vpack.c.bf16 %v1861_v45, %v1860_v35  ;;  %v8103_v35 = vld [vmem:[#allocation13_spill] sm:$0xff] }
 0x2af   :  { %5588 = vmatpush3.bf16.msra.mxu1 %v6200_v47  ;;  %v6203_v47 = vld [vmem:[%s8065_s3 + $0x308] sm:$0xff]  }
 0x2b0   :  { %5589 = vmatprep.subr.bf16.mxu1 %v6201_v36 }
 0x2b3   :  { %5590 = vmatpush3.bf16.msra.mxu1 %v6201_v36  ;;  %v6206_v36 = vld [vmem:[%s8065_s3 + $0x320] sm:$0xff]  }
 0x2b4   :  { %5595 = vmatprep.subr.bf16.mxu1 %v6202_v22 }
 0x2b6   :  { %5592 = vmatmul.mubr.bf16.vlgmr.msra.gmra.mrb[4].mxu1 %v1750_v10  ;;  %v6207_v10 = vld [vmem:[%s8065_s3 + $0x328] sm:$0xff]  }
 0x2b7   :  { %5596 = vmatpush3.bf16.msra.mxu1 %v6202_v22  ;;  %5611 = vmatprep.mubr.bf16.mxu1 %v1880_v57  ;;  %v1857_v22 = vsel %vm503_vm1, %v1853_v6, %v1854_v2  ;;  %v1999_v6 = vpack.c.bf16 %v7142_v44, %v7128_v33  ;;  %v6215_v2 = vld [vmem:[%s8065_s3 + $0x368] sm:$0xff]  }
 0x2b8   :  { %5597 = vmatprep.subr.bf16.mxu1 %v6203_v47  ;;  %v1862_v45 = vmul.f32 %v1857_v22, %v8103_v35  ;;  %v6217_v22 = vld [vmem:[%s8065_s3 + $0x378] sm:$0xff]  }
 0x2bb   :  { %5598 = vmatpush3.bf16.msra.mxu1 %v6203_v47  ;;  %v8104_v47 = vld [vmem:[#allocation14_spill] sm:$0xff] }
 0x2bc   :  { %5599 = vmatprep.subr.bf16.mxu1 %v6204_v55  ;;  %v1863_v57 = vmul.f32 %v1856_v63, %v8104_v47  ;;  %v2103_v63 = vrot.slane %v7142_v44, 1 }
 0x2bf   :  { %5600 = vmatpush3.bf16.msra.mxu1 %v6204_v55  ;;  %v6210_v55 = vld [vmem:[%s8065_s3 + $0x340] sm:$0xff]  }
 0x2c0   :  { %5601 = vmatprep.subr.bf16.mxu1 %v6205_v46 }
 0x2c3   :  { %5602 = vmatpush3.bf16.msra.mxu1 %v6205_v46  ;;  %v1881_v46 = vpack.c.bf16 %v1863_v57, %v1862_v45  ;;  %v2102_v45 = vrot.slane %v7128_v33, 1  ;;  %v2104_v57 = vrot.slane %v7133_v3, 1 }
 0x2c4   :  { %5603 = vmatprep.subr.bf16.mxu1 %v6206_v36 }
 0x2c7   :  { %5604 = vmatpush3.bf16.msra.mxu1 %v6206_v36  ;;  %v6212_v36 = vld [vmem:[%s8065_s3 + $0x350] sm:$0xff]  }
 0x2c8   :  { %5605 = vmatprep.subr.bf16.mxu1 %v6207_v10 }
 0x2cb   :  { %5606 = vmatpush3.bf16.msra.mxu1 %v6207_v10  ;;  %v6213_v10 = vld [vmem:[%s8065_s3 + $0x358] sm:$0xff]  }
 0x2cc   :  { %5607 = vmatprep.subr.bf16.mxu1 %v6208_v8 }
 0x2cf   :  { %5608 = vmatpush3.bf16.msra.mxu1 %v6208_v8  ;;  %v6214_v8 = vld [vmem:[%s8065_s3 + $0x360] sm:$0xff]  }
 0x2d0   :  { %5609 = vmatprep.subr.bf16.mxu1 %v6209_v39 }
 0x2d3   :  { %5610 = vmatpush3.bf16.msra.mxu1 %v6209_v39  ;;  %v6216_v39 = vld [vmem:[%s8065_s3 + $0x370] sm:$0xff]  }
 0x2d4   :  { %5615 = vmatprep.subr.bf16.mxu1 %v6210_v55 }
 0x2d6   :  { %5612 = vmatmul.mubr.bf16.vlgmr.msra.gmra.mrb[4].mxu1 %v1881_v46  ;;  %v2108_v46 = vsel %vm770_vm4, %v2102_v45, %v2103_v63 }
 0x2d7   :  { %5616 = vmatpush3.bf16.msra.mxu1 %v6210_v55  ;;  %5631 = vmatprep.mubr.bf16.mxu1 %v1999_v6  ;;  %v2107_v55 = vsel %vm770_vm4, %v2103_v63, %v2104_v57  ;;  %v8105_v6 = vld [vmem:[#allocation15_spill] sm:$0xff] }
 0x2d8   :  { %5617 = vmatprep.subr.bf16.mxu1 %v6211_v29 }
 0x2db   :  { %5618 = vmatpush3.bf16.msra.mxu1 %v6211_v29  ;;  %v6218_v29 = vld [vmem:[%s8065_s3 + $0x380] sm:$0xff]  }
 0x2dc   :  { %5619 = vmatprep.subr.bf16.mxu1 %v6212_v36 }
 0x2df   :  { %5620 = vmatpush3.bf16.msra.mxu1 %v6212_v36  ;;  %v2110_v36 = vmul.f32 %v2108_v46, %v8105_v6  ;;  %v6223_v46 = vld [vmem:[%s8065_s3 + $0x3a8] sm:$0xff]  }
 0x2e0   :  { %5621 = vmatprep.subr.bf16.mxu1 %v6213_v10 }
 0x2e3   :  { %5622 = vmatpush3.bf16.msra.mxu1 %v6213_v10  ;;  %v8106_v10 = vld [vmem:[#allocation17_spill] sm:$0xff] }
 0x2e4   :  { %5623 = vmatprep.subr.bf16.mxu1 %v6214_v8 }
 0x2e7   :  { %5624 = vmatpush3.bf16.msra.mxu1 %v6214_v8  ;;  %v2111_v8 = vmul.f32 %v2107_v55, %v8106_v10  ;;  %v6222_v55 = vld [vmem:[%s8065_s3 + $0x3a0] sm:$0xff]  }
 0x2e8   :  { %5625 = vmatprep.subr.bf16.mxu1 %v6215_v2 }
 0x2e9   :  { %v2130_v63 = vpack.c.bf16 %v2111_v8, %v2110_v36  ;;  %v6225_v36 = vld [vmem:[%s8065_s3 + $0x3b8] sm:$0xff]  }
 0x2eb   :  { %5626 = vmatpush3.bf16.msra.mxu1 %v6215_v2  ;;  %v2000_v2 = vpack.c.bf16 %v7138_v13, %v7133_v3 }
 0x2ec   :  { %5627 = vmatprep.subr.bf16.mxu1 %v6216_v39 }
 0x2ef   :  { %5628 = vmatpush3.bf16.msra.mxu1 %v6216_v39  ;;  %v6220_v39 = vld [vmem:[%s8065_s3 + $0x390] sm:$0xff]  }
 0x2f0   :  { %5629 = vmatprep.subr.bf16.mxu1 %v6217_v22 }
 0x2f3   :  { %5630 = vmatpush3.bf16.msra.mxu1 %v6217_v22  ;;  %v6221_v22 = vld [vmem:[%s8065_s3 + $0x398] sm:$0xff]  }
 0x2f4   :  { %5635 = vmatprep.subr.bf16.mxu1 %v6218_v29 }
 0x2f6   :  { %5632 = vmatmul.mubr.bf16.vlgmr.msra.gmra.mrb[4].mxu1 %v2000_v2 }
 0x2f7   :  { %5636 = vmatpush3.bf16.msra.mxu1 %v6218_v29  ;;  %5651 = vmatprep.mubr.bf16.mxu1 %v2130_v63  ;;  %v2105_v29 = vrot.slane %v7138_v13, 1  ;;  %v8107_v63 = vld [vmem:[#allocation16_spill] sm:$0xff] }
 0x2f8   :  { %5637 = vmatprep.subr.bf16.mxu1 %v6219_v21 }
 0x2f9   :  { %v2106_v8 = vsel %vm770_vm4, %v2104_v57, %v2105_v29  ;;  %v2109_v2 = vsel %vm770_vm4, %v2105_v29, %v2102_v45  ;;  %v6227_v57 = vld [vmem:[%s8065_s3 + $0x3c8] sm:$0xff]   ;;  %v6228_v45 = vld [vmem:[%s8065_s3 + $0x3d0] sm:$0xff]   ;;  %v6234_v29 = vld [vmem:[%s8065_s3 + $0x400] sm:$0xff]  }
 0x2fb   :  { %5638 = vmatpush3.bf16.msra.mxu1 %v6219_v21  ;;  %v6224_v21 = vld [vmem:[%s8065_s3 + $0x3b0] sm:$0xff]  }
 0x2fc   :  { %5639 = vmatprep.subr.bf16.mxu1 %v6220_v39 }
 0x2ff   :  { %5640 = vmatpush3.bf16.msra.mxu1 %v6220_v39  ;;  %v2112_v39 = vmul.f32 %v2106_v8, %v8107_v63  ;;  %v6236_v8 = vld [vmem:[%s8065_s3 + $0x410] sm:$0xff]  }
 0x300   :  { %5641 = vmatprep.subr.bf16.mxu1 %v6221_v22 }
 0x303   :  { %5642 = vmatpush3.bf16.msra.mxu1 %v6221_v22  ;;  %v8108_v22 = vld [vmem:[#allocation18_spill] sm:$0xff] }
 0x304   :  { %5643 = vmatprep.subr.bf16.mxu1 %v6222_v55 }
 0x307   :  { %5644 = vmatpush3.bf16.msra.mxu1 %v6222_v55  ;;  %v2113_v55 = vmul.f32 %v2109_v2, %v8108_v22  ;;  %v6237_v2 = vld [vmem:[%s8065_s3 + $0x418] sm:$0xff]  }
 0x308   :  { %5645 = vmatprep.subr.bf16.mxu1 %v6223_v46 }
 0x309   :  { %v2131_v62 = vpack.c.bf16 %v2113_v55, %v2112_v39  ;;  %v8109_v39 = vpack.c.bf16 %v7238_v5, %v7230_v60  ;;  %v6244_v55 = vld [vmem:[%s8065_s3 + $0x450] sm:$0xff]   ;;  %v8110_v5 = vpack.c.bf16 %v7214_v7, %v7242_v43  ;;  %v6253_v7 = vld [vmem:[%s8065_s3 + $0x4d8] sm:$0xff]   ;;  %v6254_v43 = vld [vmem:[%s8065_s3 + $0x4e0] sm:$0xff]  }
 0x30a   :  { %v6248_v60 = vld [vmem:[%s8065_s3 + $0x470] sm:$0xff]  }
 0x30b   :  { %5646 = vmatpush3.bf16.msra.mxu1 %v6223_v46  ;;  %v6226_v46 = vld [vmem:[%s8065_s3 + $0x3c0] sm:$0xff]  }
 0x30c   :  { %5647 = vmatprep.subr.bf16.mxu1 %v6224_v21 }
 0x30f   :  { %5648 = vmatpush3.bf16.msra.mxu1 %v6224_v21  ;;  %v6229_v21 = vld [vmem:[%s8065_s3 + $0x3d8] sm:$0xff]  }
 0x310   :  { %5649 = vmatprep.subr.bf16.mxu1 %v6225_v36 }
 0x313   :  { %5650 = vmatpush3.bf16.msra.mxu1 %v6225_v36  ;;  %v6235_v36 = vld [vmem:[%s8065_s3 + $0x408] sm:$0xff]  }
 0x314   :  { %5655 = vmatprep.subr.bf16.mxu1 %v6226_v46 }
 0x316   :  { %5652 = vmatmul.mubr.bf16.vlgmr.msra.gmra.mrb[4].mxu1 %v2131_v62  ;;  %v6230_v62 = vld [vmem:[%s8065_s3 + $0x3e0] sm:$0xff]  }
 0x317   :  { %5656 = vmatpush3.bf16.msra.mxu1 %v6226_v46  ;;  %5671 = vmatprep.mubr.bf16.mxu1 %v2253_v20  ;;  %v6233_v20 = vld [vmem:[%s8065_s3 + $0x3f8] sm:$0xff]  }
 0x318   :  { %5657 = vmatprep.subr.bf16.mxu1 %v6227_v57  ;;  %v6245_v46 = vld [vmem:[%s8065_s3 + $0x458] sm:$0xff]  }
 0x31b   :  { %5658 = vmatpush3.bf16.msra.mxu1 %v6227_v57  ;;  %v6250_v57 = vld [vmem:[%s8065_s3 + $0x4c0] sm:$0xff]  }
 0x31c   :  { %5659 = vmatprep.subr.bf16.mxu1 %v6228_v45  ;;  %5715 = vmatprep.subr.bf16.mxu0 %v6250_v57 }
 0x31d   :  { %5716 = vmatpush3.bf16.msra.mxu0 %v6250_v57 }
 0x31f   :  { %5660 = vmatpush3.bf16.msra.mxu1 %v6228_v45  ;;  %v6251_v45 = vld [vmem:[%s8065_s3 + $0x4c8] sm:$0xff]  }
 0x320   :  { %5661 = vmatprep.subr.bf16.mxu1 %v6229_v21  ;;  %5717 = vmatprep.subr.bf16.mxu0 %v6251_v45 }
 0x321   :  { %5718 = vmatpush3.bf16.msra.mxu0 %v6251_v45 }
 0x323   :  { %5662 = vmatpush3.bf16.msra.mxu1 %v6229_v21  ;;  %v6252_v21 = vld [vmem:[%s8065_s3 + $0x4d0] sm:$0xff]  }
 0x324   :  { %5663 = vmatprep.subr.bf16.mxu1 %v6230_v62  ;;  %5719 = vmatprep.subr.bf16.mxu0 %v6252_v21 }
 0x325   :  { %5720 = vmatpush3.bf16.msra.mxu0 %v6252_v21 }
 0x326   :  { %5721 = vmatprep.subr.bf16.mxu0 %v6253_v7 }
 0x327   :  { %5664 = vmatpush3.bf16.msra.mxu1 %v6230_v62  ;;  %v6255_v62 = vld [vmem:[%s8065_s3 + $0x4e8] sm:$0xff]  }
 0x328   :  { %5665 = vmatprep.subr.bf16.mxu1 %v6231_v15 }
 0x329   :  { %5722 = vmatpush3.bf16.msra.mxu0 %v6253_v7 }
 0x32a   :  { %5723 = vmatprep.subr.bf16.mxu0 %v6254_v43 }
 0x32b   :  { %5666 = vmatpush3.bf16.msra.mxu1 %v6231_v15  ;;  %v6256_v15 = vld [vmem:[%s8065_s3 + $0x4f0] sm:$0xff]  }
 0x32c   :  { %5667 = vmatprep.subr.bf16.mxu1 %v6232_v48 }
 0x32d   :  { %5724 = vmatpush3.bf16.msra.mxu0 %v6254_v43 }
 0x32e   :  { %5725 = vmatprep.subr.bf16.mxu0 %v6255_v62 }
 0x32f   :  { %5668 = vmatpush3.bf16.msra.mxu1 %v6232_v48  ;;  %v6257_v48 = vld [vmem:[%s8065_s3 + $0x4f8] sm:$0xff]  }
 0x330   :  { %5669 = vmatprep.subr.bf16.mxu1 %v6233_v20 }
 0x331   :  { %5726 = vmatpush3.bf16.msra.mxu0 %v6255_v62 }
 0x332   :  { %5727 = vmatprep.subr.bf16.mxu0 %v6256_v15 }
 0x333   :  { %5670 = vmatpush3.bf16.msra.mxu1 %v6233_v20  ;;  %v7517_v20 = vld [vmem:[%s8065_s3 + $0x480] sm:$0xff]  }
 0x334   :  { %5675 = vmatprep.subr.bf16.mxu1 %v6234_v29 }
 0x335   :  { %5728 = vmatpush3.bf16.msra.mxu0 %v6256_v15 }
 0x336   :  { %5672 = vmatmul.mubr.bf16.vlgmr.msra.gmra.mrb[4].mxu1 %v2254_v52  ;;  %v6242_v52 = vld [vmem:[%s8065_s3 + $0x440] sm:$0xff]   ;;  %5729 = vmatprep.subr.bf16.mxu0 %v6257_v48 }
 0x337   :  { %5676 = vmatpush3.bf16.msra.mxu1 %v6234_v29  ;;  %5691 = vmatprep.mubr.bf16.mxu1 %v2376_v27  ;;  %v6243_v27 = vld [vmem:[%s8065_s3 + $0x448] sm:$0xff]   ;;  %v4786_v29 = vld [vmem:[%s8066_s4 + $0x4] ss:$0 sm:$0xff] }
 0x338   :  { %5677 = vmatprep.subr.bf16.mxu1 %v6235_v36 }
 0x339   :  { %5730 = vmatpush3.bf16.msra.mxu0 %v6257_v48 }
 0x33a   :  { %5735 = vmatprep.subr.bf16.mxu0 %v7517_v20 }
 0x33b   :  { %5678 = vmatpush3.bf16.msra.mxu1 %v6235_v36 }
 0x33c   :  { %5679 = vmatprep.subr.bf16.mxu1 %v6236_v8 }
 0x33f   :  { %5680 = vmatpush3.bf16.msra.mxu1 %v6236_v8 }
 0x340   :  { %5681 = vmatprep.subr.bf16.mxu1 %v6237_v2 }
 0x343   :  { %5682 = vmatpush3.bf16.msra.mxu1 %v6237_v2 }
 0x344   :  { %5683 = vmatprep.subr.bf16.mxu1 %v6238_v9 }
 0x347   :  { %5684 = vmatpush3.bf16.msra.mxu1 %v6238_v9 }
 0x348   :  { %5685 = vmatprep.subr.bf16.mxu1 %v6239_v17 }
 0x34b   :  { %5686 = vmatpush3.bf16.msra.mxu1 %v6239_v17 }
 0x34c   :  { %5687 = vmatprep.subr.bf16.mxu1 %v6240_v31 }
 0x34f   :  { %5688 = vmatpush3.bf16.msra.mxu1 %v6240_v31 }
 0x350   :  { %5689 = vmatprep.subr.bf16.mxu1 %v6241_v4 }
 0x353   :  { %5690 = vmatpush3.bf16.msra.mxu1 %v6241_v4 }
 0x354   :  { %5695 = vmatprep.subr.bf16.mxu1 %v6242_v52 }
 0x356   :  { %5692 = vmatmul.mubr.bf16.vlgmr.msra.gmra.mrb[4].mxu1 %v2377_v24  ;;  %v6249_v24 = vld [vmem:[%s8065_s3 + $0x478] sm:$0xff]  }
 0x357   :  { %5696 = vmatpush3.bf16.msra.mxu1 %v6242_v52  ;;  %5711 = vmatprep.mubr.bf16.mxu1 %v8109_v39 }
 0x358   :  { %5697 = vmatprep.subr.bf16.mxu1 %v6243_v27 }
 0x35b   :  { %5698 = vmatpush3.bf16.msra.mxu1 %v6243_v27 }
 0x35c   :  { %5699 = vmatprep.subr.bf16.mxu1 %v6244_v55 }
 0x35f   :  { %5700 = vmatpush3.bf16.msra.mxu1 %v6244_v55 }
 0x360   :  { %5701 = vmatprep.subr.bf16.mxu1 %v6245_v46 }
 0x363   :  { %5702 = vmatpush3.bf16.msra.mxu1 %v6245_v46 }
 0x364   :  { %5703 = vmatprep.subr.bf16.mxu1 %v6246_v1 }
 0x367   :  { %5704 = vmatpush3.bf16.msra.mxu1 %v6246_v1 }
 0x368   :  { %5705 = vmatprep.subr.bf16.mxu1 %v6247_v56 }
 0x36b   :  { %5706 = vmatpush3.bf16.msra.mxu1 %v6247_v56 }
 0x36c   :  { %5707 = vmatprep.subr.bf16.mxu1 %v6248_v60 }
 0x36f   :  { %5708 = vmatpush3.bf16.msra.mxu1 %v6248_v60 }
 0x370   :  { %5709 = vmatprep.subr.bf16.mxu1 %v6249_v24 }
 0x373   :  { %5710 = vmatpush3.bf16.msra.mxu1 %v6249_v24 }
 0x376   :  { %5712 = vmatmul.mubr.bf16.vlgmr.msra.gmra.mrb[4].mxu1 %v8110_v5 }
 0x449   :  { %v5713_v36 = vpop.f32.mrb[4].mxu1 }
 0x44a   :  { %v7523_v8 = vadd.f32 %v5713_v36, %v4786_v29  ;;  %v2583_v2 = vpop.f32.mrb[5].mxu1 }
 0x44b   :  { %v7525_v9 = vadd.f32 %v4786_v29, %v2583_v2  ;;  %v5714_v17 = vpop.f32.mrb[6].mxu1 }
 0x44c   :  { %v7528_v31 = vmul.f32 0.70710677, %v7523_v8  ;;  %v7530_v4 = vadd.f32 %v5714_v17, %v4786_v29  ;;  %v2586_v52 = vpop.f32.mrb[7].mxu1 }
 0x44d   :  { %v7533_v27 = vmul.f32 0.70710677, %v7525_v9  ;;  %v7539_v46 = vadd.f32 %v4786_v29, %v2586_v52 }
 0x44e   :  { %v2630_v39 = vand.u32 2147483647, %v7528_v31  ;;  %v7537_v55 = vmul.f32 0.70710677, %v7530_v4  ;;  %vm2622_vm9 = vcmp.ge.f32.partialorder %v7528_v31, 0.0 }
 0x44f   :  { %v2628_v1 = vand.u32 2147483647, %v7533_v27  ;;  %v7544_v57 = vmul.f32 0.70710677, %v7539_v46  ;;  %vm2620_vm10 = vcmp.ge.f32.partialorder %v7533_v27, 0.0  ;;  %v2614_v27 = vmul.f32 0.5, %v7523_v8 }
 0x450   :  { %v2634_v56 = vmul.f32 0.3275911, %v2630_v39  ;;  %v2631_v24 = vand.u32 2147483647, %v7537_v55  ;;  %v2682_v48 = vsub.f32 0.0, %v2630_v39  ;;  %vm2623_vm11 = vcmp.ge.f32.partialorder %v7537_v55, 0.0 }
 0x451   :  { %v2632_v60 = vmul.f32 0.3275911, %v2628_v1  ;;  %v2629_v7 = vand.u32 2147483647, %v7544_v57  ;;  %v2680_v29 = vsub.f32 0.0, %v2628_v1  ;;  %vm2621_vm12 = vcmp.ge.f32.partialorder %v7544_v57, 0.0 }
 0x452   :  { %v2638_v5 = vadd.f32 1.0, %v2634_v56  ;;  %v2635_v21 = vmul.f32 0.3275911, %v2631_v24  ;;  %v2686_v2 = vmul.f32 %v2682_v48, %v2630_v39  ;;  %v2683_v17 = vsub.f32 0.0, %v2631_v24  ;;  %v4790_v8 = vld [vmem:[%s8066_s4 + $0x6] ss:$0 sm:$0xff] }
 0x453   :  { %v2636_v45 = vadd.f32 1.0, %v2632_v60  ;;  %v2633_v62 = vmul.f32 0.3275911, %v2629_v7  ;;  %v2684_v22 = vmul.f32 %v2680_v29, %v2628_v1  ;;  %v2681_v60 = vsub.f32 0.0, %v2629_v7 }
 0x454   :  { %6370 = vrcp.f32 %v2638_v5  ;;  %v2639_v43 = vadd.f32 1.0, %v2635_v21  ;;  %v2692_v6 = vmul.f32 1.442695, %v2686_v2 }
 0x455   :  { %6372 = vrcp.f32 %v2636_v45  ;;  %v2637_v15 = vadd.f32 1.0, %v2633_v62  ;;  %v2687_v45 = vmul.f32 %v2683_v17, %v2631_v24  ;;  %v2688_v35 = vmul.f32 1.442695, %v2684_v22 }
 0x456   :  { %6374 = vrcp.f32 %v2639_v43 }
 0x457   :  { %6376 = vrcp.f32 %v2637_v15  ;;  %v2685_v15 = vmul.f32 %v2681_v60, %v2629_v7  ;;  %v2694_v40 = vmul.f32 1.442695, %v2687_v45 }
 0x458   :  { %6378 = vpow2.f32 %v2692_v6 }
 0x459   :  { %6380 = vpow2.f32 %v2688_v35  ;;  %v2690_v2 = vmul.f32 1.442695, %v2685_v15 }
 0x45a   :  { %6382 = vpow2.f32 %v2694_v40 }
 0x45b   :  { %6384 = vpow2.f32 %v2690_v2 }
 0x45e   :  { %v6371_v36 = vpop.eup %6370 }
 0x45f   :  { %v6373_v52 = vpop.eup %6372  ;;  %v2646_v56 = vmul.f32 1.0614054, %v6371_v36 }
 0x460   :  { %v2644_v63 = vmul.f32 1.0614054, %v6373_v52  ;;  %v6375_v5 = vpop.eup %6374 }
 0x461   :  { %v2650_v10 = vadd.f32 -1.4531521, %v2646_v56  ;;  %v2647_v43 = vmul.f32 1.0614054, %v6375_v5  ;;  %v6377_v62 = vpop.eup %6376 }
 0x462   :  { %v2648_v47 = vadd.f32 -1.4531521, %v2644_v63  ;;  %v2645_v39 = vmul.f32 1.0614054, %v6377_v62 }
 0x463   :  { %v2654_v21 = vmul.f32 %v6371_v36, %v2650_v10  ;;  %v2651_v49 = vadd.f32 -1.4531521, %v2647_v43  ;;  %v6379_v43 = vpop.eup %6378 }
 0x464   :  { %v2652_v37 = vmul.f32 %v6373_v52, %v2648_v47  ;;  %v2649_v56 = vadd.f32 -1.4531521, %v2645_v39  ;;  %v6381_v39 = vpop.eup %6380 }
 0x465   :  { %v2658_v61 = vadd.f32 1.4214138, %v2654_v21  ;;  %v2655_v29 = vmul.f32 %v6375_v5, %v2651_v49 }
 0x466   :  { %v2656_v48 = vadd.f32 1.4214138, %v2652_v37  ;;  %v2653_v10 = vmul.f32 %v6377_v62, %v2649_v56 }
 0x467   :  { %v2662_v1 = vmul.f32 %v6371_v36, %v2658_v61  ;;  %v2659_v24 = vadd.f32 1.4214138, %v2655_v29 }
 0x468   :  { %v2660_v50 = vmul.f32 %v6373_v52, %v2656_v48  ;;  %v2657_v7 = vadd.f32 1.4214138, %v2653_v10 }
 0x469   :  { %v2666_v63 = vadd.f32 -0.28449672, %v2662_v1  ;;  %v2663_v47 = vmul.f32 %v6375_v5, %v2659_v24  ;;  %v8111_v24 = vmov -1.0  }
 0x46a   :  { %v2664_v22 = vadd.f32 -0.28449672, %v2660_v50  ;;  %v2661_v37 = vmul.f32 %v6377_v62, %v2657_v7  ;;  %v2626_v10 = vsel %vm2622_vm9, 1.0, %v8111_v24  ;;  %v2627_v55 = vsel %vm2623_vm11, 1.0, %v8111_v24 }
 0x46b   :  { %v2670_v17 = vmul.f32 %v6371_v36, %v2666_v63  ;;  %v2667_v6 = vadd.f32 -0.28449672, %v2663_v47  ;;  %v6383_v63 = vpop.eup %6382  ;;  %v2625_v57 = vsel %vm2621_vm12, 1.0, %v8111_v24 }
 0x46c   :  { %v2668_v60 = vmul.f32 %v6373_v52, %v2664_v22  ;;  %v2665_v49 = vadd.f32 -0.28449672, %v2661_v37  ;;  %v6385_v47 = vpop.eup %6384  ;;  %v2612_v37 = vmul.f32 0.5, %v7525_v9 }
 0x46d   :  { %v2674_v21 = vadd.f32 0.2548296, %v2670_v17  ;;  %v2671_v35 = vmul.f32 %v6375_v5, %v2667_v6  ;;  %v4788_v6 = vld [vmem:[%s8066_s4 + $0x5] ss:$0 sm:$0xff] }
 0x46e   :  { %v2672_v45 = vadd.f32 0.2548296, %v2668_v60  ;;  %v2669_v50 = vmul.f32 %v6377_v62, %v2665_v49 }
 0x46f   :  { %v2678_v61 = vmul.f32 %v6371_v36, %v2674_v21  ;;  %v2675_v40 = vadd.f32 0.2548296, %v2671_v35  ;;  %v2624_v36 = vsel %vm2620_vm10, 1.0, %v8111_v24 }
 0x470   :  { %v2676_v15 = vmul.f32 %v6373_v52, %v2672_v45  ;;  %v2673_v2 = vadd.f32 0.2548296, %v2669_v50 }
 0x471   :  { %v2698_v48 = vmul.f32 %v6379_v43, %v2678_v61  ;;  %v2679_v56 = vmul.f32 %v6375_v5, %v2675_v40 }
 0x472   :  { %v2696_v1 = vmul.f32 %v6381_v39, %v2676_v15  ;;  %v2677_v52 = vmul.f32 %v6377_v62, %v2673_v2  ;;  %v2615_v15 = vmul.f32 0.5, %v7530_v4 }
 0x473   :  { %v2702_v29 = vsub.f32 1.0, %v2698_v48  ;;  %v2699_v31 = vmul.f32 %v6383_v63, %v2679_v56 }
 0x474   :  { %v2700_v22 = vsub.f32 1.0, %v2696_v1  ;;  %v2697_v5 = vmul.f32 %v6385_v47, %v2677_v52  ;;  %v2613_v1 = vmul.f32 0.5, %v7539_v46 }
 0x475   :  { %v2706_v17 = vmul.f32 %v2702_v29, %v2626_v10  ;;  %v2703_v21 = vsub.f32 1.0, %v2699_v31 }
 0x476   :  { %v2704_v7 = vmul.f32 %v2700_v22, %v2624_v36  ;;  %v2701_v35 = vsub.f32 1.0, %v2697_v5 }
 0x477   :  { %v2710_v60 = vadd.f32 1.0, %v2706_v17  ;;  %v2707_v62 = vmul.f32 %v2703_v21, %v2627_v55 }
 0x478   :  { %v2708_v45 = vadd.f32 1.0, %v2704_v7  ;;  %v2705_v48 = vmul.f32 %v2701_v35, %v2625_v57 }
 0x479   :  { %v2714_v61 = vmul.f32 %v2710_v60, %v2614_v27  ;;  %v2711_v39 = vadd.f32 1.0, %v2707_v62 }
 0x47a   :  { %v2712_v49 = vmul.f32 %v2708_v45, %v2612_v37  ;;  %v2709_v29 = vadd.f32 1.0, %v2705_v48 }
 0x47b   :  { %v2723_v43 = vmul.f32 %v4788_v6, %v2714_v61  ;;  %v2715_v50 = vmul.f32 %v2711_v39, %v2615_v15 }
 0x47c   :  { %v2721_v40 = vmul.f32 %v4788_v6, %v2712_v49  ;;  %v2713_v63 = vmul.f32 %v2709_v29, %v2613_v1  ;;  %v6259_v49 = vld [vmem:[%s8065_s3 + $0x488] sm:$0xff]  }
 0x47d   :  { %v2732_v9 = vadd.f32 %v4790_v8, %v2723_v43  ;;  %v2724_v2 = vmul.f32 %v4788_v6, %v2715_v50 }
 0x47e   :  { %v2730_v56 = vadd.f32 %v4790_v8, %v2721_v40  ;;  %v2722_v17 = vmul.f32 %v4788_v6, %v2713_v63 }
 0x47f   :  { %v7569_v36 = vadd.f32 %v2732_v9, %v7133_v3  ;;  %v2733_v22 = vadd.f32 %v4790_v8, %v2724_v2 }
 0x480   :  { %v7566_v10 = vadd.f32 %v2730_v56, %v7128_v33  ;;  %v2731_v31 = vadd.f32 %v4790_v8, %v2722_v17 }
 0x481   :  { %v7572_v4 = vadd.f32 %v2733_v22, %v7138_v13  ;;  %v2771_v33 = vrot.slane %v7569_v36, 4  ;;  %v2995_v48 = vrot.slane %v7569_v36, 5 }
 0x482   :  { %v2769_v52 = vrot.slane %v7566_v10, 4  ;;  %v2738_v46 = vrot.slane %v7566_v10, 3  ;;  %v7577_v47 = vadd.f32 %v2731_v31, %v7142_v44  ;;  %v2993_v43 = vrot.slane %v7566_v10, 5 }
 0x483   :  { %v2772_v27 = vrot.slane %v7572_v4, 4  ;;  %v2741_v3 = vrot.slane %v7572_v4, 3  ;;  %v2996_v15 = vrot.slane %v7572_v4, 5 }
 0x484   :  { %v2770_v7 = vrot.slane %v7577_v47, 4  ;;  %v2739_v21 = vrot.slane %v7577_v47, 3 }
 0x485   :  { %v2776_v13 = vsel %vm114_vm2, %v2772_v27, %v2769_v52  ;;  %v2773_v60 = vsel %vm114_vm2, %v2771_v33, %v2772_v27  ;;  %v2745_v6 = vsel %vm63_vm3, %v2741_v3, %v2738_v46  ;;  %v3000_v40 = vsel %vm355_vm0, %v2996_v15, %v2993_v43  ;;  %v6265_v27 = vld [vmem:[%s8065_s3 + $0x4b8] sm:$0xff]  }
 0x486   :  { %v2777_v5 = vmul.f32 %v2776_v13, %v6783_v38  ;;  %v2780_v44 = vmul.f32 %v2773_v60, %v6824_v11  ;;  %v2775_v37 = vsel %vm114_vm2, %v2769_v52, %v2770_v7  ;;  %v2774_v45 = vsel %vm114_vm2, %v2770_v7, %v2771_v33  ;;  %v6266_v7 = vld [vmem:[%s8065_s3 + $0x500] sm:$0xff]  }
 0x487   :  { %v2744_v55 = vsel %vm63_vm3, %v2738_v46, %v2739_v21  ;;  %v2778_v61 = vmul.f32 %v2775_v37, %v6773_v28  ;;  %v2779_v62 = vmul.f32 %v2774_v45, %v6811_v0  ;;  %v2746_v38 = vmul.f32 %v2745_v6, %v6879_v54 }
 0x488   :  { %v2747_v11 = vmul.f32 %v2744_v55, %v6860_v42  ;;  %v2740_v28 = vrot.slane %v7569_v36, 3  ;;  %v2994_v0 = vrot.slane %v7577_v47, 5  ;;  %v6260_v42 = vld [vmem:[%s8065_s3 + $0x490] sm:$0xff]   ;;  %v7624_v9 = vmul.f32 %v2776_v13, %v6843_v26 }
 0x489   :  { %v2797_v35 = vpack.c.bf16 %v2778_v61, %v2777_v5  ;;  %v2798_v8 = vpack.c.bf16 %v2780_v44, %v2779_v62  ;;  %v7630_v1 = vsel %vm355_vm0, %v2995_v48, %v2996_v15  ;;  %v7640_v26 = vmul.f32 %v2744_v55, %v6745_v12  ;;  %v6267_v44 = vld [vmem:[%s8065_s3 + $0x508] sm:$0xff]   ;;  %v6274_v15 = vld [vmem:[%s8065_s3 + $0x540] sm:$0xff]  }
 0x48a   :  { %v2767_v57 = vpack.c.bf16 %v2747_v11, %v2746_v38  ;;  %v2742_v54 = vsel %vm63_vm3, %v2740_v28, %v2741_v3  ;;  %v2743_v39 = vsel %vm63_vm3, %v2739_v21, %v2740_v28  ;;  %v2999_v50 = vsel %vm355_vm0, %v2993_v43, %v2994_v0  ;;  %v6273_v38 = vld [vmem:[%s8065_s3 + $0x538] sm:$0xff]   ;;  %v8115_v28 = vld [vmem:[#allocation12_spill] sm:$0xff] }
 0x48b   :  { %5731 = vmatprep.mubr.bf16.mxu0 %v2797_v35  ;;  %v7637_v29 = vsel %vm355_vm0, %v2994_v0, %v2995_v48  ;;  %v7643_v56 = vmul.f32 %v2743_v39, %v6754_v16  ;;  %v7646_v2 = vmul.f32 %v2742_v54, %v6767_v23  ;;  %v7649_v63 = vmul.f32 %v3000_v40, %v7036_v30  ;;  %v6275_v48 = vld [vmem:[%s8065_s3 + $0x548] sm:$0xff]  }
 0x48c   :  { %5732 = vmatmul.mubr.bf16.vlgmr.msra.gmra.mrb[4].mxu0 %v2798_v8  ;;  %v7652_v22 = vmul.f32 %v2775_v37, %v6791_v53  ;;  %v7655_v17 = vmul.f32 %v2774_v45, %v6803_v59  ;;  %v7658_v31 = vmul.f32 %v2773_v60, %v6831_v18  ;;  %v7665_v23 = vmul.f32 %v2999_v50, %v6891_v14  ;;  %v6262_v14 = vld [vmem:[%s8065_s3 + $0x4a0] sm:$0xff]   ;;  %v8112_v60 = vld [vmem:[#allocation10_spill] sm:$0xff]  ;;  %v6271_v37 = vld [vmem:[%s8065_s3 + $0x528] sm:$0xff]  }
 0x48d   :  { %5736 = vmatpush3.bf16.msra.mxu0 %v7517_v20  ;;  %5751 = vmatprep.mubr.bf16.mxu0 %v2767_v57  ;;  %v7619_v20 = vmul.f32 %v2745_v6, %v6758_v19  ;;  %v6261_v19 = vld [vmem:[%s8065_s3 + $0x498] sm:$0xff]   ;;  %v3525_v12 = vpack.c.bf16 %v7643_v56, %v7640_v26  ;;  %v7673_v18 = vmul.f32 %v7637_v29, %v6901_v25  ;;  %v6263_v25 = vld [vmem:[%s8065_s3 + $0x4a8] sm:$0xff]   ;;  %v6272_v45 = vld [vmem:[%s8065_s3 + $0x530] sm:$0xff]   ;;  %v3124_v55 = vrot.slane %v7566_v10, 7 }
 0x48e   :  { %5737 = vmatprep.subr.bf16.mxu0 %v6259_v49  ;;  %v3648_v53 = vpack.c.bf16 %v7655_v17, %v7652_v22  ;;  %v3649_v59 = vpack.c.bf16 %v7624_v9, %v7658_v31  ;;  %v7677_v30 = vmul.f32 %v7630_v1, %v7038_v34  ;;  %v6264_v34 = vld [vmem:[%s8065_s3 + $0x4b0] sm:$0xff]   ;;  %v2748_v33 = vmul.f32 %v2743_v39, %v6915_v58  ;;  %v6270_v58 = vld [vmem:[%s8065_s3 + $0x520] sm:$0xff]   ;;  %v6303_v26 = vld [vmem:[%s8065_s3 + $0x628] sm:$0xff]  }
 0x48f   :  { %v3526_v16 = vpack.c.bf16 %v7619_v20, %v7646_v2  ;;  %v3771_v52 = vpack.c.bf16 %v7673_v18, %v7665_v23  ;;  %v2749_v3 = vmul.f32 %v2742_v54, %v6913_v51  ;;  %v3001_v13 = vmul.f32 %v3000_v40, %v6671_v41  ;;  %v6268_v51 = vld [vmem:[%s8065_s3 + $0x510] sm:$0xff]   ;;  %v6269_v41 = vld [vmem:[%s8065_s3 + $0x518] sm:$0xff]   ;;  %v8113_v8 = vld [vmem:[#allocation8_spill] sm:$0xff] }
 0x490   :  { %v3772_v46 = vpack.c.bf16 %v7649_v63, %v7677_v30  ;;  %v3002_v21 = vmul.f32 %v2999_v50, %v8112_v60  ;;  %v3125_v61 = vrot.slane %v7577_v47, 7  ;;  %v3127_v62 = vrot.slane %v7572_v4, 7  ;;  %v8114_v57 = vld [vmem:[#allocation9_spill] sm:$0xff]  ;;  %v6310_v20 = vld [vmem:[%s8065_s3 + $0x660] sm:$0xff]   ;;  %v6313_v17 = vld [vmem:[%s8065_s3 + $0x678] sm:$0xff]  }
 0x491   :  { %5738 = vmatpush3.bf16.msra.mxu0 %v6259_v49  ;;  %v2768_v5 = vpack.c.bf16 %v2749_v3, %v2748_v33  ;;  %v3003_v49 = vmul.f32 %v7637_v29, %v8113_v8  ;;  %v3004_v43 = vmul.f32 %v7630_v1, %v8114_v57  ;;  %v6276_v50 = vld [vmem:[%s8065_s3 + $0x550] sm:$0xff]   ;;  %v6277_v1 = vld [vmem:[%s8065_s3 + $0x558] sm:$0xff]   ;;  %v6279_v29 = vld [vmem:[%s8065_s3 + $0x568] sm:$0xff]   ;;  %vm4031_vm2 = vcmask 1040384  }
 0x492   :  { %5739 = vmatprep.subr.bf16.mxu0 %v6260_v42  ;;  %v3021_v6 = vpack.c.bf16 %v3002_v21, %v3001_v13  ;;  %v3130_v11 = vsel %vm503_vm1, %v3124_v55, %v3125_v61  ;;  %v3131_v35 = vsel %vm503_vm1, %v3127_v62, %v3124_v55  ;;  %v8117_v3 = vld [vmem:[#allocation13_spill] sm:$0xff]  ;;  %v8118_v13 = vld [vmem:[#allocation14_spill] sm:$0xff]  ;;  %v6282_v21 = vld [vmem:[%s8065_s3 + $0x580] sm:$0xff]   ;;  %v3375_v55 = vrot.slane %v7577_v47, 1 }
 0x493   :  { %v3132_v0 = vmul.f32 %v3131_v35, %v8115_v28  ;;  %v3022_v39 = vpack.c.bf16 %v3004_v43, %v3003_v49  ;;  %v6290_v8 = vld [vmem:[%s8065_s3 + $0x5c0] sm:$0xff]   ;;  %v8120_v43 = vld [vmem:[#allocation17_spill] sm:$0xff]  ;;  %v3272_v28 = vpack.c.bf16 %v7572_v4, %v7569_v36 }
 0x494   :  { %v8119_v49 = vld [vmem:[#allocation15_spill] sm:$0xff]  ;;  %v6304_v56 = vld [vmem:[%s8065_s3 + $0x630] sm:$0xff]   ;;  %v6311_v2 = vld [vmem:[%s8065_s3 + $0x668] sm:$0xff]  }
 0x495   :  { %5740 = vmatpush3.bf16.msra.mxu0 %v6260_v42  ;;  %v8116_v42 = vld [vmem:[#allocation11_spill] sm:$0xff]  ;;  %v6312_v22 = vld [vmem:[%s8065_s3 + $0x670] sm:$0xff]   ;;  %v6319_v31 = vld [vmem:[%s8065_s3 + $0x6a8] sm:$0xff]  }
 0x496   :  { %5741 = vmatprep.subr.bf16.mxu0 %v6261_v19  ;;  %v3133_v54 = vmul.f32 %v3130_v11, %v8116_v42  ;;  %v6318_v9 = vld [vmem:[%s8065_s3 + $0x6a0] sm:$0xff]   ;;  %v6320_v23 = vld [vmem:[%s8065_s3 + $0x6b0] sm:$0xff]   ;;  %v6327_v30 = vld [vmem:[#allocation2 + $0x28] sm:$0xff]  }
 0x497   :  { %v6322_v18 = vld [vmem:[#allocation2] sm:$0xff]  }
 0x498   :  { %v3152_v40 = vpack.c.bf16 %v3133_v54, %v3132_v0  ;;  %v6291_v0 = vld [vmem:[%s8065_s3 + $0x5c8] sm:$0xff]   ;;  %v6292_v54 = vld [vmem:[%s8065_s3 + $0x5d0] sm:$0xff]   ;;  %v6326_v63 = vld [vmem:[#allocation2 + $0x20] sm:$0xff]  }
 0x499   :  { %5742 = vmatpush3.bf16.msra.mxu0 %v6261_v19  ;;  %v6278_v19 = vld [vmem:[%s8065_s3 + $0x560] sm:$0xff]  }
 0x49a   :  { %5743 = vmatprep.subr.bf16.mxu0 %v6262_v14 }
 0x49d   :  { %5744 = vmatpush3.bf16.msra.mxu0 %v6262_v14  ;;  %v6280_v14 = vld [vmem:[%s8065_s3 + $0x570] sm:$0xff]  }
 0x49e   :  { %5745 = vmatprep.subr.bf16.mxu0 %v6263_v25 }
 0x4a1   :  { %5746 = vmatpush3.bf16.msra.mxu0 %v6263_v25  ;;  %v3126_v25 = vrot.slane %v7569_v36, 7 }
 0x4a2   :  { %5747 = vmatprep.subr.bf16.mxu0 %v6264_v34 }
 0x4a3   :  { %v3129_v33 = vsel %vm503_vm1, %v3125_v61, %v3126_v25  ;;  %v6289_v61 = vld [vmem:[%s8065_s3 + $0x5b8] sm:$0xff]  }
 0x4a5   :  { %5748 = vmatpush3.bf16.msra.mxu0 %v6264_v34  ;;  %v6281_v34 = vld [vmem:[%s8065_s3 + $0x578] sm:$0xff]  }
 0x4a6   :  { %5749 = vmatprep.subr.bf16.mxu0 %v6265_v27 }
 0x4a9   :  { %5750 = vmatpush3.bf16.msra.mxu0 %v6265_v27  ;;  %v3128_v27 = vsel %vm503_vm1, %v3126_v25, %v3127_v62  ;;  %v3374_v62 = vrot.slane %v7566_v10, 1  ;;  %v8121_v25 = vld [vmem:[#allocation16_spill] sm:$0xff] }
 0x4aa   :  { %5755 = vmatprep.subr.bf16.mxu0 %v6266_v7  ;;  %v3135_v60 = vmul.f32 %v3128_v27, %v8118_v13  ;;  %v8122_v27 = vld [vmem:[#allocation18_spill] sm:$0xff]  ;;  %v6299_v13 = vld [vmem:[%s8065_s3 + $0x608] sm:$0xff]  }
 0x4ab   :  { %v3380_v35 = vsel %vm770_vm4, %v3374_v62, %v3375_v55 }
 0x4ac   :  { %5752 = vmatmul.mubr.bf16.vlgmr.msra.gmra.mrb[4].mxu0 %v2768_v5  ;;  %v3382_v57 = vmul.f32 %v3380_v35, %v8119_v49 }
 0x4ad   :  { %5756 = vmatpush3.bf16.msra.mxu0 %v6266_v7  ;;  %5771 = vmatprep.mubr.bf16.mxu0 %v3021_v6  ;;  %v3134_v7 = vmul.f32 %v3129_v33, %v8117_v3  ;;  %v3271_v6 = vpack.c.bf16 %v7577_v47, %v7566_v10  ;;  %v6298_v3 = vld [vmem:[%s8065_s3 + $0x600] sm:$0xff]  }
 0x4ae   :  { %5757 = vmatprep.subr.bf16.mxu0 %v6267_v44 }
 0x4af   :  { %v3153_v5 = vpack.c.bf16 %v3135_v60, %v3134_v7  ;;  %v6301_v60 = vld [vmem:[%s8065_s3 + $0x618] sm:$0xff]  }
 0x4b1   :  { %5758 = vmatpush3.bf16.msra.mxu0 %v6267_v44  ;;  %v6283_v44 = vld [vmem:[%s8065_s3 + $0x588] sm:$0xff]  }
 0x4b2   :  { %5759 = vmatprep.subr.bf16.mxu0 %v6268_v51 }
 0x4b5   :  { %5760 = vmatpush3.bf16.msra.mxu0 %v6268_v51  ;;  %v6284_v51 = vld [vmem:[%s8065_s3 + $0x590] sm:$0xff]  }
 0x4b6   :  { %5761 = vmatprep.subr.bf16.mxu0 %v6269_v41 }
 0x4b9   :  { %5762 = vmatpush3.bf16.msra.mxu0 %v6269_v41  ;;  %v6285_v41 = vld [vmem:[%s8065_s3 + $0x598] sm:$0xff]  }
 0x4ba   :  { %5763 = vmatprep.subr.bf16.mxu0 %v6270_v58 }
 0x4bd   :  { %5764 = vmatpush3.bf16.msra.mxu0 %v6270_v58  ;;  %v6286_v58 = vld [vmem:[%s8065_s3 + $0x5a0] sm:$0xff]  }
 0x4be   :  { %5765 = vmatprep.subr.bf16.mxu0 %v6271_v37 }
 0x4c1   :  { %5766 = vmatpush3.bf16.msra.mxu0 %v6271_v37  ;;  %v6287_v37 = vld [vmem:[%s8065_s3 + $0x5a8] sm:$0xff]  }
 0x4c2   :  { %5767 = vmatprep.subr.bf16.mxu0 %v6272_v45 }
 0x4c5   :  { %5768 = vmatpush3.bf16.msra.mxu0 %v6272_v45  ;;  %v6288_v45 = vld [vmem:[%s8065_s3 + $0x5b0] sm:$0xff]  }
 0x4c6   :  { %5769 = vmatprep.subr.bf16.mxu0 %v6273_v38 }
 0x4c9   :  { %5770 = vmatpush3.bf16.msra.mxu0 %v6273_v38  ;;  %v3376_v38 = vrot.slane %v7569_v36, 1 }
 0x4ca   :  { %5775 = vmatprep.subr.bf16.mxu0 %v6274_v15 }
 0x4cb   :  { %v3379_v11 = vsel %vm770_vm4, %v3375_v55, %v3376_v38  ;;  %v6325_v55 = vld [vmem:[#allocation2 + $0x18] sm:$0xff]  }
 0x4cc   :  { %5772 = vmatmul.mubr.bf16.vlgmr.msra.gmra.mrb[4].mxu0 %v3022_v39  ;;  %v6293_v39 = vld [vmem:[%s8065_s3 + $0x5d8] sm:$0xff]  }
 0x4cd   :  { %5776 = vmatpush3.bf16.msra.mxu0 %v6274_v15  ;;  %5791 = vmatprep.mubr.bf16.mxu0 %v3152_v40  ;;  %v3383_v15 = vmul.f32 %v3379_v11, %v8120_v43  ;;  %v6295_v40 = vld [vmem:[%s8065_s3 + $0x5e8] sm:$0xff]  }
 0x4ce   :  { %5777 = vmatprep.subr.bf16.mxu0 %v6275_v48 }
 0x4cf   :  { %v3402_v42 = vpack.c.bf16 %v3383_v15, %v3382_v57 }
 0x4d1   :  { %5778 = vmatpush3.bf16.msra.mxu0 %v6275_v48  ;;  %v6294_v48 = vld [vmem:[%s8065_s3 + $0x5e0] sm:$0xff]  }
 0x4d2   :  { %5779 = vmatprep.subr.bf16.mxu0 %v6276_v50 }
 0x4d5   :  { %5780 = vmatpush3.bf16.msra.mxu0 %v6276_v50  ;;  %v6296_v50 = vld [vmem:[%s8065_s3 + $0x5f0] sm:$0xff]  }
 0x4d6   :  { %5781 = vmatprep.subr.bf16.mxu0 %v6277_v1 }
 0x4d9   :  { %5782 = vmatpush3.bf16.msra.mxu0 %v6277_v1  ;;  %v3377_v1 = vrot.slane %v7572_v4, 1 }
 0x4da   :  { %5783 = vmatprep.subr.bf16.mxu0 %v6278_v19 }
 0x4dd   :  { %5784 = vmatpush3.bf16.msra.mxu0 %v6278_v19  ;;  %v6297_v19 = vld [vmem:[%s8065_s3 + $0x5f8] sm:$0xff]  }
 0x4de   :  { %5785 = vmatprep.subr.bf16.mxu0 %v6279_v29 }
 0x4e1   :  { %5786 = vmatpush3.bf16.msra.mxu0 %v6279_v29  ;;  %v3378_v29 = vsel %vm770_vm4, %v3376_v38, %v3377_v1 }
 0x4e2   :  { %5787 = vmatprep.subr.bf16.mxu0 %v6280_v14 }
 0x4e5   :  { %5788 = vmatpush3.bf16.msra.mxu0 %v6280_v14  ;;  %v3381_v14 = vsel %vm770_vm4, %v3377_v1, %v3374_v62  ;;  %v5008_v62 = vld [vmem:[%s8066_s4 + $0x8] ss:$0 sm:$0xff] }
 0x4e6   :  { %5789 = vmatprep.subr.bf16.mxu0 %v6281_v34  ;;  %v3385_v33 = vmul.f32 %v3381_v14, %v8122_v27 }
 0x4e9   :  { %5790 = vmatpush3.bf16.msra.mxu0 %v6281_v34  ;;  %v3384_v34 = vmul.f32 %v3378_v29, %v8121_v25 }
 0x4ea   :  { %5795 = vmatprep.subr.bf16.mxu0 %v6282_v21 }
 0x4eb   :  { %v3403_v7 = vpack.c.bf16 %v3385_v33, %v3384_v34 }
 0x4ec   :  { %5792 = vmatmul.mubr.bf16.vlgmr.msra.gmra.mrb[4].mxu0 %v3153_v5  ;;  %v6306_v5 = vld [vmem:[%s8065_s3 + $0x640] sm:$0xff]  }
 0x4ed   :  { %5796 = vmatpush3.bf16.msra.mxu0 %v6282_v21  ;;  %5811 = vmatprep.mubr.bf16.mxu0 %v3271_v6  ;;  %v6302_v21 = vld [vmem:[%s8065_s3 + $0x620] sm:$0xff]   ;;  %v6308_v6 = vld [vmem:[%s8065_s3 + $0x650] sm:$0xff]  }
 0x4ee   :  { %5797 = vmatprep.subr.bf16.mxu0 %v6283_v44 }
 0x4f1   :  { %5798 = vmatpush3.bf16.msra.mxu0 %v6283_v44  ;;  %v6307_v44 = vld [vmem:[%s8065_s3 + $0x648] sm:$0xff]  }
 0x4f2   :  { %5799 = vmatprep.subr.bf16.mxu0 %v6284_v51 }
 0x4f5   :  { %5800 = vmatpush3.bf16.msra.mxu0 %v6284_v51  ;;  %v6309_v51 = vld [vmem:[%s8065_s3 + $0x658] sm:$0xff]  }
 0x4f6   :  { %5801 = vmatprep.subr.bf16.mxu0 %v6285_v41 }
 0x4f9   :  { %5802 = vmatpush3.bf16.msra.mxu0 %v6285_v41  ;;  %v6316_v41 = vld [vmem:[%s8065_s3 + $0x690] sm:$0xff]  }
 0x4fa   :  { %5803 = vmatprep.subr.bf16.mxu0 %v6286_v58 }
 0x4fd   :  { %5804 = vmatpush3.bf16.msra.mxu0 %v6286_v58  ;;  %v6317_v58 = vld [vmem:[%s8065_s3 + $0x698] sm:$0xff]  }
 0x4fe   :  { %5805 = vmatprep.subr.bf16.mxu0 %v6287_v37 }
 0x501   :  { %5806 = vmatpush3.bf16.msra.mxu0 %v6287_v37  ;;  %v6323_v37 = vld [vmem:[#allocation2 + $0x8] sm:$0xff]  }
 0x502   :  { %5807 = vmatprep.subr.bf16.mxu0 %v6288_v45 }
 0x505   :  { %5808 = vmatpush3.bf16.msra.mxu0 %v6288_v45  ;;  %v6324_v45 = vld [vmem:[#allocation2 + $0x10] sm:$0xff]  }
 0x506   :  { %5809 = vmatprep.subr.bf16.mxu0 %v6289_v61 }
 0x509   :  { %5810 = vmatpush3.bf16.msra.mxu0 %v6289_v61  ;;  %v6329_v61 = vld [vmem:[#allocation2 + $0x38] sm:$0xff]  }
 0x50a   :  { %5815 = vmatprep.subr.bf16.mxu0 %v6290_v8 }
 0x50c   :  { %5812 = vmatmul.mubr.bf16.vlgmr.msra.gmra.mrb[4].mxu0 %v3272_v28 }
 0x50d   :  { %5816 = vmatpush3.bf16.msra.mxu0 %v6290_v8  ;;  %5831 = vmatprep.mubr.bf16.mxu0 %v3402_v42 }
 0x50e   :  { %5817 = vmatprep.subr.bf16.mxu0 %v6291_v0 }
 0x511   :  { %5818 = vmatpush3.bf16.msra.mxu0 %v6291_v0 }
 0x512   :  { %5819 = vmatprep.subr.bf16.mxu0 %v6292_v54 }
 0x515   :  { %5820 = vmatpush3.bf16.msra.mxu0 %v6292_v54 }
 0x516   :  { %5821 = vmatprep.subr.bf16.mxu0 %v6293_v39 }
 0x519   :  { %5822 = vmatpush3.bf16.msra.mxu0 %v6293_v39 }
 0x51a   :  { %5823 = vmatprep.subr.bf16.mxu0 %v6294_v48 }
 0x51d   :  { %5824 = vmatpush3.bf16.msra.mxu0 %v6294_v48 }
 0x51e   :  { %5825 = vmatprep.subr.bf16.mxu0 %v6295_v40 }
 0x521   :  { %5826 = vmatpush3.bf16.msra.mxu0 %v6295_v40 }
 0x522   :  { %5827 = vmatprep.subr.bf16.mxu0 %v6296_v50 }
 0x525   :  { %5828 = vmatpush3.bf16.msra.mxu0 %v6296_v50 }
 0x526   :  { %5829 = vmatprep.subr.bf16.mxu0 %v6297_v19 }
 0x529   :  { %5830 = vmatpush3.bf16.msra.mxu0 %v6297_v19 }
 0x52a   :  { %5835 = vmatprep.subr.bf16.mxu0 %v6298_v3 }
 0x52c   :  { %5832 = vmatmul.mubr.bf16.vlgmr.msra.gmra.mrb[4].mxu0 %v3403_v7 }
 0x52d   :  { %5836 = vmatpush3.bf16.msra.mxu0 %v6298_v3  ;;  %5851 = vmatprep.mubr.bf16.mxu0 %v3525_v12  ;;  %v6305_v12 = vld [vmem:[%s8065_s3 + $0x638] sm:$0xff]  }
 0x52e   :  { %5837 = vmatprep.subr.bf16.mxu0 %v6299_v13 }
 0x531   :  { %5838 = vmatpush3.bf16.msra.mxu0 %v6299_v13 }
 0x532   :  { %5839 = vmatprep.subr.bf16.mxu0 %v6300_v32 }
 0x535   :  { %5840 = vmatpush3.bf16.msra.mxu0 %v6300_v32 }
 0x536   :  { %5841 = vmatprep.subr.bf16.mxu0 %v6301_v60 }
 0x539   :  { %5842 = vmatpush3.bf16.msra.mxu0 %v6301_v60 }
 0x53a   :  { %5843 = vmatprep.subr.bf16.mxu0 %v6302_v21 }
 0x53d   :  { %5844 = vmatpush3.bf16.msra.mxu0 %v6302_v21 }
 0x53e   :  { %5845 = vmatprep.subr.bf16.mxu0 %v6303_v26 }
 0x541   :  { %5846 = vmatpush3.bf16.msra.mxu0 %v6303_v26 }
 0x542   :  { %5847 = vmatprep.subr.bf16.mxu0 %v6304_v56 }
 0x545   :  { %5848 = vmatpush3.bf16.msra.mxu0 %v6304_v56 }
 0x546   :  { %5849 = vmatprep.subr.bf16.mxu0 %v6305_v12 }
 0x549   :  { %5850 = vmatpush3.bf16.msra.mxu0 %v6305_v12 }
 0x54a   :  { %5855 = vmatprep.subr.bf16.mxu0 %v6306_v5 }
 0x54c   :  { %5852 = vmatmul.mubr.bf16.vlgmr.msra.gmra.mrb[4].mxu0 %v3526_v16  ;;  %v6314_v16 = vld [vmem:[%s8065_s3 + $0x680] sm:$0xff]  }
 0x54d   :  { %5856 = vmatpush3.bf16.msra.mxu0 %v6306_v5  ;;  %5871 = vmatprep.mubr.bf16.mxu0 %v3648_v53  ;;  %v6315_v53 = vld [vmem:[%s8065_s3 + $0x688] sm:$0xff]  }
 0x54e   :  { %5857 = vmatprep.subr.bf16.mxu0 %v6307_v44 }
 0x551   :  { %5858 = vmatpush3.bf16.msra.mxu0 %v6307_v44 }
 0x552   :  { %5859 = vmatprep.subr.bf16.mxu0 %v6308_v6 }
 0x555   :  { %5860 = vmatpush3.bf16.msra.mxu0 %v6308_v6 }
 0x556   :  { %5861 = vmatprep.subr.bf16.mxu0 %v6309_v51 }
 0x559   :  { %5862 = vmatpush3.bf16.msra.mxu0 %v6309_v51 }
 0x55a   :  { %5863 = vmatprep.subr.bf16.mxu0 %v6310_v20 }
 0x55d   :  { %5864 = vmatpush3.bf16.msra.mxu0 %v6310_v20 }
 0x55e   :  { %5865 = vmatprep.subr.bf16.mxu0 %v6311_v2 }
 0x561   :  { %5866 = vmatpush3.bf16.msra.mxu0 %v6311_v2 }
 0x562   :  { %5867 = vmatprep.subr.bf16.mxu0 %v6312_v22 }
 0x565   :  { %5868 = vmatpush3.bf16.msra.mxu0 %v6312_v22 }
 0x566   :  { %5869 = vmatprep.subr.bf16.mxu0 %v6313_v17 }
 0x569   :  { %5870 = vmatpush3.bf16.msra.mxu0 %v6313_v17 }
 0x56a   :  { %5875 = vmatprep.subr.bf16.mxu0 %v6314_v16 }
 0x56c   :  { %5872 = vmatmul.mubr.bf16.vlgmr.msra.gmra.mrb[4].mxu0 %v3649_v59  ;;  %v6321_v59 = vld [vmem:[%s8065_s3 + $0x6b8] sm:$0xff]  }
 0x56d   :  { %5876 = vmatpush3.bf16.msra.mxu0 %v6314_v16  ;;  %5891 = vmatprep.mubr.bf16.mxu0 %v3771_v52  ;;  %v6470_v52 = vmov 0.0  }
 0x56e   :  { %5877 = vmatprep.subr.bf16.mxu0 %v6315_v53  ;;  %5895 = vmatprep.subr.bf16.mxu1 %v6470_v52 }
 0x56f   :  { %5911 = vmatprep.mubr.msk.bf16.mxu1 %vm6471_vm13, %v6470_v52  ;;  %5896 = vmatpush3.bf16.msra.mxu1 %v6322_v18 }
 0x570   :  { %5897 = vmatprep.subr.bf16.mxu1 %v6470_v52 }
 0x571   :  { %5878 = vmatpush3.bf16.msra.mxu0 %v6315_v53 }
 0x572   :  { %5879 = vmatprep.subr.bf16.mxu0 %v6316_v41 }
 0x573   :  { %5898 = vmatpush3.bf16.msra.mxu1 %v6323_v37 }
 0x574   :  { %5899 = vmatprep.subr.bf16.mxu1 %v6470_v52 }
 0x575   :  { %5880 = vmatpush3.bf16.msra.mxu0 %v6316_v41 }
 0x576   :  { %5881 = vmatprep.subr.bf16.mxu0 %v6317_v58 }
 0x577   :  { %5900 = vmatpush3.bf16.msra.mxu1 %v6324_v45 }
 0x578   :  { %5901 = vmatprep.subr.bf16.mxu1 %v6470_v52 }
 0x579   :  { %5882 = vmatpush3.bf16.msra.mxu0 %v6317_v58 }
 0x57a   :  { %5883 = vmatprep.subr.bf16.mxu0 %v6318_v9 }
 0x57b   :  { %5902 = vmatpush3.bf16.msra.mxu1 %v6325_v55 }
 0x57c   :  { %5903 = vmatprep.subr.bf16.mxu1 %v6470_v52 }
 0x57d   :  { %5884 = vmatpush3.bf16.msra.mxu0 %v6318_v9 }
 0x57e   :  { %5885 = vmatprep.subr.bf16.mxu0 %v6319_v31 }
 0x57f   :  { %5904 = vmatpush3.bf16.msra.mxu1 %v6326_v63 }
 0x580   :  { %5905 = vmatprep.subr.bf16.mxu1 %v6470_v52 }
 0x581   :  { %5886 = vmatpush3.bf16.msra.mxu0 %v6319_v31 }
 0x582   :  { %5887 = vmatprep.subr.bf16.mxu0 %v6320_v23 }
 0x583   :  { %5906 = vmatpush3.bf16.msra.mxu1 %v6327_v30 }
 0x584   :  { %5907 = vmatprep.subr.bf16.mxu1 %v6470_v52 }
 0x585   :  { %5888 = vmatpush3.bf16.msra.mxu0 %v6320_v23 }
 0x586   :  { %5889 = vmatprep.subr.bf16.mxu0 %v6321_v59 }
 0x589   :  { %5890 = vmatpush3.bf16.msra.mxu0 %v6321_v59 }
 0x58c   :  { %5892 = vmatmul.mubr.bf16.vlgmr.msra.gmra.mrb[4].mxu0 %v3772_v46  ;;  %v6328_v46 = vld [vmem:[#allocation2 + $0x30] sm:$0xff]  }
 0x58d   :  { %5908 = vmatpush3.bf16.msra.mxu1 %v6328_v46 }
 0x58e   :  { %5909 = vmatprep.subr.bf16.mxu1 %v6470_v52 }
 0x591   :  { %5910 = vmatpush3.bf16.msra.mxu1 %v6329_v61 }
 0x592   :  { %5915 = vmatprep.subr.bf16.mxu1 %v6470_v52 }
 0x65f   :  { %v5893_v38 = vpop.f32.mrb[4].mxu0 }
 0x660   :  { %v7939_v11 = vadd.f32 %v5893_v38, %v5008_v62  ;;  %v3855_v35 = vpop.f32.mrb[5].mxu0 }
 0x661   :  { %v7941_v8 = vadd.f32 %v5008_v62, %v3855_v35  ;;  %v5894_v49 = vpop.f32.mrb[6].mxu0 }
 0x662   :  { %v7944_v57 = vmul.f32 0.70710677, %v7939_v11  ;;  %v7946_v43 = vadd.f32 %v5894_v49, %v5008_v62  ;;  %v3858_v15 = vpop.f32.mrb[7].mxu0 }
 0x663   :  { %v7949_v28 = vmul.f32 0.70710677, %v7941_v8  ;;  %v7955_v54 = vadd.f32 %v5008_v62, %v3858_v15 }
 0x664   :  { %v3902_v0 = vand.u32 2147483647, %v7944_v57  ;;  %v7953_v42 = vmul.f32 0.70710677, %v7946_v43  ;;  %vm3894_vm14 = vcmp.ge.f32.partialorder %v7944_v57, 0.0 }
 0x665   :  { %v3900_v39 = vand.u32 2147483647, %v7949_v28  ;;  %v7960_v19 = vmul.f32 0.70710677, %v7955_v54  ;;  %vm3892_vm15 = vcmp.ge.f32.partialorder %v7949_v28, 0.0  ;;  %v3886_v28 = vmul.f32 0.5, %v7939_v11 }
 0x666   :  { %v3906_v48 = vmul.f32 0.3275911, %v3902_v0  ;;  %v3903_v50 = vand.u32 2147483647, %v7953_v42  ;;  %v3954_v3 = vsub.f32 0.0, %v3902_v0  ;;  %vm3895_vm0 = vcmp.ge.f32.partialorder %v7953_v42, 0.0 }
 0x667   :  { %v3904_v40 = vmul.f32 0.3275911, %v3900_v39  ;;  %v3901_v25 = vand.u32 2147483647, %v7960_v19  ;;  %v3952_v7 = vsub.f32 0.0, %v3900_v39  ;;  %vm3893_vm1 = vcmp.ge.f32.partialorder %v7960_v19, 0.0 }
 0x668   :  { %v3910_v1 = vadd.f32 1.0, %v3906_v48  ;;  %v3907_v14 = vmul.f32 0.3275911, %v3903_v50  ;;  %v3958_v32 = vmul.f32 %v3954_v3, %v3902_v0  ;;  %v3955_v60 = vsub.f32 0.0, %v3903_v50  ;;  %v5012_v11 = vld [vmem:[%s8066_s4 + $0xa] ss:$0 sm:$0xff] }
 0x669   :  { %v3908_v29 = vadd.f32 1.0, %v3904_v40  ;;  %v3905_v27 = vmul.f32 0.3275911, %v3901_v25  ;;  %v3956_v56 = vmul.f32 %v3952_v7, %v3900_v39  ;;  %v3953_v5 = vsub.f32 0.0, %v3901_v25 }
 0x66a   :  { %6386 = vrcp.f32 %v3910_v1  ;;  %v3911_v34 = vadd.f32 1.0, %v3907_v14  ;;  %v3964_v51 = vmul.f32 1.442695, %v3958_v32  ;;  %v3959_v2 = vmul.f32 %v3955_v60, %v3903_v50 }
 0x66b   :  { %6388 = vrcp.f32 %v3908_v29  ;;  %v3909_v33 = vadd.f32 1.0, %v3905_v27  ;;  %v3960_v17 = vmul.f32 1.442695, %v3956_v56  ;;  %v3957_v58 = vmul.f32 %v3953_v5, %v3901_v25 }
 0x66c   :  { %6390 = vrcp.f32 %v3911_v34  ;;  %v3966_v18 = vmul.f32 1.442695, %v3959_v2  ;;  %v3898_v5 = vsel %vm3894_vm14, 1.0, %v8111_v24  ;;  %v3899_v42 = vsel %vm3895_vm0, 1.0, %v8111_v24 }
 0x66d   :  { %6392 = vrcp.f32 %v3909_v33  ;;  %v3962_v30 = vmul.f32 1.442695, %v3957_v58  ;;  %v3897_v19 = vsel %vm3893_vm1, 1.0, %v8111_v24 }
 0x66e   :  { %6394 = vpow2.f32 %v3964_v51 }
 0x66f   :  { %6396 = vpow2.f32 %v3960_v17 }
 0x670   :  { %6398 = vpow2.f32 %v3966_v18  ;;  %v3887_v18 = vmul.f32 0.5, %v7946_v43 }
 0x671   :  { %6400 = vpow2.f32 %v3962_v30  ;;  %v3885_v30 = vmul.f32 0.5, %v7955_v54 }
 0x674   :  { %v6387_v13 = vpop.eup %6386 }
 0x675   :  { %v6389_v21 = vpop.eup %6388  ;;  %v3918_v26 = vmul.f32 1.0614054, %v6387_v13 }
 0x676   :  { %v3916_v12 = vmul.f32 1.0614054, %v6389_v21  ;;  %v6391_v6 = vpop.eup %6390 }
 0x677   :  { %v3922_v44 = vadd.f32 -1.4531521, %v3918_v26  ;;  %v3919_v16 = vmul.f32 1.0614054, %v6391_v6  ;;  %v6393_v53 = vpop.eup %6392 }
 0x678   :  { %v3920_v20 = vadd.f32 -1.4531521, %v3916_v12  ;;  %v3917_v23 = vmul.f32 1.0614054, %v6393_v53  ;;  %v6395_v25 = vpop.eup %6394 }
 0x679   :  { %v3926_v22 = vmul.f32 %v6387_v13, %v3922_v44  ;;  %v3923_v31 = vadd.f32 -1.4531521, %v3919_v16  ;;  %v6397_v27 = vpop.eup %6396  ;;  %v5010_v16 = vld [vmem:[%s8066_s4 + $0x9] ss:$0 sm:$0xff] }
 0x67a   :  { %v3924_v41 = vmul.f32 %v6389_v21, %v3920_v20  ;;  %v3921_v55 = vadd.f32 -1.4531521, %v3917_v23  ;;  %v6399_v12 = vpop.eup %6398 }
 0x67b   :  { %v3930_v9 = vadd.f32 1.4214138, %v3926_v22  ;;  %v3927_v45 = vmul.f32 %v6391_v6, %v3923_v31  ;;  %v6401_v20 = vpop.eup %6400 }
 0x67c   :  { %v3928_v59 = vadd.f32 1.4214138, %v3924_v41  ;;  %v3925_v62 = vmul.f32 %v6393_v53, %v3921_v55  ;;  %v3884_v41 = vmul.f32 0.5, %v7941_v8 }
 0x67d   :  { %v3934_v37 = vmul.f32 %v6387_v13, %v3930_v9  ;;  %v3931_v61 = vadd.f32 1.4214138, %v3927_v45 }
 0x67e   :  { %v3932_v63 = vmul.f32 %v6389_v21, %v3928_v59  ;;  %v3929_v15 = vadd.f32 1.4214138, %v3925_v62 }
 0x67f   :  { %v3938_v46 = vadd.f32 -0.28449672, %v3934_v37  ;;  %v3935_v49 = vmul.f32 %v6391_v6, %v3931_v61 }
 0x680   :  { %v3936_v38 = vadd.f32 -0.28449672, %v3932_v63  ;;  %v3933_v40 = vmul.f32 %v6393_v53, %v3929_v15 }
 0x681   :  { %v3942_v35 = vmul.f32 %v6387_v13, %v3938_v46  ;;  %v3939_v48 = vadd.f32 -0.28449672, %v3935_v49 }
 0x682   :  { %v3940_v0 = vmul.f32 %v6389_v21, %v3936_v38  ;;  %v3937_v14 = vadd.f32 -0.28449672, %v3933_v40 }
 0x683   :  { %v3946_v39 = vadd.f32 0.2548296, %v3942_v35  ;;  %v3943_v29 = vmul.f32 %v6391_v6, %v3939_v48 }
 0x684   :  { %v3944_v50 = vadd.f32 0.2548296, %v3940_v0  ;;  %v3941_v7 = vmul.f32 %v6393_v53, %v3937_v14 }
 0x685   :  { %v3950_v1 = vmul.f32 %v6387_v13, %v3946_v39  ;;  %v3947_v3 = vadd.f32 0.2548296, %v3943_v29  ;;  %v3896_v13 = vsel %vm3892_vm15, 1.0, %v8111_v24 }
 0x686   :  { %v3948_v34 = vmul.f32 %v6389_v21, %v3944_v50  ;;  %v3945_v56 = vadd.f32 0.2548296, %v3941_v7 }
 0x687   :  { %v3970_v33 = vmul.f32 %v6395_v25, %v3950_v1  ;;  %v3951_v26 = vmul.f32 %v6391_v6, %v3947_v3 }
 0x688   :  { %v3968_v32 = vmul.f32 %v6397_v27, %v3948_v34  ;;  %v3949_v21 = vmul.f32 %v6393_v53, %v3945_v56 }
 0x689   :  { %v3974_v60 = vsub.f32 1.0, %v3970_v33  ;;  %v3971_v57 = vmul.f32 %v6399_v12, %v3951_v26  ;;  %v6330_v12 = vld [vmem:[#allocation2 + $0x40] sm:$0xff]  }
 0x68a   :  { %v3972_v44 = vsub.f32 1.0, %v3968_v32  ;;  %v3969_v6 = vmul.f32 %v6401_v20, %v3949_v21  ;;  %v6335_v21 = vld [vmem:[#allocation2 + $0x68] sm:$0xff]   ;;  %v6336_v20 = vld [vmem:[#allocation2 + $0x70] sm:$0xff]  }
 0x68b   :  { %v3978_v51 = vmul.f32 %v3974_v60, %v3898_v5  ;;  %v3975_v17 = vsub.f32 1.0, %v3971_v57  ;;  %v6334_v57 = vld [vmem:[#allocation2 + $0x60] sm:$0xff]  }
 0x68c   :  { %v3976_v2 = vmul.f32 %v3972_v44, %v3896_v13  ;;  %v3973_v31 = vsub.f32 1.0, %v3969_v6  ;;  %v6331_v13 = vld [vmem:[#allocation2 + $0x48] sm:$0xff]   ;;  %v6332_v44 = vld [vmem:[#allocation2 + $0x50] sm:$0xff]  }
 0x68d   :  { %v3982_v22 = vadd.f32 1.0, %v3978_v51  ;;  %v3979_v53 = vmul.f32 %v3975_v17, %v3899_v42  ;;  %v6333_v51 = vld [vmem:[#allocation2 + $0x58] sm:$0xff]   ;;  %v6338_v42 = vld [vmem:[#allocation2 + $0x80] sm:$0xff]  }
 0x68e   :  { %v3980_v58 = vadd.f32 1.0, %v3976_v2  ;;  %v3977_v45 = vmul.f32 %v3973_v31, %v3897_v19  ;;  %v5013_v2 = vld [vmem:[%s8068_s6] ss:$0 sm:$0xff]  ;;  %v6340_v31 = vld [vmem:[#allocation2 + $0x90] sm:$0xff]   ;;  %v6343_v19 = vld [vmem:[#allocation2 + $0xa8] sm:$0xff]  }
 0x68f   :  { %v3986_v9 = vmul.f32 %v3982_v22, %v3886_v28  ;;  %v3983_v37 = vadd.f32 1.0, %v3979_v53  ;;  %v6337_v28 = vld [vmem:[#allocation2 + $0x78] sm:$0xff]   ;;  %v6339_v53 = vld [vmem:[#allocation2 + $0x88] sm:$0xff]  }
 0x690   :  { %v3984_v23 = vmul.f32 %v3980_v58, %v3884_v41  ;;  %v3981_v46 = vadd.f32 1.0, %v3977_v45 }
 0x691   :  { %v3995_v59 = vmul.f32 %v5010_v16, %v3986_v9  ;;  %v3987_v63 = vmul.f32 %v3983_v37, %v3887_v18  ;;  %v6345_v18 = vld [vmem:[#allocation2 + $0xb8] sm:$0xff]   ;;  %v5022_v37 = vld [vmem:[%s8068_s6 + $0x1] ss:$0 sm:$0xff] }
 0x692   :  { %v3993_v55 = vmul.f32 %v5010_v16, %v3984_v23  ;;  %v3985_v38 = vmul.f32 %v3981_v46, %v3885_v30  ;;  %v6342_v23 = vld [vmem:[#allocation2 + $0xa0] sm:$0xff]  }
 0x693   :  { %v4004_v8 = vadd.f32 %v5012_v11, %v3995_v59  ;;  %v3996_v62 = vmul.f32 %v5010_v16, %v3987_v63  ;;  %v6344_v59 = vld [vmem:[#allocation2 + $0xb0] sm:$0xff]  }
 0x694   :  { %v4002_v61 = vadd.f32 %v5012_v11, %v3993_v55  ;;  %v3994_v15 = vmul.f32 %v5010_v16, %v3985_v38  ;;  %v6347_v38 = vld [vmem:[%s8069_s7 + $0x8] sm:$0xff]  }
 0x695   :  { %v4008_v35 = vadd.f32 %v4004_v8, %v7569_v36  ;;  %v4005_v49 = vadd.f32 %v5012_v11, %v3996_v62 }
 0x696   :  { %v4006_v24 = vadd.f32 %v4002_v61, %v7566_v10  ;;  %v4003_v43 = vadd.f32 %v5012_v11, %v3994_v15  ;;  %v6341_v11 = vld [vmem:[#allocation2 + $0x98] sm:$0xff]   ;;  %v6346_v61 = vld [vmem:[%s8069_s7] sm:$0xff]  }
 0x697   :  { %v4009_v0 = vadd.f32 %v4005_v49, %v7572_v4  ;;  %6402 = vtanh.f32 %v4008_v35  ;;  %v6348_v35 = vld [vmem:[%s8069_s7 + $0x10] sm:$0xff]   ;;  %v6349_v49 = vld [vmem:[%s8069_s7 + $0x18] sm:$0xff]   ;;  %v6350_v15 = vld [vmem:[%s8069_s7 + $0x20] sm:$0xff]  }
 0x698   :  { %v4007_v39 = vadd.f32 %v4003_v43, %v7577_v47  ;;  %v6353_v43 = vld [vmem:[%s8069_s7 + $0x38] sm:$0xff]  }
 0x699   :  { %6404 = vtanh.f32 %v4009_v0  ;;  %v6352_v0 = vld [vmem:[%s8069_s7 + $0x30] sm:$0xff]  }
 0x69a   :  { %6406 = vtanh.f32 %v4006_v24  ;;  %v6351_v24 = vld [vmem:[%s8069_s7 + $0x28] sm:$0xff]   ;;  %s6472_s7 = smov [#allocation5]  }
 0x69b   :  { %6408 = vtanh.f32 %v4007_v39  ;;  %v5031_v39 = vld [vmem:[%s8068_s6 + $0x2] ss:$0 sm:$0xff]  ;;  %s4485_s27 = sshll.u32 %s6472_s7, 4  ;;  %s4486_s27 = int_to_ptr.vmem [resolvable:$true] %s4485_s27 }
 0x69c   :  { %s6432_s28 = scalar_lea.vmem %s4486_s27, 32  ;;  %p6437_p9 = scmp.lt.s32.totalorder %s4486_s27, %s4486_s27 }
 0x69d   :  { %p6433_p8 = scmp.ne.s32.totalorder %s4486_s27, %s6432_s28  ;;  %p6438_p10 = scmp.lt.s32.totalorder %s6432_s28, %s6432_s28 }
 0x69f   :  { %p6439_p11 = por %p6438_p10, %p6437_p9 }
 0x6a1   :  { %v6403_v54 = vpop.eup %6402  ;;  %p6440_p12 = pnand %p6439_p11, %p6433_p8 }
 0x6a3   :  { %v6405_v48 = vpop.eup %6404 }
 0x6a4   :  { %v6407_v40 = vpop.eup %6406  ;;  %v4023_v50 = vadd.f32 %v6405_v48, %v6403_v54 }
 0x6a5   :  { %v6409_v1 = vpop.eup %6408 }
 0x6a6   :  { %v4014_v29 = vadd.f32 %v6409_v1, %v6407_v40  ;;  %v4024_v36 = vrot.slane %v4023_v50, 4 }
 0x6a8   :  { %v4015_v14 = vrot.slane %v4014_v29, 4  ;;  %v4025_v25 = vadd.f32 %v4024_v36, %v4023_v50 }
 0x6aa   :  { %v4016_v34 = vadd.f32 %v4015_v14, %v4014_v29  ;;  %v4026_v10 = vrot.slane %v4025_v25, 2  ;;  %v5040_v14 = vld [vmem:[%s8068_s6 + $0x3] ss:$0 sm:$0xff] }
 0x6ac   :  { %v4017_v27 = vrot.slane %v4016_v34, 2  ;;  %v4027_v4 = vadd.f32 %v4026_v10, %v4025_v25 }
 0x6ae   :  { %v4018_v33 = vadd.f32 %v4017_v27, %v4016_v34  ;;  %v4028_v3 = vrot.slane %v4027_v4, 1 }
 0x6b0   :  { %v4019_v7 = vrot.slane %v4018_v33, 1  ;;  %v4029_v32 = vadd.f32 %v4028_v3, %v4027_v4 }
 0x6b2   :  { %v4020_v47 = vadd.f32 %v4019_v7, %v4018_v33  ;;  %v4030_v60 = vmul.f32 0.0625, %v4029_v32 }
 0x6b4   :  { %v4022_v26 = vmul.f32 0.0625, %v4020_v47 }
 0x6b6   :  { %v4032_v56 = vsel %vm4031_vm2, %v4022_v26, %v4030_v60 }
 0x6b7   :  { %v4049_v5 = vpack.c.bf16 %v4032_v56, %v4032_v56 }
 0x6b9   :  { %5912 = vmatmul.mubr.bf16.vlgmr.msra.gmra.mrb[8].mxu1 %v4049_v5 }
 0x6ba   :  { %5916 = vmatpush3.bf16.msra.mxu1 %v6330_v12  ;;  %5931 = vmatprep.mubr.msk.bf16.mxu1 %vm6471_vm13, %v6470_v52 }
 0x6bb   :  { %5917 = vmatprep.subr.bf16.mxu1 %v6470_v52 }
 0x6be   :  { %5918 = vmatpush3.bf16.msra.mxu1 %v6331_v13 }
 0x6bf   :  { %5919 = vmatprep.subr.bf16.mxu1 %v6470_v52 }
 0x6c2   :  { %5920 = vmatpush3.bf16.msra.mxu1 %v6332_v44 }
 0x6c3   :  { %5921 = vmatprep.subr.bf16.mxu1 %v6470_v52 }
 0x6c6   :  { %5922 = vmatpush3.bf16.msra.mxu1 %v6333_v51 }
 0x6c7   :  { %5923 = vmatprep.subr.bf16.mxu1 %v6470_v52 }
 0x6ca   :  { %5924 = vmatpush3.bf16.msra.mxu1 %v6334_v57 }
 0x6cb   :  { %5925 = vmatprep.subr.bf16.mxu1 %v6470_v52 }
 0x6ce   :  { %5926 = vmatpush3.bf16.msra.mxu1 %v6335_v21 }
 0x6cf   :  { %5927 = vmatprep.subr.bf16.mxu1 %v6470_v52 }
 0x6d2   :  { %5928 = vmatpush3.bf16.msra.mxu1 %v6336_v20 }
 0x6d3   :  { %5929 = vmatprep.subr.bf16.mxu1 %v6470_v52 }
 0x6d6   :  { %5930 = vmatpush3.bf16.msra.mxu1 %v6337_v28 }
 0x6d7   :  { %5935 = vmatprep.subr.bf16.mxu1 %v6470_v52 }
 0x78c   :  { %v4137_v22 = vpop.f32.mrb[8].mxu1 }
 0x78d   :  { %v4138_v17 = vadd.f32 %v5013_v2, %v4137_v22  ;;  %v5913_v6 = vpop.f32.mrb[9].mxu1 }
 0x78e   :  { %v4140_v16 = vpop.f32.mrb[10].mxu1 }
 0x78f   :  { %v4143_v41 = vmax.f32 %v4138_v17, 0.0  ;;  %v5914_v58 = vpop.f32.mrb[11].mxu1 }
 0x791   :  { %v4161_v9 = vpack.c.bf16 %v4143_v41, %v4143_v41 }
 0x793   :  { %5932 = vmatmul.mubr.bf16.vlgmr.msra.gmra.mrb[12].mxu1 %v4161_v9 }
 0x794   :  { %5936 = vmatpush3.bf16.msra.mxu1 %v6338_v42  ;;  %5951 = vmatprep.mubr.msk.bf16.mxu1 %vm6471_vm13, %v6470_v52 }
 0x795   :  { %5937 = vmatprep.subr.bf16.mxu1 %v6470_v52 }
 0x798   :  { %5938 = vmatpush3.bf16.msra.mxu1 %v6339_v53 }
 0x799   :  { %5939 = vmatprep.subr.bf16.mxu1 %v6470_v52 }
 0x79c   :  { %5940 = vmatpush3.bf16.msra.mxu1 %v6340_v31 }
 0x79d   :  { %5941 = vmatprep.subr.bf16.mxu1 %v6470_v52 }
 0x7a0   :  { %5942 = vmatpush3.bf16.msra.mxu1 %v6341_v11 }
 0x7a1   :  { %5943 = vmatprep.subr.bf16.mxu1 %v6470_v52 }
 0x7a4   :  { %5944 = vmatpush3.bf16.msra.mxu1 %v6342_v23 }
 0x7a5   :  { %5945 = vmatprep.subr.bf16.mxu1 %v6470_v52 }
 0x7a8   :  { %5946 = vmatpush3.bf16.msra.mxu1 %v6343_v19 }
 0x7a9   :  { %5947 = vmatprep.subr.bf16.mxu1 %v6470_v52 }
 0x7ac   :  { %5948 = vmatpush3.bf16.msra.mxu1 %v6344_v59 }
 0x7ad   :  { %5949 = vmatprep.subr.bf16.mxu1 %v6470_v52 }
 0x7b0   :  { %5950 = vmatpush3.bf16.msra.mxu1 %v6345_v18 }
 0x7b1   :  { %5955 = vmatprep.subr.bf16.mxu1 %v6470_v52 }
 0x866   :  { %v4249_v45 = vpop.f32.mrb[12].mxu1 }
 0x867   :  { %v4250_v55 = vadd.f32 %v5022_v37, %v4249_v45  ;;  %v5933_v8 = vpop.f32.mrb[13].mxu1 }
 0x868   :  { %v4252_v63 = vpop.f32.mrb[14].mxu1 }
 0x869   :  { %v4255_v30 = vmax.f32 %v4250_v55, 0.0  ;;  %v5934_v46 = vpop.f32.mrb[15].mxu1 }
 0x86b   :  { %v4273_v62 = vpack.c.bf16 %v4255_v30, %v4255_v30 }
 0x86d   :  { %5952 = vmatmul.mubr.bf16.vlgmr.msra.gmra.mrb[16].mxu1 %v4273_v62 }
 0x86e   :  { %5956 = vmatpush3.bf16.msra.mxu1 %v6346_v61  ;;  %5971 = vmatprep.mubr.msk.bf16.mxu1 %vm6471_vm13, %v6470_v52 }
 0x86f   :  { %5957 = vmatprep.subr.bf16.mxu1 %v6470_v52 }
 0x872   :  { %5958 = vmatpush3.bf16.msra.mxu1 %v6347_v38 }
 0x873   :  { %5959 = vmatprep.subr.bf16.mxu1 %v6470_v52 }
 0x876   :  { %5960 = vmatpush3.bf16.msra.mxu1 %v6348_v35 }
 0x877   :  { %5961 = vmatprep.subr.bf16.mxu1 %v6470_v52 }
 0x87a   :  { %5962 = vmatpush3.bf16.msra.mxu1 %v6349_v49 }
 0x87b   :  { %5963 = vmatprep.subr.bf16.mxu1 %v6470_v52 }
 0x87e   :  { %5964 = vmatpush3.bf16.msra.mxu1 %v6350_v15 }
 0x87f   :  { %5965 = vmatprep.subr.bf16.mxu1 %v6470_v52 }
 0x882   :  { %5966 = vmatpush3.bf16.msra.mxu1 %v6351_v24 }
 0x883   :  { %5967 = vmatprep.subr.bf16.mxu1 %v6470_v52 }
 0x886   :  { %5968 = vmatpush3.bf16.msra.mxu1 %v6352_v0 }
 0x887   :  { %5969 = vmatprep.subr.bf16.mxu1 %v6470_v52 }
 0x88a   :  { %5970 = vmatpush3.bf16.msra.mxu1 %v6353_v43 }
 0x940   :  { %v4361_v54 = vpop.f32.mrb[16].mxu1 }
 0x941   :  { %v4362_v48 = vadd.f32 %v5031_v39, %v4361_v54  ;;  %v5953_v40 = vpop.f32.mrb[17].mxu1 }
 0x942   :  { %v4364_v50 = vpop.f32.mrb[18].mxu1 }
 0x943   :  { %v4367_v1 = vmax.f32 %v4362_v48, 0.0  ;;  %v5954_v29 = vpop.f32.mrb[19].mxu1 }
 0x945   :  { %v4384_v36 = vpack.c.bf16 %v4367_v1, %v4367_v1 }
 0x947   :  { %5972 = vmatmul.mubr.bf16.vlgmr.msra.gmra.mrb[20].mxu1 %v4384_v36 }
 0xa1a   :  { %v4472_v52 = vpop.f32.mrb[20].mxu1 }
 0xa1b   :  { %v4473_v25 = vadd.f32 %v5040_v14, %v4472_v52  ;;  %v5973_v34 = vpop.f32.mrb[21].mxu1 }
 0xa1c   :  { %v4475_v10 = vpop.f32.mrb[22].mxu1 }
 0xa1d   :  { %4478 = vst [vmem:[#allocation5] sm:$0x3] %v4473_v25  ;;  %v5974_v27 = vpop.f32.mrb[23].mxu1 }
 0xa1e   :  { %6443 = shalt.err (!%p6440_p12)
}
 0xa1f   :  { %s6444_s6 = scalar_lea.hbm %s8070_s8, 32 }
 0xa20   :  { %p6445_p13 = scmp.ne.s32.totalorder %s8070_s8, %s6444_s6  ;;  %p6448_p0 = scmp.lt.u32.totalorder %s6444_s6, %s8070_s8 }
 0xa22   :  { %p6450_p1 = pnand %p6448_p0, %p6445_p13 }
 0xa24   :  { %6453 = shalt.err (!%p6450_p1)
}
 0xa25   :  { %4488 = dma.vmem_to_hbm [thread:$0]  %s4486_s27, 32, %s8070_s8, [#allocation4]  }
 0xa26   :  { %6456 = dma.done.wait [#allocation4], 32  }
 0xa27   :  { %6457 = vsyncadd [#allocation4], 4294967264 }
 0xa28   :  { %4492 = vsyncpa [#allocation3], 1 }
 0xa29   :  { %4493 = vsyncpa [#allocation4], 1 }

</bundles_post_ra>
